<compile_context>
chip_gen: v6e
topology: v6e:2x2x1
jax: 0.10.0
libtpu: 0.0.40
codegen_flags: <defaults>
</compile_context>

<pallas_src>
import numpy as np
import jax
import jax.numpy as jnp
from jax.experimental import pallas as pl
from jax.experimental.pallas import tpu as pltpu

BN_EPS = 1e-5
_VMEM_LIMIT = 32 * 1024 * 1024   # within the scoped-VMEM budget of every TPU generation


# ----------------------------------------------------------------------------
# Kernel 1: bottleneck (BN1+ReLU+1x1) + bilinear x2 upsample + skip add + BN2 + ReLU.
# Output is the blend-conv input: NHWC, zero-padded along W, already activated.
# ----------------------------------------------------------------------------
def _fuse_kernel(skip_ref, xc_ref, xt_ref, xb_ref,
                 s1_ref, b1_ref, w1_ref, s2_ref, b2_ref, o_ref):
    # skip_ref: (TH, WO, Cs)    skip rows of this output-row tile (NHWC)
    # xc_ref  : (TH//2, W, Cm)  low-res rows feeding this tile
    # xt/xb   : (1, W, Cm)      one-row halos; their index_maps are edge-clamped, which
    #                           is exactly the bilinear (align_corners=False) boundary rule
    # o_ref   : (TH, WO+2, Cm)  activated blend-conv input, zero columns at 0 and WO+1
    TH, WO, Cs = skip_ref.shape
    Hh, W, Cm = xc_ref.shape

    # ---- bottleneck: BN1 + ReLU + 1x1 conv (one channel-contraction matmul on the MXU)
    s = skip_ref[...].reshape(TH * WO, Cs).astype(jnp.float32)
    act = jnp.maximum(s * s1_ref[...] + b1_ref[...], 0.0)
    skip_feat = jnp.dot(act, w1_ref[...],
                        preferred_element_type=jnp.float32).reshape(TH, WO, Cm)

    # ---- bilinear x2 upsample (align_corners=False) as 0.25/0.75 VPU blends (no transposes)
    xw = jnp.concatenate([xt_ref[...], xc_ref[...], xb_ref[...]],
                         axis=0).astype(jnp.float32)               # (Hh+2, W, Cm)
    xe = 0.25 * xw[0:Hh] + 0.75 * xw[1:Hh + 1]                     # even output rows
    xo = 0.75 * xw[1:Hh + 1] + 0.25 * xw[2:Hh + 2]                 # odd output rows
    uph = jnp.stack([xe, xo], axis=1).reshape(TH, W, Cm)           # interleave rows
    left = jnp.concatenate([uph[:, :1], uph[:, :W - 1]], axis=1)   # col j-1 (edge clamp)
    right = jnp.concatenate([uph[:, 1:], uph[:, W - 1:]], axis=1)  # col j+1 (edge clamp)
    we = 0.25 * left + 0.75 * uph                                  # even output cols
    wo = 0.75 * uph + 0.25 * right                                 # odd output cols
    up = jnp.stack([we, wo], axis=2).reshape(TH, WO, Cm)           # interleave cols

    # ---- skip add + BN2 + ReLU, then store with the conv's 1-pixel zero columns baked in
    a = jnp.maximum((up + skip_feat) * s2_ref[...] + b2_ref[...], 0.0)
    zcol = jnp.zeros((TH, 1, Cm), jnp.float32)
    o_ref[...] = jnp.concatenate([zcol, a, zcol], axis=1).astype(o_ref.dtype)


# ----------------------------------------------------------------------------
# Kernel 2: 3x3 conv (padding=1) on the pre-activated, W-padded NHWC input.
# Row halos arrive through two extra 1-row BlockSpecs on the same array; the three
# width taps are folded into one K=3*Cin matmul per kernel row (3 fat matmuls/tile).
# ----------------------------------------------------------------------------
def _blend_kernel(top_ref, ctr_ref, bot_ref, w_ref, o_ref, win_ref):
    # top/bot_ref: (1, WOp, Cm), ctr_ref: (TH, WOp, Cm), w_ref: (3, 3*Cm, Co)
    # o_ref: (TH, WO, Co), win_ref: VMEM scratch (TH+2, WOp, Cm)
    i = pl.program_id(1)
    n_tiles = pl.num_programs(1)
    TH, WOp, Cm = ctr_ref.shape
    WO = WOp - 2
    Co = o_ref.shape[-1]

    # Assemble the (TH+2)-row halo window; the image's top/bottom rows are the conv's zero pad.
    win_ref[1:TH + 1] = ctr_ref[...]
    win_ref[0:1] = jnp.where(i == 0, jnp.zeros_like(top_ref[...]), top_ref[...])
    win_ref[TH + 1:TH + 2] = jnp.where(i == n_tiles - 1,
                                       jnp.zeros_like(bot_ref[...]), bot_ref[...])

    acc = jnp.zeros((TH * WO, Co), jnp.float32)                    # f32 accumulator, vreg/VMEM tile
    for kh in range(3):                                            # 3 matmuls, K = 3*Cm each
        rows = win_ref[kh:kh + TH]                                 # (TH, WOp, Cm)
        patch = jnp.concatenate(
            [rows[:, 0:WO], rows[:, 1:WO + 1], rows[:, 2:WO + 2]], axis=-1)  # im2col along W
        acc = acc + jnp.dot(patch.reshape(TH * WO, 3 * Cm), w_ref[kh],
                            preferred_element_type=jnp.float32)
    o_ref[...] = acc.reshape(TH, WO, Co).astype(o_ref.dtype)


# ----------------------------------------------------------------------------
# Glue / wrapper
# ----------------------------------------------------------------------------
def _fold_bn(gamma, beta, mean, var):
    scale = gamma / jnp.sqrt(var + BN_EPS)
    shift = beta - mean * scale
    return scale.astype(jnp.float32), shift.astype(jnp.float32)


def _pick_row_tile(HO, WO, Cm, Cs, Co, vmem_budget=4 * 1024 * 1024):
    """Largest even divisor of HO whose per-step (double-buffered) block set fits the budget."""
    best = 2
    for th in range(2, HO + 1, 2):
        if HO % th:
            continue
        bytes_k1 = 4 * th * WO * (Cs + 2 * Cm) + 2 * th * (WO + 2) * Cm
        bytes_k2 = 2 * (th + 2) * (WO + 2) * Cm + 4 * th * WO * Co
        if 2 * max(bytes_k1, bytes_k2) <= vmem_budget:             # x2 for double buffering
            best = th
    return best


def upsample_forward(x, skip, params, *, row_tile=None, interm_dtype=jnp.bfloat16):
    """x: (N, Cm, H, W) NCHW, skip: (N, Cs, 2H, 2W) NCHW. Returns (N, Co, 2H, 2W) NCHW."""
    N, Cm, H, W = x.shape
    Ns, Cs, HO, WO = skip.shape
    Co = params['w_blend'].shape[0]
    assert Ns == N and HO == 2 * H and WO == 2 * W

    scale1, shift1 = _fold_bn(params['bn1_gamma'], params['bn1_beta'],
                              params['bn1_mean'], params['bn1_var'])
    scale2, shift2 = _fold_bn(params['bn2_gamma'], params['bn2_beta'],
                              params['bn2_mean'], params['bn2_var'])
    w1 = params['w_bneck'][:, :, 0, 0].T.astype(jnp.float32)                 # (Cs, Cm)
    # (Co, Cm, 3, 3) -> (kh, kw, Cm, Co) -> (kh, kw*Cm + ci, Co): matches K2's im2col-W order
    w3 = jnp.transpose(params['w_blend'], (2, 3, 1, 0)).reshape(3, 3 * Cm, Co).astype(interm_dtype)

    # API-boundary layout change only; all intermediates stay NHWC in HBM.
    x_nhwc = jnp.transpose(x, (0, 2, 3, 1))                                  # (N, H, W, Cm)
    skip_nhwc = jnp.transpose(skip, (0, 2, 3, 1))                            # (N, HO, WO, Cs)

    TH = row_tile if row_tile is not None else _pick_row_tile(HO, WO, Cm, Cs, Co)
    assert HO % TH == 0 and TH % 2 == 0, (HO, TH)
    Hh = TH // 2
    WOp = WO + 2
    n_tiles = HO // TH
    cparams = pltpu.CompilerParams(
        dimension_semantics=("parallel", "parallel"),   # batch x row tiles (megacore on v7x)
        vmem_limit_bytes=_VMEM_LIMIT)

    # ---- kernel 1: bottleneck + upsample + add + BN2 + ReLU (W-padded, activated, bf16 out)
    a_pad = pl.pallas_call(
        _fuse_kernel,
        out_shape=jax.ShapeDtypeStruct((N, HO, WOp, Cm), interm_dtype),
        grid=(N, n_tiles),
        in_specs=[
            pl.BlockSpec((None, TH, WO, Cs), lambda n, i: (n, i, 0, 0)),
            pl.BlockSpec((None, Hh, W, Cm), lambda n, i: (n, i, 0, 0)),
            # one-row halos of x; edge clamp == bilinear boundary replication
            pl.BlockSpec((None, 1, W, Cm),
                         lambda n, i: (n, jnp.maximum(i * Hh - 1, 0), 0, 0)),
            pl.BlockSpec((None, 1, W, Cm),
                         lambda n, i: (n, jnp.minimum((i + 1) * Hh, H - 1), 0, 0)),
            pl.BlockSpec((1, Cs), lambda n, i: (0, 0)),
            pl.BlockSpec((1, Cs), lambda n, i: (0, 0)),
            pl.BlockSpec((Cs, Cm), lambda n, i: (0, 0)),
            pl.BlockSpec((1, Cm), lambda n, i: (0, 0)),
            pl.BlockSpec((1, Cm), lambda n, i: (0, 0)),
        ],
        out_specs=pl.BlockSpec((None, TH, WOp, Cm), lambda n, i: (n, i, 0, 0)),
        compiler_params=cparams,
    )(skip_nhwc, x_nhwc, x_nhwc, x_nhwc,
      scale1.reshape(1, Cs), shift1.reshape(1, Cs), w1,
      scale2.reshape(1, Cm), shift2.reshape(1, Cm))

    # ---- kernel 2: 3x3 blend conv, row-tiled with 1-row halos
    out_nhwc = pl.pallas_call(
        _blend_kernel,
        out_shape=jax.ShapeDtypeStruct((N, HO, WO, Co), jnp.float32),
        grid=(N, n_tiles),
        in_specs=[
            pl.BlockSpec((None, 1, WOp, Cm),
                         lambda n, i: (n, jnp.maximum(i * TH - 1, 0), 0, 0)),      # top halo row
            pl.BlockSpec((None, TH, WOp, Cm), lambda n, i: (n, i, 0, 0)),           # center rows
            pl.BlockSpec((None, 1, WOp, Cm),
                         lambda n, i: (n, jnp.minimum((i + 1) * TH, HO - 1), 0, 0)),  # bottom halo
            pl.BlockSpec((3, 3 * Cm, Co), lambda n, i: (0, 0, 0)),
        ],
        out_specs=pl.BlockSpec((None, TH, WO, Co), lambda n, i: (n, i, 0, 0)),
        scratch_shapes=[pltpu.VMEM((TH + 2, WOp, Cm), interm_dtype)],
        compiler_params=cparams,
    )(a_pad, a_pad, a_pad, w3)

    return jnp.transpose(out_nhwc, (0, 3, 1, 2))                              # back to NCHW


# ----------------------------------------------------------------------------
# Pure-JAX reference (same eval-mode BN semantics) for a sanity check
# ----------------------------------------------------------------------------
def _bilinear_matrix(out_size, in_size):
    """PyTorch bilinear interpolation matrix (align_corners=False). Shape (out, in)."""
    scale = in_size / out_size
    dst = np.arange(out_size)
    src = (dst + 0.5) * scale - 0.5
    src = np.maximum(src, 0.0)
    i0 = np.minimum(np.floor(src).astype(np.int64), in_size - 1)
    i1 = np.minimum(i0 + 1, in_size - 1)
    l1 = (src - i0).astype(np.float32)
    l0 = 1.0 - l1
    m = np.zeros((out_size, in_size), np.float32)
    np.add.at(m, (dst, i0), l0)
    np.add.at(m, (dst, i1), l1)
    return m


def reference_forward(x, skip, params):
    _, _, H, W = x.shape
    HO, WO = 2 * H, 2 * W
    scale1, shift1 = _fold_bn(params['bn1_gamma'], params['bn1_beta'],
                              params['bn1_mean'], params['bn1_var'])
    scale2, shift2 = _fold_bn(params['bn2_gamma'], params['bn2_beta'],
                              params['bn2_mean'], params['bn2_var'])
    bn_relu = lambda t, sc, sh: jnp.maximum(t * sc[None, :, None, None] + sh[None, :, None, None], 0.0)

    s_act = bn_relu(skip, scale1, shift1)
    s_feat = jax.lax.conv_general_dilated(
        s_act, params['w_bneck'], (1, 1), 'VALID',
        dimension_numbers=('NCHW', 'OIHW', 'NCHW'),
        precision=jax.lax.Precision.HIGHEST)

    wh = jnp.asarray(_bilinear_matrix(HO, H))
    ww = jnp.asarray(_bilinear_matrix(WO, W))
    x_up = jnp.einsum('oh,nchw->ncow', wh, x, precision=jax.lax.Precision.HIGHEST)
    x_up = jnp.einsum('pw,ncow->ncop', ww, x_up, precision=jax.lax.Precision.HIGHEST)

    z = x_up + s_feat
    z_act = bn_relu(z, scale2, shift2)
    out = jax.lax.conv_general_dilated(
        z_act, params['w_blend'], (1, 1), ((1, 1), (1, 1)),
        dimension_numbers=('NCHW', 'OIHW', 'NCHW'),
        precision=jax.lax.Precision.HIGHEST)
    return out


# ----------------------------------------------------------------------------
if __name__ == "__main__":
    # _Upsample(num_maps_in=32, skip_maps_in=16, num_maps_out=32, scale_factor=2.0)
    N, Cm, Cs, Co = 2, 32, 16, 32
    H = W = 16           # x spatial
    HO = WO = 32         # skip / output spatial (= 2x)

    key = jax.random.PRNGKey(0)
    ks = jax.random.split(key, 12)
    params = {
        'bn1_gamma': jax.random.uniform(ks[0], (Cs,), minval=0.5, maxval=1.5),
        'bn1_beta':  jax.random.normal(ks[1], (Cs,)) * 0.1,
        'bn1_mean':  jax.random.normal(ks[2], (Cs,)) * 0.1,
        'bn1_var':   jax.random.uniform(ks[3], (Cs,), minval=0.5, maxval=1.5),
        'w_bneck':   jax.random.normal(ks[4], (Cm, Cs, 1, 1)) / np.sqrt(Cs),
        'bn2_gamma': jax.random.uniform(ks[5], (Cm,), minval=0.5, maxval=1.5),
        'bn2_beta':  jax.random.normal(ks[6], (Cm,)) * 0.1,
        'bn2_mean':  jax.random.normal(ks[7], (Cm,)) * 0.1,
        'bn2_var':   jax.random.uniform(ks[8], (Cm,), minval=0.5, maxval=1.5),
        'w_blend':   jax.random.normal(ks[9], (Co, Cm, 3, 3)) / np.sqrt(Cm * 9),
    }
    params = {k: v.astype(jnp.float32) for k, v in params.items()}

    x = jax.random.normal(ks[10], (N, Cm, H, W), jnp.float32)
    skip = jax.random.normal(ks[11], (N, Cs, HO, WO), jnp.float32)

    # row_tile=8 -> grid (N, 4): exercises the multi-tile / halo paths at the toy size.
    out = jax.block_until_ready(upsample_forward(x, skip, params, row_tile=8))
    ref = jax.block_until_ready(reference_forward(x, skip, params))

    assert out.shape == (N, Co, HO, WO), out.shape
    # tolerance covers the bf16 intermediate activation/weights + MXU bf16 matmul passes
    np.testing.assert_allclose(np.asarray(out), np.asarray(ref), rtol=2e-2, atol=3e-2)
    print("KERNEL_OK")
</pallas_src>

<mosaic_0001>
module attributes {stable_mosaic.version = 11 : i64} {
  func.func @_fuse_kernel(%arg0: i32, %arg1: i32, %arg2: memref<1x8x32x16xf32, #tpu.memory_space<vmem>>, %arg3: memref<1x4x16x32xf32, #tpu.memory_space<vmem>>, %arg4: memref<1x1x16x32xf32, #tpu.memory_space<vmem>>, %arg5: memref<1x1x16x32xf32, #tpu.memory_space<vmem>>, %arg6: memref<1x16xf32, #tpu.memory_space<vmem>>, %arg7: memref<1x16xf32, #tpu.memory_space<vmem>>, %arg8: memref<16x32xf32, #tpu.memory_space<vmem>>, %arg9: memref<1x32xf32, #tpu.memory_space<vmem>>, %arg10: memref<1x32xf32, #tpu.memory_space<vmem>>, %arg11: memref<1x8x34x32xbf16, #tpu.memory_space<vmem>>) attributes {dimension_semantics = [#tpu.dimension_semantics<parallel>, #tpu.dimension_semantics<parallel>], iteration_bounds = array<i64: 2, 4>, scalar_prefetch = 0 : i64, scratch_operands = 0 : i64, tpu.core_type = #tpu.core_type<tc>, window_params = [{transform_indices = @transform_0, window_bounds = array<i64: 1, 8, 32, 16>}, {transform_indices = @transform_1, window_bounds = array<i64: 1, 4, 16, 32>}, {transform_indices = @transform_2, window_bounds = array<i64: 1, 1, 16, 32>}, {transform_indices = @transform_3, window_bounds = array<i64: 1, 1, 16, 32>}, {pipeline_mode = #tpu.pipeline_mode<synchronous>, transform_indices = @transform_4, window_bounds = array<i64: 1, 16>}, {pipeline_mode = #tpu.pipeline_mode<synchronous>, transform_indices = @transform_5, window_bounds = array<i64: 1, 16>}, {pipeline_mode = #tpu.pipeline_mode<synchronous>, transform_indices = @transform_6, window_bounds = array<i64: 16, 32>}, {pipeline_mode = #tpu.pipeline_mode<synchronous>, transform_indices = @transform_7, window_bounds = array<i64: 1, 32>}, {pipeline_mode = #tpu.pipeline_mode<synchronous>, transform_indices = @transform_8, window_bounds = array<i64: 1, 32>}, {transform_indices = @transform_9, window_bounds = array<i64: 1, 8, 34, 32>}]} {
    %c0 = arith.constant 0 : index
    %c0_0 = arith.constant 0 : index
    %c0_1 = arith.constant 0 : index
    %c0_2 = arith.constant 0 : index
    %0 = vector.load %arg2[%c0, %c0_0, %c0_1, %c0_2] : memref<1x8x32x16xf32, #tpu.memory_space<vmem>>, vector<1x8x32x16xf32>
    %1 = vector.shape_cast %0 : vector<1x8x32x16xf32> to vector<8x32x16xf32>
    %2 = vector.shape_cast %1 : vector<8x32x16xf32> to vector<256x16xf32>
    %c0_3 = arith.constant 0 : index
    %c0_4 = arith.constant 0 : index
    %3 = vector.load %arg6[%c0_3, %c0_4] : memref<1x16xf32, #tpu.memory_space<vmem>>, vector<1x16xf32>
    %4 = vector.broadcast %3 : vector<1x16xf32> to vector<256x16xf32>
    %5 = arith.mulf %2, %4 : vector<256x16xf32>
    %c0_5 = arith.constant 0 : index
    %c0_6 = arith.constant 0 : index
    %6 = vector.load %arg7[%c0_5, %c0_6] : memref<1x16xf32, #tpu.memory_space<vmem>>, vector<1x16xf32>
    %7 = vector.broadcast %6 : vector<1x16xf32> to vector<256x16xf32>
    %8 = arith.addf %5, %7 : vector<256x16xf32>
    %cst = arith.constant 0.000000e+00 : f32
    %9 = vector.broadcast %cst : f32 to vector<256x16xf32>
    %10 = arith.maximumf %8, %9 : vector<256x16xf32>
    %c0_7 = arith.constant 0 : index
    %c0_8 = arith.constant 0 : index
    %11 = vector.load %arg8[%c0_7, %c0_8] : memref<16x32xf32, #tpu.memory_space<vmem>>, vector<16x32xf32>
    %cst_9 = arith.constant dense<0.000000e+00> : vector<256x32xf32>
    %12 = tpu.matmul %10, %11, %cst_9 {dimension_numbers = #tpu.dot_dimension_numbers<[1], [0], [0], [1], [0, 0, 1, 1], [], []>} : vector<256x16xf32>, vector<16x32xf32>, vector<256x32xf32> -> vector<256x32xf32>
    %13 = vector.shape_cast %12 : vector<256x32xf32> to vector<8x32x32xf32>
    %c0_10 = arith.constant 0 : index
    %c0_11 = arith.constant 0 : index
    %c0_12 = arith.constant 0 : index
    %c0_13 = arith.constant 0 : index
    %14 = vector.load %arg4[%c0_10, %c0_11, %c0_12, %c0_13] : memref<1x1x16x32xf32, #tpu.memory_space<vmem>>, vector<1x1x16x32xf32>
    %15 = vector.shape_cast %14 : vector<1x1x16x32xf32> to vector<1x16x32xf32>
    %c0_14 = arith.constant 0 : index
    %c0_15 = arith.constant 0 : index
    %c0_16 = arith.constant 0 : index
    %c0_17 = arith.constant 0 : index
    %16 = vector.load %arg3[%c0_14, %c0_15, %c0_16, %c0_17] : memref<1x4x16x32xf32, #tpu.memory_space<vmem>>, vector<1x4x16x32xf32>
    %17 = vector.shape_cast %16 : vector<1x4x16x32xf32> to vector<4x16x32xf32>
    %c0_18 = arith.constant 0 : index
    %c0_19 = arith.constant 0 : index
    %c0_20 = arith.constant 0 : index
    %c0_21 = arith.constant 0 : index
    %18 = vector.load %arg5[%c0_18, %c0_19, %c0_20, %c0_21] : memref<1x1x16x32xf32, #tpu.memory_space<vmem>>, vector<1x1x16x32xf32>
    %19 = vector.shape_cast %18 : vector<1x1x16x32xf32> to vector<1x16x32xf32>
    %20 = tpu.concatenate %15, %17, %19 in 0 : vector<1x16x32xf32>, vector<4x16x32xf32>, vector<1x16x32xf32> -> vector<6x16x32xf32>
    %21 = vector.extract_strided_slice %20 {offsets = [0, 0, 0], sizes = [4, 16, 32], strides = [1, 1, 1]} : vector<6x16x32xf32> to vector<4x16x32xf32>
    %cst_22 = arith.constant 2.500000e-01 : f32
    %22 = vector.broadcast %cst_22 : f32 to vector<4x16x32xf32>
    %23 = arith.mulf %22, %21 : vector<4x16x32xf32>
    %24 = vector.extract_strided_slice %20 {offsets = [1, 0, 0], sizes = [4, 16, 32], strides = [1, 1, 1]} : vector<6x16x32xf32> to vector<4x16x32xf32>
    %cst_23 = arith.constant 7.500000e-01 : f32
    %25 = vector.broadcast %cst_23 : f32 to vector<4x16x32xf32>
    %26 = arith.mulf %25, %24 : vector<4x16x32xf32>
    %27 = arith.addf %23, %26 : vector<4x16x32xf32>
    %28 = vector.extract_strided_slice %20 {offsets = [1, 0, 0], sizes = [4, 16, 32], strides = [1, 1, 1]} : vector<6x16x32xf32> to vector<4x16x32xf32>
    %cst_24 = arith.constant 7.500000e-01 : f32
    %29 = vector.broadcast %cst_24 : f32 to vector<4x16x32xf32>
    %30 = arith.mulf %29, %28 : vector<4x16x32xf32>
    %31 = vector.extract_strided_slice %20 {offsets = [2, 0, 0], sizes = [4, 16, 32], strides = [1, 1, 1]} : vector<6x16x32xf32> to vector<4x16x32xf32>
    %cst_25 = arith.constant 2.500000e-01 : f32
    %32 = vector.broadcast %cst_25 : f32 to vector<4x16x32xf32>
    %33 = arith.mulf %32, %31 : vector<4x16x32xf32>
    %34 = arith.addf %30, %33 : vector<4x16x32xf32>
    %35 = vector.shape_cast %27 : vector<4x16x32xf32> to vector<4x1x16x32xf32>
    %36 = vector.shape_cast %34 : vector<4x16x32xf32> to vector<4x1x16x32xf32>
    %37 = tpu.concatenate %35, %36 in 1 : vector<4x1x16x32xf32>, vector<4x1x16x32xf32> -> vector<4x2x16x32xf32>
    %38 = vector.shape_cast %37 : vector<4x2x16x32xf32> to vector<8x16x32xf32>
    %39 = vector.extract_strided_slice %38 {offsets = [0, 0, 0], sizes = [8, 1, 32], strides = [1, 1, 1]} : vector<8x16x32xf32> to vector<8x1x32xf32>
    %40 = vector.extract_strided_slice %38 {offsets = [0, 0, 0], sizes = [8, 15, 32], strides = [1, 1, 1]} : vector<8x16x32xf32> to vector<8x15x32xf32>
    %41 = tpu.concatenate %39, %40 in 1 : vector<8x1x32xf32>, vector<8x15x32xf32> -> vector<8x16x32xf32>
    %42 = vector.extract_strided_slice %38 {offsets = [0, 1, 0], sizes = [8, 15, 32], strides = [1, 1, 1]} : vector<8x16x32xf32> to vector<8x15x32xf32>
    %43 = vector.extract_strided_slice %38 {offsets = [0, 15, 0], sizes = [8, 1, 32], strides = [1, 1, 1]} : vector<8x16x32xf32> to vector<8x1x32xf32>
    %44 = tpu.concatenate %42, %43 in 1 : vector<8x15x32xf32>, vector<8x1x32xf32> -> vector<8x16x32xf32>
    %cst_26 = arith.constant 2.500000e-01 : f32
    %45 = vector.broadcast %cst_26 : f32 to vector<8x16x32xf32>
    %46 = arith.mulf %45, %41 : vector<8x16x32xf32>
    %cst_27 = arith.constant 7.500000e-01 : f32
    %47 = vector.broadcast %cst_27 : f32 to vector<8x16x32xf32>
    %48 = arith.mulf %47, %38 : vector<8x16x32xf32>
    %49 = arith.addf %46, %48 : vector<8x16x32xf32>
    %cst_28 = arith.constant 7.500000e-01 : f32
    %50 = vector.broadcast %cst_28 : f32 to vector<8x16x32xf32>
    %51 = arith.mulf %50, %38 : vector<8x16x32xf32>
    %cst_29 = arith.constant 2.500000e-01 : f32
    %52 = vector.broadcast %cst_29 : f32 to vector<8x16x32xf32>
    %53 = arith.mulf %52, %44 : vector<8x16x32xf32>
    %54 = arith.addf %51, %53 : vector<8x16x32xf32>
    %55 = vector.shape_cast %49 : vector<8x16x32xf32> to vector<8x16x1x32xf32>
    %56 = vector.shape_cast %54 : vector<8x16x32xf32> to vector<8x16x1x32xf32>
    %57 = tpu.concatenate %55, %56 in 2 : vector<8x16x1x32xf32>, vector<8x16x1x32xf32> -> vector<8x16x2x32xf32>
    %58 = vector.shape_cast %57 : vector<8x16x2x32xf32> to vector<8x32x32xf32>
    %59 = arith.addf %58, %13 : vector<8x32x32xf32>
    %c0_30 = arith.constant 0 : index
    %c0_31 = arith.constant 0 : index
    %60 = vector.load %arg9[%c0_30, %c0_31] : memref<1x32xf32, #tpu.memory_space<vmem>>, vector<1x32xf32>
    %61 = vector.shape_cast %60 : vector<1x32xf32> to vector<1x1x32xf32>
    %62 = vector.broadcast %61 : vector<1x1x32xf32> to vector<8x32x32xf32>
    %63 = arith.mulf %59, %62 : vector<8x32x32xf32>
    %c0_32 = arith.constant 0 : index
    %c0_33 = arith.constant 0 : index
    %64 = vector.load %arg10[%c0_32, %c0_33] : memref<1x32xf32, #tpu.memory_space<vmem>>, vector<1x32xf32>
    %65 = vector.shape_cast %64 : vector<1x32xf32> to vector<1x1x32xf32>
    %66 = vector.broadcast %65 : vector<1x1x32xf32> to vector<8x32x32xf32>
    %67 = arith.addf %63, %66 : vector<8x32x32xf32>
    %cst_34 = arith.constant 0.000000e+00 : f32
    %68 = vector.broadcast %cst_34 : f32 to vector<8x32x32xf32>
    %69 = arith.maximumf %67, %68 : vector<8x32x32xf32>
    %cst_35 = arith.constant 0.000000e+00 : f32
    %70 = vector.broadcast %cst_35 : f32 to vector<8x1x32xf32>
    %71 = tpu.concatenate %70, %69, %70 in 1 : vector<8x1x32xf32>, vector<8x32x32xf32>, vector<8x1x32xf32> -> vector<8x34x32xf32>
    %72 = arith.truncf %71 : vector<8x34x32xf32> to vector<8x34x32xbf16>
    %c0_36 = arith.constant 0 : index
    %c0_37 = arith.constant 0 : index
    %c0_38 = arith.constant 0 : index
    %c0_39 = arith.constant 0 : index
    %73 = vector.load %arg11[%c0_36, %c0_37, %c0_38, %c0_39] : memref<1x8x34x32xbf16, #tpu.memory_space<vmem>>, vector<1x8x34x32xbf16>
    %74 = vector.shape_cast %73 : vector<1x8x34x32xbf16> to vector<8x34x32xbf16>
    %75 = vector.shape_cast %72 : vector<8x34x32xbf16> to vector<1x8x34x32xbf16>
    tpu.vector_store %arg11[%c0_36, %c0_37, %c0_38, %c0_39], %75 {strides = array<i32>} : memref<1x8x34x32xbf16, #tpu.memory_space<vmem>>, vector<1x8x34x32xbf16>,
    return
  }
  func.func @transform_0(%arg0: i32, %arg1: i32) -> (i32, i32, i32, i32) {
    %c0_i32 = arith.constant 0 : i32
    %c0_i32_0 = arith.constant 0 : i32
    %c0_i32_1 = arith.constant 0 : i32
    return %arg0, %arg1, %c0_i32, %c0_i32_0 : i32, i32, i32, i32
  }
  func.func @transform_1(%arg0: i32, %arg1: i32) -> (i32, i32, i32, i32) {
    %c0_i32 = arith.constant 0 : i32
    %c0_i32_0 = arith.constant 0 : i32
    %c0_i32_1 = arith.constant 0 : i32
    return %arg0, %arg1, %c0_i32, %c0_i32_0 : i32, i32, i32, i32
  }
  func.func @transform_2(%arg0: i32, %arg1: i32) -> (i32, i32, i32, i32) {
    %c4_i32 = arith.constant 4 : i32
    %0 = arith.muli %arg1, %c4_i32 : i32
    %c1_i32 = arith.constant 1 : i32
    %1 = arith.subi %0, %c1_i32 : i32
    %c0_i32 = arith.constant 0 : i32
    %2 = arith.maxsi %1, %c0_i32 : i32
    %c0_i32_0 = arith.constant 0 : i32
    %c0_i32_1 = arith.constant 0 : i32
    %c0_i32_2 = arith.constant 0 : i32
    return %arg0, %2, %c0_i32_0, %c0_i32_1 : i32, i32, i32, i32
  }
  func.func @transform_3(%arg0: i32, %arg1: i32) -> (i32, i32, i32, i32) {
    %c1_i32 = arith.constant 1 : i32
    %0 = arith.addi %arg1, %c1_i32 : i32
    %c4_i32 = arith.constant 4 : i32
    %1 = arith.muli %0, %c4_i32 : i32
    %c15_i32 = arith.constant 15 : i32
    %2 = arith.minsi %1, %c15_i32 : i32
    %c0_i32 = arith.constant 0 : i32
    %c0_i32_0 = arith.constant 0 : i32
    %c0_i32_1 = arith.constant 0 : i32
    return %arg0, %2, %c0_i32, %c0_i32_0 : i32, i32, i32, i32
  }
  func.func @transform_4(%arg0: i32, %arg1: i32) -> (i32, i32) {
    %c0_i32 = arith.constant 0 : i32
    %c0_i32_0 = arith.constant 0 : i32
    %c0_i32_1 = arith.constant 0 : i32
    return %c0_i32, %c0_i32_0 : i32, i32
  }
  func.func @transform_5(%arg0: i32, %arg1: i32) -> (i32, i32) {
    %c0_i32 = arith.constant 0 : i32
    %c0_i32_0 = arith.constant 0 : i32
    %c0_i32_1 = arith.constant 0 : i32
    return %c0_i32, %c0_i32_0 : i32, i32
  }
  func.func @transform_6(%arg0: i32, %arg1: i32) -> (i32, i32) {
    %c0_i32 = arith.constant 0 : i32
    %c0_i32_0 = arith.constant 0 : i32
    %c0_i32_1 = arith.constant 0 : i32
    return %c0_i32, %c0_i32_0 : i32, i32
  }
  func.func @transform_7(%arg0: i32, %arg1: i32) -> (i32, i32) {
    %c0_i32 = arith.constant 0 : i32
    %c0_i32_0 = arith.constant 0 : i32
    %c0_i32_1 = arith.constant 0 : i32
    return %c0_i32, %c0_i32_0 : i32, i32
  }
  func.func @transform_8(%arg0: i32, %arg1: i32) -> (i32, i32) {
    %c0_i32 = arith.constant 0 : i32
    %c0_i32_0 = arith.constant 0 : i32
    %c0_i32_1 = arith.constant 0 : i32
    return %c0_i32, %c0_i32_0 : i32, i32
  }
  func.func @transform_9(%arg0: i32, %arg1: i32) -> (i32, i32, i32, i32) {
    %c0_i32 = arith.constant 0 : i32
    %c0_i32_0 = arith.constant 0 : i32
    %c0_i32_1 = arith.constant 0 : i32
    return %arg0, %arg1, %c0_i32, %c0_i32_0 : i32, i32, i32, i32
  }
}

</mosaic_0001>

<bundles_post_ra>
// kernel: tpu_custom_call.1
= control target key start
LH: loop header
LB: loop body
LE: loop exit
PB: predicated region body
PF: predicated region fallthrough
CT: control target
= control target key end

     0   :  { %s6560_s30 = smov 0   ;;  %s6562_s10 = smov 0   ;;  %s8635_s0 = inlined_call_operand.vmem [shape: f32[2,32,32,16], index: 0, kind: input, shape index: {}]   ;;  %s8636_s1 = inlined_call_operand.vmem [shape: f32[2,16,16,32], index: 1, kind: input, shape index: {}]   ;;  %s8637_s2 = inlined_call_operand.vmem [shape: f32[2,16,16,32], index: 2, kind: input, shape index: {}]   ;;  %s8638_s3 = inlined_call_operand.vmem [shape: f32[2,16,16,32], index: 3, kind: input, shape index: {}]   ;;  %s8639_s4 = inlined_call_operand.vmem [shape: f32[1,16], index: 4, kind: input, shape index: {}]   ;;  %s8640_s5 = inlined_call_operand.vmem [shape: f32[1,16], index: 5, kind: input, shape index: {}]   ;;  %s8641_s6 = inlined_call_operand.vmem [shape: f32[16,32], index: 6, kind: input, shape index: {}]   ;;  %s8642_s7 = inlined_call_operand.vmem [shape: f32[1,32], index: 7, kind: input, shape index: {}]   ;;  %s8643_s8 = inlined_call_operand.vmem [shape: f32[1,32], index: 8, kind: input, shape index: {}]   ;;  %s8644_s9 = inlined_call_operand.vmem [shape: bf16[2,32,34,32], index: 9, kind: output, shape index: {}]  }
   0x1   :  { %8681 = sst [smem:[#allocation60_spill]] %s8641_s6  ;;  %s6564_s11 = smov 0  }
   0x2   :  { %s6566_s12 = smov 0   ;;  %s6568_s13 = smov 0  }
   0x3 LB: > { %s28_s14 = sadd.s32 1, %s6498_s11  ;;  %s31_s15 = sadd.s32 1, %s6502_s12  ;;  %s6506_s13 = sphi %s6568_s13, %s19_s13   ;;  %s6502_s12 = sphi %s6566_s12, %s8821_s12   ;;  %s6498_s11 = sphi %s6564_s11, %s8820_s11   ;;  %s6494_s10 = sphi %s6562_s10, %s8819_s10   ;;  %s6490_s30 = sphi %s6560_s30, %s8818_s30  }
   0x4   : > { %p29_p0 = scmp.ge.s32.totalorder %s28_s14, 4  ;;  %p6180_p1 = scmp.ge.s32.totalorder %s6506_s13, 1 }
   0x5   : > { %p391_p2 = scmp.lt.s32.totalorder %s6506_s13, 9 }
   0x6   : > { %s8823_s14 = smov (%p29_p0, %s28_s14), 0  ;;  %s8825_s15 = smov (!%p29_p0, %s31_s15), %s6502_s12 }
   0x7   : > { %p392_p3 = pnand %p6180_p1, %p391_p2  ;;  %p33_p4 = scmp.ge.s32.totalorder %s8825_s15, 2 }
   0x9   : > { %s8827_s15 = smov (%p33_p4, %s8825_s15), 0  ;;  %395 = sbr.rel (%p392_p3) target bundleno = 564 (0x234), region = 56 }
   0xe   : > { %s8682_s6 = sld [smem:[#allocation60_spill]]  ;;  %s6181_s20 = sshll.u32 %s6490_s30, 3  ;;  %v6608_v2 = vld [vmem:[%s8639_s4] ss:$0 sm:$0xff]  ;;  %vm684_vm0 = vcmask 130048   ;;  %vm1119_vm1 = vcmask 1046528  }
   0xf   : > { %p474_p5 = scmp.lt.s32.totalorder %s6494_s10, 1  ;;  %p476_p6 = scmp.lt.s32.totalorder %s6181_s20, 31  ;;  %v6618_v3 = vld [vmem:[%s8640_s5] ss:$0 sm:$0xff]  ;;  %vm1070_vm2 = vcmask 1040384   ;;  %vm5966_vm3 = vcmask 257024  }
  0x10   : > { %vm5971_vm4 = vcmask 253952  }
  0x11   : > { %s8829_s10 = smov (!%p474_p5, %s6494_s10), 1  ;;  %s8831_s20 = smov (!%p476_p6, %s6181_s20), 31 }
  0x12   : > { %s6183_s21 = sshll.u32 %s8829_s10, 7  ;;  %s6425_s22 = smul.u32 160, %s8829_s10 }
  0x13   : > { %s6182_s23 = sshll.u32 %s8831_s20, 2  ;;  %s6424_s24 = smul.u32 5, %s8831_s20 }
  0x14   : > { %v683_v0 = vld [vmem:[%s8682_s6 + $0x8] sm:$0xff]  ;;  %v682_v1 = vld [vmem:[%s8682_s6] sm:$0xff]  ;;  %s480_s25 = sadd.s32 %s6183_s21, %s6182_s23  ;;  %s6733_s6 = sshll.u32 %s6490_s30, 2 }
  0x15   : > { %6368 = vmatprep.subr.mxu0 %v683_v0  ;;  %6420 = vmatprep.subr.mxu1 %v683_v0  ;;  %s6184_s26 = sshll.u32 %s480_s25, 3  ;;  %s6603_s27 = sadd.s32 %s6425_s22, %s6424_s24 }
  0x16   : > { %6369 = vmatpush3.msra.mxu0 %v683_v0  ;;  %6422 = vmatpush3.msra.mxu1 %v683_v0  ;;  %s6613_s18 = scalar_lea.vmem %s8635_s0, %s6184_s26  ;;  %s6190_s20 = sadd.s32 4294967295, %s6733_s6 }
  0x17   : > { %6370 = vmatprep.subr.mxu0 %v682_v1  ;;  %6421 = vmatprep.subr.mxu1 %v682_v1  ;;  %v540_v4 = vld [vmem:[%s6613_s18] sm:$0xff]  ;;  %v541_v6 = vld [vmem:[%s6613_s18 + $0x8] sm:$0xff]  ;;  %v542_v11 = vld [vmem:[%s6613_s18 + $0x10] sm:$0xff]  ;;  %p497_p7 = scmp.gt.s32.totalorder %s6190_s20, 0  ;;  %p487_p8 = scmp.lt.s32.totalorder %s6733_s6, 15 }
  0x18   : > { %6371 = vmatpush3.msra.mxu0 %v682_v1  ;;  %6423 = vmatpush3.msra.mxu1 %v682_v1  ;;  %v556_v5 = vld [vmem:[%s6613_s18 + $0x80] sm:$0xff]  ;;  %v579_v7 = vmul.f32 %v6608_v2, %v540_v4  ;;  %v580_v9 = vmul.f32 %v6608_v2, %v541_v6  ;;  %v557_v10 = vld [vmem:[%s6613_s18 + $0x88] sm:$0xff]  ;;  %v558_v12 = vld [vmem:[%s6613_s18 + $0x90] sm:$0xff]  ;;  %v581_v14 = vmul.f32 %v6608_v2, %v542_v11  ;;  %p6191_p9 = scmp.lt.s32.totalorder %s6190_s20, 15  ;;  %s6755_s21 = sshll.u32 %s8829_s10, 5 }
  0x19   : > { %v595_v8 = vmul.f32 %v6608_v2, %v556_v5  ;;  %v596_v13 = vmul.f32 %v6608_v2, %v557_v10  ;;  %v597_v15 = vmul.f32 %v6608_v2, %v558_v12  ;;  %v543_v16 = vld [vmem:[%s6613_s18 + $0x18] sm:$0xff]  ;;  %v544_v26 = vld [vmem:[%s6613_s18 + $0x20] sm:$0xff]  ;;  %v545_v28 = vld [vmem:[%s6613_s18 + $0x28] sm:$0xff]  ;;  %s8833_s20 = smov (!%p497_p7, %s6190_s20), 0 }
  0x1a   : > { %v559_v17 = vld [vmem:[%s6613_s18 + $0x98] sm:$0xff]  ;;  %v618_v18 = vadd.f32 %v6618_v3, %v579_v7  ;;  %v619_v20 = vadd.f32 %v6618_v3, %v580_v9  ;;  %v582_v21 = vmul.f32 %v6608_v2, %v543_v16  ;;  %v620_v23 = vadd.f32 %v6618_v3, %v581_v14  ;;  %v560_v27 = vld [vmem:[%s6613_s18 + $0xa0] sm:$0xff]  ;;  %v561_v33 = vld [vmem:[%s6613_s18 + $0xa8] sm:$0xff]  ;;  %s488_s30 = scalar_select %p487_p8, %s6733_s6, 15 }
  0x1b   : > { %v634_v19 = vadd.f32 %v6618_v3, %v595_v8  ;;  %v635_v22 = vadd.f32 %v6618_v3, %v596_v13  ;;  %v636_v24 = vadd.f32 %v6618_v3, %v597_v15  ;;  %v598_v25 = vmul.f32 %v6608_v2, %v559_v17  ;;  %v546_v34 = vld [vmem:[%s6613_s18 + $0x30] sm:$0xff]  ;;  %v547_v44 = vld [vmem:[%s6613_s18 + $0x38] sm:$0xff]  ;;  %v548_v57 = vld [vmem:[%s6613_s18 + $0x40] sm:$0xff]  ;;  %s8835_s20 = smov (!%p6191_p9, %s8833_s20), 15 }
  0x1c   : > { %v650_v29 = vmax.f32 %v618_v18, 0.0  ;;  %v651_v31 = vmax.f32 %v619_v20, 0.0  ;;  %v621_v32 = vadd.f32 %v6618_v3, %v582_v21  ;;  %v562_v35 = vld [vmem:[%s6613_s18 + $0xb0] sm:$0xff]  ;;  %v652_v37 = vmax.f32 %v620_v23, 0.0  ;;  %v563_v49 = vld [vmem:[%s6613_s18 + $0xb8] sm:$0xff]  ;;  %v564_v58 = vld [vmem:[%s6613_s18 + $0xc0] sm:$0xff] }
  0x1d   : > { %v666_v30 = vmax.f32 %v634_v19, 0.0  ;;  %v667_v36 = vmax.f32 %v635_v22, 0.0  ;;  %v668_v38 = vmax.f32 %v636_v24, 0.0  ;;  %v637_v39 = vadd.f32 %v6618_v3, %v598_v25  ;;  %v549_v62 = vld [vmem:[%s6613_s18 + $0x48] sm:$0xff]  ;;  %v550_v0 = vld [vmem:[%s6613_s18 + $0x50] sm:$0xff]  ;;  %v551_v15 = vld [vmem:[%s6613_s18 + $0x58] sm:$0xff] }
  0x1e   : > { %6372 = vmatprep.mubr.msk.f32.mxu0 %vm684_vm0, %v650_v29  ;;  %v653_v40 = vmax.f32 %v621_v32, 0.0  ;;  %v583_v41 = vmul.f32 %v6608_v2, %v544_v26  ;;  %v599_v42 = vmul.f32 %v6608_v2, %v560_v27  ;;  %v584_v43 = vmul.f32 %v6608_v2, %v545_v28  ;;  %v565_v63 = vld [vmem:[%s6613_s18 + $0xc8] sm:$0xff]  ;;  %v566_v7 = vld [vmem:[%s6613_s18 + $0xd0] sm:$0xff]  ;;  %v567_v20 = vld [vmem:[%s6613_s18 + $0xd8] sm:$0xff]  ;;  %s6186_s22 = sshll.u32 %s488_s30, 1  ;;  %s6196_s23 = sshll.u32 %s8835_s20, 1 }
  0x1f   : > { %6396 = vmatprep.mubr.msk.f32.mxu1 %vm684_vm0, %v666_v30  ;;  %6373 = vmatmul.mubr.msk.f32.vlgmr.msra.gmra.mxu0 %vm684_vm0, %v651_v31  ;;  %v669_v45 = vmax.f32 %v637_v39, 0.0  ;;  %v600_v46 = vmul.f32 %v6608_v2, %v561_v33  ;;  %v585_v47 = vmul.f32 %v6608_v2, %v546_v34  ;;  %v601_v48 = vmul.f32 %v6608_v2, %v562_v35  ;;  %v552_v25 = vld [vmem:[%s6613_s18 + $0x60] sm:$0xff]  ;;  %v553_v31 = vld [vmem:[%s6613_s18 + $0x68] sm:$0xff]  ;;  %v554_v35 = vld [vmem:[%s6613_s18 + $0x70] sm:$0xff]  ;;  %s491_s24 = sadd.s32 %s6755_s21, %s6186_s22  ;;  %s505_s25 = sadd.s32 %s6196_s23, %s6755_s21 }
  0x20   : > { %6397 = vmatmul.mubr.msk.f32.vlgmr.msra.gmra.mxu1 %vm684_vm0, %v667_v36  ;;  %6375 = vmatprep.mubr.msk.f32.mxu0 %vm684_vm0, %v652_v37  ;;  %v622_v50 = vadd.f32 %v6618_v3, %v583_v41  ;;  %v638_v51 = vadd.f32 %v6618_v3, %v599_v42  ;;  %v623_v52 = vadd.f32 %v6618_v3, %v584_v43  ;;  %v568_v26 = vld [vmem:[%s6613_s18 + $0xe0] sm:$0xff]  ;;  %v569_v32 = vld [vmem:[%s6613_s18 + $0xe8] sm:$0xff]  ;;  %s6188_s26 = sshll.u32 %s491_s24, 3  ;;  %s6198_s28 = sshll.u32 %s505_s25, 3 }
  0x21   : > { %6399 = vmatprep.mubr.msk.f32.mxu1 %vm684_vm0, %v668_v38  ;;  %v639_v53 = vadd.f32 %v6618_v3, %v600_v46  ;;  %v624_v54 = vadd.f32 %v6618_v3, %v585_v47  ;;  %v640_v55 = vadd.f32 %v6618_v3, %v601_v48  ;;  %v586_v56 = vmul.f32 %v6608_v2, %v547_v44  ;;  %s6762_s17 = scalar_lea.vmem %s8636_s1, %s6188_s26  ;;  %s507_s10 = scalar_lea.vmem %s8637_s2, %s6198_s28 }
  0x22   : > { %v654_v59 = vmax.f32 %v622_v50, 0.0  ;;  %v670_v60 = vmax.f32 %v638_v51, 0.0  ;;  %v602_v61 = vmul.f32 %v6608_v2, %v563_v49  ;;  %v655_v1 = vmax.f32 %v623_v52, 0.0  ;;  %v555_v49 = vld [vmem:[%s6613_s18 + $0x78] sm:$0xff]  ;;  %s6207_s24 = sshll.u32 %s6603_s27, 2  ;;  %s6293_s28 = sadd.s32 4, %s6733_s6 }
  0x23   : > { %6376 = vmatmul.mubr.msk.f32.gmra.mxu0 %vm684_vm0, %v653_v40  ;;  %v671_v4 = vmax.f32 %v639_v53, 0.0  ;;  %v656_v5 = vmax.f32 %v624_v54, 0.0  ;;  %v625_v6 = vadd.f32 %v6618_v3, %v586_v56  ;;  %v672_v8 = vmax.f32 %v640_v55, 0.0  ;;  %v570_v40 = vld [vmem:[%s6613_s18 + $0xf0] sm:$0xff]  ;;  %v571_v50 = vld [vmem:[%s6613_s18 + $0xf8] sm:$0xff]  ;;  %s7616_s26 = scalar_lea.vmem %s8644_s9, %s6207_s24  ;;  %p8132_p10 = scmp.lt.s32.totalorder %s6293_s28, 15 }
  0x24   : > { %6400 = vmatmul.mubr.msk.f32.gmra.mxu1 %vm684_vm0, %v669_v45  ;;  %6378 = vmatprep.mubr.msk.f32.mxu0 %vm684_vm0, %v654_v59  ;;  %v641_v9 = vadd.f32 %v6618_v3, %v602_v61  ;;  %v587_v10 = vmul.f32 %v6608_v2, %v548_v57  ;;  %v603_v11 = vmul.f32 %v6608_v2, %v564_v58 }
  0x25   : > { %6402 = vmatprep.mubr.msk.f32.mxu1 %vm684_vm0, %v670_v60  ;;  %v588_v12 = vmul.f32 %v6608_v2, %v549_v62  ;;  %v604_v13 = vmul.f32 %v6608_v2, %v565_v63  ;;  %v589_v14 = vmul.f32 %v6608_v2, %v550_v0  ;;  %v657_v16 = vmax.f32 %v625_v6, 0.0  ;;  %s8837_s28 = smov (!%p8132_p10, %s6293_s28), 15 }
  0x26   : > { %v626_v17 = vadd.f32 %v6618_v3, %v587_v10  ;;  %v642_v18 = vadd.f32 %v6618_v3, %v603_v11  ;;  %v605_v19 = vmul.f32 %v6608_v2, %v566_v7  ;;  %v673_v21 = vmax.f32 %v641_v9, 0.0  ;;  %v1007_v7 = vld [vmem:[%s507_s10 + $0x8] sm:$0xff]  ;;  %s8839_s28 = smov (!%p8132_p10, %s8837_s28), 15 }
  0x27   : > { %6379 = vmatmul.mubr.msk.f32.gmra.mxu0 %vm684_vm0, %v655_v1  ;;  %v627_v22 = vadd.f32 %v6618_v3, %v588_v12  ;;  %v643_v23 = vadd.f32 %v6618_v3, %v604_v13  ;;  %v628_v24 = vadd.f32 %v6618_v3, %v589_v14  ;;  %v590_v30 = vmul.f32 %v6608_v2, %v551_v15  ;;  %v6771_v9 = vld [vmem:[%s6762_s17 + $0x8] sm:$0xff]  ;;  %v6777_v13 = vld [vmem:[%s6762_s17 + $0x10] sm:$0xff]  ;;  %v6780_v14 = vld [vmem:[%s6762_s17 + $0x18] sm:$0xff]  ;;  %s6203_s6 = sshll.u32 %s8839_s28, 1 }
  0x28   : > { %6403 = vmatmul.mubr.msk.f32.gmra.mxu1 %vm684_vm0, %v671_v4  ;;  %6381 = vmatprep.mubr.msk.f32.mxu0 %vm684_vm0, %v656_v5  ;;  %v658_v27 = vmax.f32 %v626_v17, 0.0  ;;  %v674_v28 = vmax.f32 %v642_v18, 0.0  ;;  %v644_v29 = vadd.f32 %v6618_v3, %v605_v19  ;;  %v606_v34 = vmul.f32 %v6608_v2, %v567_v20  ;;  %v6789_v17 = vld [vmem:[%s6762_s17 + $0x28] sm:$0xff]  ;;  %s522_s16 = sadd.s32 %s6203_s6, %s6755_s21 }
  0x29   : > { %6405 = vmatprep.mubr.msk.f32.mxu1 %vm684_vm0, %v672_v8  ;;  %v659_v33 = vmax.f32 %v627_v22, 0.0  ;;  %v675_v36 = vmax.f32 %v643_v23, 0.0  ;;  %v629_v37 = vadd.f32 %v6618_v3, %v590_v30  ;;  %v591_v38 = vmul.f32 %v6608_v2, %v552_v25  ;;  %v6768_v8 = vld [vmem:[%s6762_s17] sm:$0xff]  ;;  %s6205_s21 = sshll.u32 %s522_s16, 3 }
  0x2a   : > { %v607_v39 = vmul.f32 %v6608_v2, %v568_v26  ;;  %v660_v41 = vmax.f32 %v628_v24, 0.0  ;;  %v645_v42 = vadd.f32 %v6618_v3, %v606_v34  ;;  %v592_v43 = vmul.f32 %v6608_v2, %v553_v31  ;;  %s524_s19 = scalar_lea.vmem %s8638_s3, %s6205_s21 }
  0x2b   : > { %6382 = vmatmul.mubr.msk.f32.gmra.mxu0 %vm684_vm0, %v657_v16  ;;  %v608_v44 = vmul.f32 %v6608_v2, %v569_v32  ;;  %v676_v45 = vmax.f32 %v644_v29, 0.0  ;;  %v630_v46 = vadd.f32 %v6618_v3, %v591_v38  ;;  %v593_v48 = vmul.f32 %v6608_v2, %v554_v35  ;;  %v6786_v16 = vld [vmem:[%s6762_s17 + $0x20] sm:$0xff] }
  0x2c   : > { %6406 = vmatmul.mubr.msk.f32.gmra.mxu1 %vm684_vm0, %v673_v21  ;;  %6384 = vmatprep.mubr.msk.f32.mxu0 %vm684_vm0, %v658_v27  ;;  %v646_v47 = vadd.f32 %v6618_v3, %v607_v39  ;;  %v609_v51 = vmul.f32 %v6608_v2, %v570_v40  ;;  %v661_v52 = vmax.f32 %v629_v37, 0.0  ;;  %v631_v53 = vadd.f32 %v6618_v3, %v592_v43 }
  0x2d   : > { %6408 = vmatprep.mubr.msk.f32.mxu1 %vm684_vm0, %v674_v28  ;;  %v677_v54 = vmax.f32 %v645_v42, 0.0  ;;  %v647_v55 = vadd.f32 %v6618_v3, %v608_v44  ;;  %v594_v56 = vmul.f32 %v6608_v2, %v555_v49  ;;  %v610_v57 = vmul.f32 %v6608_v2, %v571_v50 }
  0x2e   : > { %v662_v58 = vmax.f32 %v630_v46, 0.0  ;;  %v678_v59 = vmax.f32 %v646_v47, 0.0  ;;  %v632_v60 = vadd.f32 %v6618_v3, %v593_v48  ;;  %v648_v61 = vadd.f32 %v6618_v3, %v609_v51 }
  0x2f   : > { %6385 = vmatmul.mubr.msk.f32.gmra.mxu0 %vm684_vm0, %v659_v33  ;;  %v663_v2 = vmax.f32 %v631_v53, 0.0  ;;  %v679_v62 = vmax.f32 %v647_v55, 0.0  ;;  %v633_v63 = vadd.f32 %v6618_v3, %v594_v56  ;;  %v649_v0 = vadd.f32 %v6618_v3, %v610_v57  ;;  %v1006_v3 = vld [vmem:[%s507_s10] sm:$0xff] }
  0x30   : > { %6409 = vmatmul.mubr.msk.f32.gmra.mxu1 %vm684_vm0, %v675_v36  ;;  %6387 = vmatprep.mubr.msk.f32.mxu0 %vm684_vm0, %v660_v41  ;;  %v664_v1 = vmax.f32 %v632_v60, 0.0  ;;  %v680_v4 = vmax.f32 %v648_v61, 0.0  ;;  %v1018_v10 = vmul.f32 0.25, %v1006_v3  ;;  %v1019_v11 = vmul.f32 0.25, %v1007_v7  ;;  %v6242_v3 = vld [vmem:[%s8642_s7] ss:$0 sm:$0xff] }
  0x31   : > { %6411 = vmatprep.mubr.msk.f32.mxu1 %vm684_vm0, %v676_v45  ;;  %v665_v5 = vmax.f32 %v633_v63, 0.0  ;;  %v681_v6 = vmax.f32 %v649_v0, 0.0  ;;  %v6774_v12 = vmul.f32 0.75, %v6768_v8  ;;  %v6783_v15 = vmul.f32 0.75, %v6771_v9 }
  0x32   : > { %v6792_v18 = vmul.f32 0.25, %v6777_v13  ;;  %v6798_v20 = vmul.f32 0.25, %v6780_v14  ;;  %v6801_v21 = vmul.f32 0.75, %v6786_v16  ;;  %v6804_v22 = vmul.f32 0.75, %v6789_v17 }
  0x33   : > { %6388 = vmatmul.mubr.msk.f32.gmra.mxu0 %vm684_vm0, %v661_v52  ;;  %v6795_v19 = vadd.f32 %v6774_v12, %v1018_v10  ;;  %v6807_v23 = vadd.f32 %v6783_v15, %v1019_v11  ;;  %v6508_v32 = vmov 1966171168   ;;  %v1268_v36 = vlaneseq }
  0x34   : > { %6412 = vmatmul.mubr.msk.f32.gmra.mxu1 %vm684_vm0, %v677_v54  ;;  %6390 = vmatprep.mubr.msk.f32.mxu0 %vm684_vm0, %v662_v58  ;;  %v6812_v25 = vadd.f32 %v6801_v21, %v6792_v18  ;;  %v6818_v28 = vadd.f32 %v6804_v22, %v6798_v20  ;;  %v1266_v33 = vunpack.c.l.s4 %v6508_v32  ;;  %v6509_v56 = vmov 1983009808   ;;  %v6243_v32 = vld [vmem:[%s8643_s8] ss:$0 sm:$0xff] }
  0x35   : > { %6414 = vmatprep.mubr.msk.f32.mxu1 %vm684_vm0, %v678_v59  ;;  %v1120_v24 = vrot.slane %v6795_v19, 1  ;;  %v1121_v26 = vrot.slane %v6807_v23, 1  ;;  %v1071_v27 = vrot.slane %v6795_v19, 7  ;;  %v1184_v31 = vmul.f32 0.75, %v6795_v19 }
  0x36   : > { %v1083_v29 = vrot.slane %v6812_v25, 7  ;;  %v1267_v38 = vunpack.c.0.s8 %v1266_v33  ;;  %v1269_v41 = vshrl.u32 %v1268_v36, 7  ;;  %v1132_v43 = vrot.slane %v6812_v25, 1 }
  0x37   : > { %6391 = vmatmul.mubr.msk.f32.gmra.mxu0 %vm684_vm0, %v663_v2  ;;  %v1122_v30 = vsel %vm1119_vm1, %v1120_v24, %v1121_v26  ;;  %v1111_v34 = vsel %vm1070_vm2, %v6795_v19, %v1071_v27  ;;  %v1133_v44 = vrot.slane %v6818_v28, 1  ;;  %v1192_v50 = vmul.f32 0.75, %v6812_v25 }
  0x38   : > { %6415 = vmatmul.mubr.msk.f32.gmra.mxu1 %vm684_vm0, %v679_v62  ;;  %6393 = vmatprep.mubr.msk.f32.mxu0 %vm684_vm0, %v664_v1  ;;  %v1216_v35 = vmul.f32 0.25, %v1122_v30  ;;  %v1168_v37 = vmul.f32 0.25, %v1111_v34  ;;  %v1115_v39 = vsel %vm1070_vm2, %v6812_v25, %v1083_v29  ;;  %v6835_v45 = vsub.s32 %v1267_v38, %v1269_v41 }
  0x39   : > { %6417 = vmatprep.mubr.msk.f32.mxu1 %vm684_vm0, %v680_v4  ;;  %v1176_v47 = vmul.f32 0.25, %v1115_v39  ;;  %v1134_v51 = vsel %vm1119_vm1, %v1132_v43, %v1133_v44  ;;  %v3778_v57 = vunpack.c.l.s4 %v6509_v56  ;;  %v6849_v62 = vsub.s32 0, %v1269_v41 }
  0x3a   : > { %v1232_v40 = vadd.f32 %v1216_v35, %v1184_v31  ;;  %v1200_v42 = vadd.f32 %v1184_v31, %v1168_v37  ;;  %8683 = vst [vmem:[#allocation2_spill] sm:$0xff] %v6835_v45  ;;  %v1224_v55 = vmul.f32 0.25, %v1134_v51  ;;  %v4582_v34 = vcombine.high %v6242_v3, %v6242_v3 }
  0x3b   : > { %6394 = vmatmul.mubr.msk.f32.gmra.mxu0 %vm684_vm0, %v665_v5  ;;  %v6842_v52 = vadd.f32 %v1192_v50, %v1176_v47  ;;  %8684 = vst [vmem:[#allocation3_spill] sm:$0xff] %v6849_v62  ;;  %v3779_v63 = vunpack.c.0.s8 %v3778_v57  ;;  %v1160_v57 = vsel %vm1119_vm1, %v1121_v26, %v6807_v23 }
  0x3c   : > { %6418 = vmatmul.mubr.msk.f32.gmra.mxu1 %vm684_vm0, %v681_v6  ;;  %v2192_v46 = vcombine.high %v1232_v40, %v1232_v40  ;;  %v1264_v48 = vcombine.high %v1200_v42, %v1200_v42  ;;  %v1240_v2 = vadd.f32 %v1224_v55, %v1192_v50  ;;  %v2199_v43 = vrot.slane %v1232_v40, %v6835_v45 }
  0x3d   : > { %v1656_v59 = vcombine.high %v6842_v52, %v6842_v52  ;;  %v6858_v11 = vsub.s32 %v3779_v63, %v1269_v41  ;;  %v4737_v41 = vcombine.high %v6243_v32, %v6243_v32  ;;  %v1663_v25 = vrot.slane %v6842_v52, %v6835_v45 }
  0x3e   : > { %v2206_v49 = vrot.slane %v2192_v46, %v6835_v45  ;;  %v1278_v53 = vrot.slane %v1264_v48, %v6835_v45  ;;  %v2584_v7 = vcombine.high %v1240_v2, %v1240_v2  ;;  %v2207_v19 = vcombine.high %v2199_v43, %v2199_v43 }
  0x3f   : > { %v1670_v4 = vrot.slane %v1656_v59, %v6835_v45  ;;  %v6866_v35 = vrot.slane %v6242_v3, %v6858_v11  ;;  %v6887_v50 = vrot.slane %v4582_v34, %v6858_v11  ;;  %v6894_v40 = vrot.slane %v6243_v32, %v6858_v11 }
  0x40   : > { %v2208_v54 = vcombine.high %v2206_v49, %v2206_v49  ;;  %v2222_v58 = vrot.slane %v2206_v49, %v6835_v45  ;;  %v1280_v60 = vcombine.high %v1278_v53, %v1278_v53  ;;  %v1294_v0 = vrot.slane %v1278_v53, %v6835_v45 }
  0x41   : > { %v1672_v33 = vcombine.high %v1670_v4, %v1670_v4  ;;  %v6870_v38 = vrot.slane %v1670_v4, %v6835_v45  ;;  %v2598_v39 = vrot.slane %v2584_v7, %v6835_v45  ;;  %v6891_v51 = vcombine.high %v6866_v35, %v6866_v35 }
  0x42   : > { %v2236_v61 = vrot.slane %v2208_v54, %v6835_v45  ;;  %v2238_v1 = vcombine.high %v2222_v58, %v2222_v58  ;;  %v1308_v5 = vrot.slane %v1280_v60, %v6835_v45  ;;  %v2995_v10 = vrot.slane %v2222_v58, %v6849_v62 }
  0x43   : > { %v1310_v24 = vcombine.high %v1294_v0, %v1294_v0  ;;  %v6884_v49 = vrot.slane %v1672_v33, %v6835_v45  ;;  %v1072_v53 = vrot.slane %v6807_v23, 7  ;;  %v1702_v55 = vcombine.high %v6870_v38, %v6870_v38 }
  0x44   : > { %v2240_v6 = vcombine.high %v2236_v61, %v2236_v61  ;;  %v2999_v30 = vrot.slane %v2236_v61, %v6849_v62  ;;  %v3003_v31 = vrot.slane %v2238_v1, %v6849_v62  ;;  %v1312_v36 = vcombine.high %v1308_v5, %v1308_v5 }
  0x45   : > { %v6875_v46 = vsel %vm1070_vm2, %v1294_v0, %v2995_v10  ;;  %v2600_v56 = vcombine.high %v2598_v39, %v2598_v39  ;;  %v6907_v58 = vrot.slane %v4737_v41, %v6858_v11  ;;  %v2614_v59 = vrot.slane %v2598_v39, %v6835_v45 }
  0x46   : > { %v3007_v37 = vrot.slane %v2240_v6, %v6849_v62  ;;  %v6878_v47 = vsel %vm1070_vm2, %v1308_v5, %v2999_v30  ;;  %v6881_v48 = vsel %vm1070_vm2, %v1310_v24, %v3003_v31  ;;  %v1073_v60 = vsel %vm1070_vm2, %v1071_v27, %v1072_v53 }
  0x47   : > { %v1185_v61 = vmul.f32 0.75, %v6807_v23  ;;  %v1704_v63 = vcombine.high %v6884_v49, %v6884_v49  ;;  %v1271_v0 = vrot.slane %v1200_v42, %v6835_v45  ;;  %v1169_v1 = vmul.f32 0.25, %v1073_v60 }
  0x48   : > { %v6898_v54 = vsel %vm1070_vm2, %v1312_v36, %v3007_v37  ;;  %v1217_v4 = vmul.f32 0.25, %v1160_v57  ;;  %v6919_v26 = vcombine.high %v6887_v50, %v6887_v50  ;;  %v6923_v5 = vcombine.high %v6894_v40, %v6894_v40 }
  0x49   : > { %v1084_v27 = vrot.slane %v6818_v28, 7  ;;  %v2628_v23 = vrot.slane %v2600_v56, %v6835_v45  ;;  %v2215_v6 = vrot.slane %v2199_v43, %v6835_v45  ;;  %v6928_v3 = vadd.f32 %v1185_v61, %v1169_v1 }
  0x4a   : > { %v6930_v42 = vadd.f32 %v1217_v4, %v1185_v61  ;;  %v2630_v7 = vcombine.high %v2614_v59, %v2614_v59  ;;  %v3251_v10 = vrot.slane %v2614_v59, %v6849_v62  ;;  %v2591_v24 = vrot.slane %v1240_v2, %v6835_v45 }
  0x4b   : > { %v1164_v30 = vsel %vm1119_vm1, %v1133_v44, %v6818_v28  ;;  %v1279_v31 = vcombine.high %v1271_v0, %v1271_v0  ;;  %v1287_v32 = vrot.slane %v1271_v0, %v6835_v45  ;;  %v1085_v34 = vsel %vm1070_vm2, %v1083_v29, %v1084_v27 }
  0x4c   : > { %v2241_v33 = vcombine.high %v6930_v42, %v6930_v42  ;;  %v2229_v36 = vrot.slane %v2207_v19, %v6835_v45  ;;  %v1313_v2 = vcombine.high %v6928_v3, %v6928_v3  ;;  %v1177_v37 = vmul.f32 0.25, %v1085_v34 }
  0x4d   : > { %v1193_v39 = vmul.f32 0.75, %v6818_v28  ;;  %v2632_v41 = vcombine.high %v2628_v23, %v2628_v23  ;;  %v3255_v44 = vrot.slane %v2628_v23, %v6849_v62  ;;  %v1225_v53 = vmul.f32 0.25, %v1164_v30 }
  0x4e   : > { %v2255_v43 = vrot.slane %v2241_v33, %v6835_v45  ;;  %v6952_v56 = vcombine.high %v6907_v58, %v6907_v58  ;;  %v2599_v29 = vcombine.high %v2591_v24, %v2591_v24  ;;  %v3259_v59 = vrot.slane %v2630_v7, %v6849_v62 }
  0x4f   : > { %v6956_v57 = vadd.f32 %v1193_v39, %v1177_v37  ;;  %v6961_v28 = vsel %vm1070_vm2, %v6870_v38, %v3251_v10  ;;  %v1301_v60 = vrot.slane %v1279_v31, %v6835_v45  ;;  %v2237_v61 = vcombine.high %v2215_v6, %v2215_v6 }
  0x50   : > { %8685 = vst [vmem:[#allocation4_spill] sm:$0xff] %v6952_v56  ;;  %v1309_v0 = vcombine.high %v1287_v32, %v1287_v32  ;;  %v2239_v1 = vcombine.high %v2229_v36, %v2229_v36  ;;  %v1327_v4 = vrot.slane %v1313_v2, %v6835_v45  ;;  %v2257_v19 = vcombine.high %v2255_v43, %v2255_v43 }
  0x51   : > { %v3263_v27 = vrot.slane %v2632_v41, %v6849_v62  ;;  %v6968_v52 = vsel %vm1070_vm2, %v6884_v49, %v3255_v44  ;;  %v6970_v23 = vadd.f32 %v1225_v53, %v1193_v39  ;;  %v1705_v38 = vcombine.high %v6956_v57, %v6956_v57 }
  0x52   : > { %v2979_v7 = vrot.slane %v2215_v6, %v6849_v62  ;;  %v1671_v10 = vcombine.high %v1663_v25, %v1663_v25  ;;  %v2607_v30 = vrot.slane %v2591_v24, %v6835_v45  ;;  %v2621_v31 = vrot.slane %v2599_v29, %v6835_v45 }
  0x53   : > { %v6978_v33 = vsel %vm1070_vm2, %v1702_v55, %v3259_v59  ;;  %v1311_v34 = vcombine.high %v1301_v60, %v1301_v60  ;;  %v2983_v2 = vrot.slane %v2229_v36, %v6849_v62  ;;  %v2987_v49 = vrot.slane %v2237_v61, %v6849_v62 }
  0x54   : > { %v2991_v37 = vrot.slane %v2239_v1, %v6849_v62  ;;  %v1329_v39 = vcombine.high %v1327_v4, %v1327_v4  ;;  %v2271_v41 = vrot.slane %v2255_v43, %v6835_v45  ;;  %v2285_v6 = vrot.slane %v2257_v19, %v6835_v45 }
  0x55   : > { %v6986_v44 = vsel %vm1070_vm2, %v1704_v63, %v3263_v27  ;;  %v1679_v24 = vrot.slane %v1663_v25, %v6835_v45  ;;  %v1719_v55 = vrot.slane %v1705_v38, %v6835_v45  ;;  %v2633_v53 = vcombine.high %v6970_v23, %v6970_v23 }
  0x56   : > { %v1693_v36 = vrot.slane %v1671_v10, %v6835_v45  ;;  %v2629_v29 = vcombine.high %v2607_v30, %v2607_v30  ;;  %v2631_v59 = vcombine.high %v2621_v31, %v2621_v31  ;;  %v3235_v61 = vrot.slane %v2607_v30, %v6849_v62 }
  0x57   : > { %v6995_v43 = vsel %vm1070_vm2, %v1287_v32, %v2979_v7  ;;  %v6998_v1 = vsel %vm1070_vm2, %v1301_v60, %v2983_v2  ;;  %v7001_v63 = vsel %vm1070_vm2, %v1309_v0, %v2987_v49  ;;  %v1343_v25 = vrot.slane %v1327_v4, %v6835_v45 }
  0x58   : > { %8686 = vst [vmem:[#allocation5_spill] sm:$0xff] %v6998_v1  ;;  %8687 = vst [vmem:[#allocation6_spill] sm:$0xff] %v7001_v63  ;;  %v7005_v19 = vsel %vm1070_vm2, %v1311_v34, %v2991_v37  ;;  %v1357_v27 = vrot.slane %v1329_v39, %v6835_v45  ;;  %v2287_v38 = vcombine.high %v2271_v41, %v2271_v41 }
  0x59   : > { %8688 = vst [vmem:[#allocation7_spill] sm:$0xff] %v7005_v19  ;;  %v2289_v10 = vcombine.high %v2285_v6, %v2285_v6  ;;  %v1701_v56 = vcombine.high %v1679_v24, %v1679_v24  ;;  %v3239_v30 = vrot.slane %v2621_v31, %v6849_v62  ;;  %v1721_v32 = vcombine.high %v1719_v55, %v1719_v55 }
  0x5a   : > { %v2647_v7 = vrot.slane %v2633_v53, %v6835_v45  ;;  %v1703_v60 = vcombine.high %v1693_v36, %v1693_v36  ;;  %v3243_v2 = vrot.slane %v2629_v29, %v6849_v62  ;;  %v3247_v0 = vrot.slane %v2631_v59, %v6849_v62 }
  0x5b   : > { %v7013_v4 = vsel %vm1070_vm2, %v1679_v24, %v3235_v61  ;;  %v1359_v34 = vcombine.high %v1343_v25, %v1343_v25  ;;  %v3027_v49 = vrot.slane %v2271_v41, %v6849_v62  ;;  %v3031_v37 = vrot.slane %v2285_v6, %v6849_v62 }
  0x5c   : > { %8689 = vst [vmem:[#allocation8_spill] sm:$0xff] %v7013_v4  ;;  %v1320_v39 = vrot.slane %v6928_v3, %v6835_v45  ;;  %v1361_v31 = vcombine.high %v1357_v27, %v1357_v27  ;;  %v3035_v19 = vrot.slane %v2287_v38, %v6849_v62  ;;  %v3039_v53 = vrot.slane %v2289_v10, %v6849_v62 }
  0x5d   : > { %v7022_v29 = vrot.slane %v1719_v55, %v6835_v45  ;;  %v7025_v59 = vsel %vm1070_vm2, %v1693_v36, %v3239_v30  ;;  %v7028_v24 = vrot.slane %v1721_v32, %v6835_v45  ;;  %v2649_v41 = vcombine.high %v2647_v7, %v2647_v7 }
  0x5e   : > { %8690 = vst [vmem:[#allocation9_spill] sm:$0xff] %v7025_v59  ;;  %v2248_v6 = vrot.slane %v6930_v42, %v6835_v45  ;;  %v7033_v3 = vsel %vm1070_vm2, %v1701_v56, %v3243_v2  ;;  %v7036_v61 = vsel %vm1070_vm2, %v1703_v60, %v3247_v0  ;;  %v2663_v55 = vrot.slane %v2647_v7, %v6835_v45  ;;  %v7069_v60 = vld [vmem:[%s6762_s17 + $0x30] sm:$0xff] }
  0x5f   : > { %8691 = vst [vmem:[#allocation10_spill] sm:$0xff] %v7033_v3  ;;  %8692 = vst [vmem:[#allocation11_spill] sm:$0xff] %v7036_v61  ;;  %v7041_v36 = vadd.f32 %v6774_v12, %v6792_v18  ;;  %v7044_v38 = vsel %vm1070_vm2, %v1343_v25, %v3027_v49  ;;  %v7047_v10 = vsel %vm1070_vm2, %v1357_v27, %v3031_v37 }
  0x60   : > { %8693 = vst [vmem:[#allocation12_spill] sm:$0xff] %v7044_v38  ;;  %8694 = vst [vmem:[#allocation13_spill] sm:$0xff] %v7047_v10  ;;  %v1328_v42 = vcombine.high %v1320_v39, %v1320_v39  ;;  %v7050_v56 = vrot.slane %v1320_v39, %v6835_v45  ;;  %v7053_v30 = vsel %vm1070_vm2, %v1359_v34, %v3035_v19 }
  0x61   : > { %8695 = vst [vmem:[#allocation14_spill] sm:$0xff] %v7053_v30  ;;  %v7056_v32 = vsel %vm1070_vm2, %v1361_v31, %v3039_v53  ;;  %v1751_v12 = vcombine.high %v7022_v29, %v7022_v29  ;;  %v7062_v18 = vadd.f32 %v6783_v15, %v6798_v20  ;;  %v2677_v27 = vrot.slane %v2649_v41, %v6835_v45  ;;  %v7085_v31 = vld [vmem:[%s6762_s17 + $0x38] sm:$0xff] }
  0x62   : > { %8696 = vst [vmem:[#allocation15_spill] sm:$0xff] %v7056_v32  ;;  %v2256_v7 = vcombine.high %v2248_v6, %v2248_v6  ;;  %v8646_v19 = vrot.slane %v7041_v36, 7  ;;  %v2679_v2 = vcombine.high %v2663_v55, %v2663_v55  ;;  %v3283_v0 = vrot.slane %v2663_v55, %v6849_v62 }
  0x63   : > { %v1123_v34 = vrot.slane %v7041_v36, 1  ;;  %v8647_v49 = vrot.slane %v7062_v18, 1  ;;  %v7075_v15 = vrot.slane %v1328_v42, %v6835_v45  ;;  %v2264_v37 = vrot.slane %v2248_v6, %v6835_v45 }
  0x64   : > { %v1112_v39 = vsel %vm1070_vm2, %v7041_v36, %v8646_v19  ;;  %v1186_v55 = vmul.f32 0.75, %v7041_v36  ;;  %v1042_v42 = vmul.f32 0.25, %v7069_v60  ;;  %v2681_v25 = vcombine.high %v2677_v27, %v2677_v27 }
  0x65   : > { %v1125_v53 = vsel %vm1119_vm1, %v1123_v34, %v8647_v49  ;;  %v1170_v41 = vmul.f32 0.25, %v1112_v39  ;;  %v2278_v20 = vrot.slane %v2256_v7, %v6835_v45  ;;  %v1712_v6 = vrot.slane %v6956_v57, %v6835_v45 }
  0x66   : > { %v2640_v19 = vrot.slane %v6970_v23, %v6835_v45  ;;  %v1218_v30 = vmul.f32 0.25, %v1125_v53  ;;  %v1043_v10 = vmul.f32 0.25, %v7085_v31  ;;  %v7101_v34 = vadd.f32 %v1042_v42, %v6801_v21 }
  0x67   : > { %v7097_v32 = vadd.f32 %v1186_v55, %v1170_v41  ;;  %v3287_v39 = vrot.slane %v2677_v27, %v6849_v62  ;;  %v3291_v49 = vrot.slane %v2679_v2, %v6849_v62  ;;  %v7107_v7 = vsel %vm1070_vm2, %v7022_v29, %v3283_v0 }
  0x68   : > { %8697 = vst [vmem:[#allocation16_spill] sm:$0xff] %v7107_v7  ;;  %v1360_v57 = vcombine.high %v7075_v15, %v7075_v15  ;;  %v1234_v23 = vadd.f32 %v1218_v30, %v1186_v55  ;;  %v7114_v41 = vadd.f32 %v1043_v10, %v6804_v22  ;;  %v8648_v21 = vrot.slane %v7101_v34, 7 }
  0x69   : > { %v1362_v53 = vcombine.high %v7097_v32, %v7097_v32  ;;  %v2286_v42 = vcombine.high %v2264_v37, %v2264_v37  ;;  %v2288_v27 = vcombine.high %v2278_v20, %v2278_v20  ;;  %v3011_v2 = vrot.slane %v2264_v37, %v6849_v62 }
  0x6a   : > { %v1135_v38 = vrot.slane %v7101_v34, 1  ;;  %v2648_v29 = vcombine.high %v2640_v19, %v2640_v19  ;;  %v2290_v0 = vcombine.high %v1234_v23, %v1234_v23  ;;  %v1116_v30 = vsel %vm1070_vm2, %v7101_v34, %v8648_v21 }
  0x6b   : > { %v8649_v55 = vrot.slane %v7114_v41, 1  ;;  %v3295_v22 = vrot.slane %v2681_v25, %v6849_v62  ;;  %v1376_v10 = vrot.slane %v1362_v53, %v6835_v45  ;;  %v1178_v7 = vmul.f32 0.25, %v1116_v30 }
  0x6c   : > { %v1194_v61 = vmul.f32 0.75, %v7101_v34  ;;  %v7129_v37 = vsel %vm1070_vm2, %v7028_v24, %v3287_v39  ;;  %v7132_v3 = vsel %vm1070_vm2, %v1751_v12, %v3291_v49  ;;  %v2304_v59 = vrot.slane %v2290_v0, %v6835_v45 }
  0x6d   : > { %8698 = vst [vmem:[#allocation17_spill] sm:$0xff] %v7129_v37  ;;  %8699 = vst [vmem:[#allocation18_spill] sm:$0xff] %v7132_v3  ;;  %v1137_v21 = vsel %vm1119_vm1, %v1135_v38, %v8649_v55  ;;  %v3015_v25 = vrot.slane %v2278_v20, %v6849_v62  ;;  %v1720_v4 = vcombine.high %v1712_v6, %v1712_v6 }
  0x6e   : > { %v7139_v53 = vadd.f32 %v1194_v61, %v1178_v7  ;;  %v1226_v30 = vmul.f32 0.25, %v1137_v21  ;;  %v3019_v63 = vrot.slane %v2286_v42, %v6849_v62  ;;  %v2656_v39 = vrot.slane %v2640_v19, %v6835_v45 }
  0x6f   : > { %v2670_v37 = vrot.slane %v2648_v29, %v6835_v45  ;;  %v2306_v12 = vcombine.high %v2304_v59, %v2304_v59  ;;  %v3023_v49 = vrot.slane %v2288_v27, %v6849_v62  ;;  %v1378_v0 = vcombine.high %v1376_v10, %v1376_v10 }
  0x70   : > { %v7145_v3 = vadd.f32 %v1226_v30, %v1194_v61  ;;  %v1754_v38 = vcombine.high %v7139_v53, %v7139_v53  ;;  %v7151_v20 = vsel %vm1070_vm2, %v7050_v56, %v3011_v2  ;;  %v1728_v7 = vrot.slane %v1712_v6, %v6835_v45 }
  0x71   : > { %8700 = vst [vmem:[#allocation19_spill] sm:$0xff] %v7151_v20  ;;  %v2320_v21 = vrot.slane %v2304_v59, %v6835_v45  ;;  %v2334_v19 = vrot.slane %v2306_v12, %v6835_v45  ;;  %v8701_v42 = vcombine.high %v7028_v24, %v7028_v24  ;;  %v1742_v61 = vrot.slane %v1720_v4, %v6835_v45 }
  0x72   : > { %v1768_v29 = vrot.slane %v1754_v38, %v6835_v45  ;;  %v2682_v2 = vcombine.high %v7145_v3, %v7145_v3  ;;  %v7168_v6 = vsel %vm1070_vm2, %v7075_v15, %v3015_v25  ;;  %v2678_v59 = vcombine.high %v2656_v39, %v2656_v39 }
  0x73   : > { %v7160_v27 = vsel %vm1070_vm2, %v8701_v42, %v3295_v22  ;;  %8703 = vst [vmem:[#allocation21_spill] sm:$0xff] %v7168_v6  ;;  %v2680_v30 = vcombine.high %v2670_v37, %v2670_v37  ;;  %v1392_v12 = vrot.slane %v1376_v10, %v6835_v45  ;;  %v8704_v24 = vcombine.high %v7050_v56, %v7050_v56 }
  0x74   : > { %8702 = vst [vmem:[#allocation20_spill] sm:$0xff] %v7160_v27  ;;  %v7178_v4 = vsel %vm1070_vm2, %v1360_v57, %v3023_v49  ;;  %v1406_v38 = vrot.slane %v1378_v0, %v6835_v45  ;;  %v2696_v42 = vrot.slane %v2682_v2, %v6835_v45  ;;  %v1750_v55 = vcombine.high %v1728_v7, %v1728_v7 }
  0x75   : > { %v7175_v22 = vsel %vm1070_vm2, %v8704_v24, %v3019_v63  ;;  %8706 = vst [vmem:[#allocation23_spill] sm:$0xff] %v7178_v4  ;;  %v2336_v15 = vcombine.high %v2320_v21, %v2320_v21  ;;  %v2338_v25 = vcombine.high %v2334_v19, %v2334_v19  ;;  %v1770_v6 = vcombine.high %v1768_v29, %v1768_v29 }
  0x76   : > { %8705 = vst [vmem:[#allocation22_spill] sm:$0xff] %v7175_v22  ;;  %v1752_v20 = vcombine.high %v1742_v61, %v1742_v61  ;;  %v3267_v10 = vrot.slane %v2656_v39, %v6849_v62  ;;  %v3271_v27 = vrot.slane %v2670_v37, %v6849_v62  ;;  %v1369_v63 = vrot.slane %v7097_v32, %v6835_v45 }
  0x77   : > { %v3275_v56 = vrot.slane %v2678_v59, %v6849_v62  ;;  %v3279_v57 = vrot.slane %v2680_v30, %v6849_v62  ;;  %v1408_v49 = vcombine.high %v1392_v12, %v1392_v12  ;;  %v2297_v0 = vrot.slane %v1234_v23, %v6835_v45 }
  0x78   : > { %v1410_v2 = vcombine.high %v1406_v38, %v1406_v38  ;;  %v3059_v24 = vrot.slane %v2320_v21, %v6849_v62  ;;  %v3063_v4 = vrot.slane %v2334_v19, %v6849_v62  ;;  %v2698_v22 = vcombine.high %v2696_v42, %v2696_v42 }
  0x79   : > { %v3067_v39 = vrot.slane %v2336_v15, %v6849_v62  ;;  %v3071_v37 = vrot.slane %v2338_v25, %v6849_v62  ;;  %v1784_v1 = vrot.slane %v1768_v29, %v6835_v45  ;;  %v7195_v32 = vrot.slane %v1770_v6, %v6835_v45 }
  0x7a   : > { %v7198_v59 = vsel %vm1070_vm2, %v1728_v7, %v3267_v10  ;;  %v7201_v23 = vsel %vm1070_vm2, %v1742_v61, %v3271_v27  ;;  %v2712_v21 = vrot.slane %v2696_v42, %v6835_v45  ;;  %v1377_v30 = vcombine.high %v1369_v63, %v1369_v63 }
  0x7b   : > { %8707 = vst [vmem:[#allocation24_spill] sm:$0xff] %v7201_v23  ;;  %v7205_v19 = vsel %vm1070_vm2, %v1750_v55, %v3275_v56  ;;  %v7208_v15 = vrot.slane %v1369_v63, %v6835_v45  ;;  %v2305_v25 = vcombine.high %v2297_v0, %v2297_v0  ;;  %v2313_v29 = vrot.slane %v2297_v0, %v6835_v45 }
  0x7c   : > { %8708 = vst [vmem:[#allocation25_spill] sm:$0xff] %v7205_v19  ;;  %v7212_v6 = vsel %vm1070_vm2, %v1752_v20, %v3279_v57  ;;  %v7215_v7 = vsel %vm1070_vm2, %v1392_v12, %v3059_v24  ;;  %v7218_v27 = vsel %vm1070_vm2, %v1406_v38, %v3063_v4  ;;  %v2726_v61 = vrot.slane %v2698_v22, %v6835_v45 }
  0x7d   : > { %8709 = vst [vmem:[#allocation26_spill] sm:$0xff] %v7212_v6  ;;  %8710 = vst [vmem:[#allocation27_spill] sm:$0xff] %v7215_v7  ;;  %v7222_v55 = vsel %vm1070_vm2, %v1408_v49, %v3067_v39  ;;  %v7225_v42 = vsel %vm1070_vm2, %v1410_v2, %v3071_v37  ;;  %v1800_v10 = vcombine.high %v1784_v1, %v1784_v1  ;;  %v1075_v4 = vrot.slane %v7062_v18, 7 }
  0x7e   : > { %8711 = vst [vmem:[#allocation28_spill] sm:$0xff] %v7218_v27  ;;  %8712 = vst [vmem:[#allocation29_spill] sm:$0xff] %v7222_v55  ;;  %v1802_v63 = vcombine.high %v7195_v32, %v7195_v32  ;;  %v2728_v20 = vcombine.high %v2712_v21, %v2712_v21  ;;  %v3315_v56 = vrot.slane %v2712_v21, %v6849_v62  ;;  %v8714_v49 = vrot.slane %v7062_v18, 1 }
  0x7f   : > { %8713 = vst [vmem:[#allocation30_spill] sm:$0xff] %v7225_v42  ;;  %v1399_v12 = vrot.slane %v1377_v30, %v6835_v45  ;;  %v1407_v22 = vcombine.high %v7208_v15, %v7208_v15  ;;  %v2327_v38 = vrot.slane %v2305_v25, %v6835_v45  ;;  %v2335_v57 = vcombine.high %v2313_v29, %v2313_v29 }
  0x80   : > { %v1161_v0 = vsel %vm1119_vm1, %v8714_v49, %v7062_v18  ;;  %v2730_v2 = vcombine.high %v2726_v61, %v2726_v61  ;;  %v1761_v24 = vrot.slane %v7139_v53, %v6835_v45  ;;  %v8715_v39 = vrot.slane %v7041_v36, 7 }
  0x81   : > { %v1187_v21 = vmul.f32 0.75, %v7062_v18  ;;  %v3319_v30 = vrot.slane %v2726_v61, %v6849_v62  ;;  %v2689_v25 = vrot.slane %v7145_v3, %v6835_v45  ;;  %v1219_v27 = vmul.f32 0.25, %v1161_v0 }
  0x82   : > { %v1076_v37 = vsel %vm1070_vm2, %v8715_v39, %v1075_v4  ;;  %v3323_v55 = vrot.slane %v2728_v20, %v6849_v62  ;;  %v7250_v49 = vsel %vm1070_vm2, %v1784_v1, %v3315_v56  ;;  %v1409_v7 = vcombine.high %v1399_v12, %v1399_v12 }
  0x83   : > { %v1171_v42 = vmul.f32 0.25, %v1076_v37  ;;  %8716 = vst [vmem:[#allocation31_spill] sm:$0xff] %v7250_v49  ;;  %v1087_v53 = vrot.slane %v7114_v41, 7  ;;  %v2337_v36 = vcombine.high %v2327_v38, %v2327_v38  ;;  %v3043_v4 = vrot.slane %v2313_v29, %v6849_v62 }
  0x84   : > { %v1235_v18 = vadd.f32 %v1219_v27, %v1187_v21  ;;  %v3327_v61 = vrot.slane %v2730_v2, %v6849_v62  ;;  %v3047_v6 = vrot.slane %v2327_v38, %v6849_v62  ;;  %v1769_v3 = vcombine.high %v1761_v24, %v1761_v24 }
  0x85   : > { %v1203_v39 = vadd.f32 %v1187_v21, %v1171_v42  ;;  %v8717_v0 = vrot.slane %v7114_v41, 1  ;;  %v2697_v1 = vcombine.high %v2689_v25, %v2689_v25  ;;  %v8718_v49 = vrot.slane %v7101_v34, 7 }
  0x86   : > { %v2339_v37 = vcombine.high %v1235_v18, %v1235_v18  ;;  %v7265_v29 = vsel %vm1070_vm2, %v7195_v32, %v3319_v30  ;;  %v2705_v27 = vrot.slane %v2689_v25, %v6835_v45  ;;  %v1195_v38 = vmul.f32 0.75, %v7114_v41 }
  0x87   : > { %v1165_v20 = vsel %vm1119_vm1, %v8717_v0, %v7114_v41  ;;  %v1411_v56 = vcombine.high %v1203_v39, %v1203_v39  ;;  %v1088_v19 = vsel %vm1070_vm2, %v8718_v49, %v1087_v53  ;;  %v7270_v2 = vsel %vm1070_vm2, %v1800_v10, %v3323_v55 }
  0x88   : > { %v1179_v42 = vmul.f32 0.25, %v1088_v19  ;;  %v2353_v0 = vrot.slane %v2339_v37, %v6835_v45  ;;  %v1227_v23 = vmul.f32 0.25, %v1165_v20  ;;  %v3051_v34 = vrot.slane %v2335_v57, %v6849_v62 }
  0x89   : > { %v1425_v21 = vrot.slane %v1411_v56, %v6835_v45  ;;  %v3055_v49 = vrot.slane %v2337_v36, %v6849_v62  ;;  %v7278_v32 = vsel %vm1070_vm2, %v7208_v15, %v3043_v4  ;;  %v1777_v41 = vrot.slane %v1761_v24, %v6835_v45 }
  0x8a   : > { %v7280_v30 = vadd.f32 %v1195_v38, %v1179_v42  ;;  %v1791_v19 = vrot.slane %v1769_v3, %v6835_v45  ;;  %v2719_v55 = vrot.slane %v2697_v1, %v6835_v45  ;;  %v2355_v10 = vcombine.high %v2353_v0, %v2353_v0 }
  0x8b   : > { %v2727_v25 = vcombine.high %v2705_v27, %v2705_v27  ;;  %v3299_v53 = vrot.slane %v2705_v27, %v6849_v62  ;;  %v1243_v20 = vadd.f32 %v1227_v23, %v1195_v38  ;;  %v7289_v36 = vsel %vm1070_vm2, %v1802_v63, %v3327_v61 }
  0x8c   : > { %v1803_v57 = vcombine.high %v7280_v30, %v7280_v30  ;;  %v7292_v15 = vsel %vm1070_vm2, %v1399_v12, %v3047_v6  ;;  %v1427_v4 = vcombine.high %v1425_v21, %v1425_v21  ;;  %v2369_v24 = vrot.slane %v2353_v0, %v6835_v45 }
  0x8d   : > { %8719 = vst [vmem:[#allocation32_spill] sm:$0xff] %v7292_v15  ;;  %v7296_v3 = vsel %vm1070_vm2, %v1407_v22, %v3051_v34  ;;  %v2383_v1 = vrot.slane %v2355_v10, %v6835_v45  ;;  %v2731_v23 = vcombine.high %v1243_v20, %v1243_v20  ;;  %v7301_v37 = vsel %vm1070_vm2, %v1409_v7, %v3055_v49 }
  0x8e   : > { %v1817_v56 = vrot.slane %v1803_v57, %v6835_v45  ;;  %8720 = vst [vmem:[#allocation33_spill] sm:$0xff] %v7301_v37  ;;  %v1799_v27 = vcombine.high %v1777_v41, %v1777_v41  ;;  %v2729_v63 = vcombine.high %v2719_v55, %v2719_v55  ;;  %v3303_v61 = vrot.slane %v2719_v55, %v6849_v62 }
  0x8f   : > { %v1801_v6 = vcombine.high %v1791_v19, %v1791_v19  ;;  %v3307_v12 = vrot.slane %v2727_v25, %v6849_v62  ;;  %v7306_v42 = vsel %vm1070_vm2, %v1777_v41, %v3299_v53  ;;  %v2745_v22 = vrot.slane %v2731_v23, %v6835_v45 }
  0x90   : > { %8721 = vst [vmem:[#allocation34_spill] sm:$0xff] %v7306_v42  ;;  %v1441_v38 = vrot.slane %v1425_v21, %v6835_v45  ;;  %v1455_v0 = vrot.slane %v1427_v4, %v6835_v45  ;;  %v2385_v34 = vcombine.high %v2369_v24, %v2369_v24  ;;  %v2346_v7 = vrot.slane %v1235_v18, %v6835_v45 }
  0x91   : > { %v2387_v49 = vcombine.high %v2383_v1, %v2383_v1  ;;  %v1819_v10 = vcombine.high %v1817_v56, %v1817_v56  ;;  %v2747_v57 = vcombine.high %v2745_v22, %v2745_v22  ;;  %v2761_v55 = vrot.slane %v2745_v22, %v6835_v45 }
  0x92   : > { %v3311_v37 = vrot.slane %v2729_v63, %v6849_v62  ;;  %v7315_v25 = vsel %vm1070_vm2, %v1791_v19, %v3303_v61  ;;  %v3091_v41 = vrot.slane %v2369_v24, %v6849_v62  ;;  %v1418_v53 = vrot.slane %v1203_v39, %v6835_v45 }
  0x93   : > { %v7320_v21 = vsel %vm1070_vm2, %v1799_v27, %v3307_v12  ;;  %v3095_v4 = vrot.slane %v2383_v1, %v6849_v62  ;;  %v2775_v18 = vrot.slane %v2747_v57, %v6835_v45  ;;  %v2354_v23 = vcombine.high %v2346_v7, %v2346_v7 }
  0x94   : > { %8722 = vst [vmem:[#allocation35_spill] sm:$0xff] %v7320_v21  ;;  %v1457_v42 = vcombine.high %v1441_v38, %v1441_v38  ;;  %v3099_v22 = vrot.slane %v2385_v34, %v6849_v62  ;;  %v1833_v63 = vrot.slane %v1817_v56, %v6835_v45  ;;  %v2777_v15 = vcombine.high %v2761_v55, %v2761_v55 }
  0x95   : > { %v1459_v19 = vcombine.high %v1455_v0, %v1455_v0  ;;  %v3103_v61 = vrot.slane %v2387_v49, %v6849_v62  ;;  %v1847_v24 = vrot.slane %v1819_v10, %v6835_v45  ;;  %v1426_v39 = vcombine.high %v1418_v53, %v1418_v53 }
  0x96   : > { %v7329_v27 = vsel %vm1070_vm2, %v1801_v6, %v3311_v37  ;;  %v7332_v1 = vsel %vm1070_vm2, %v1441_v38, %v3091_v41  ;;  %v3347_v12 = vrot.slane %v2761_v55, %v6849_v62  ;;  %v2362_v57 = vrot.slane %v2346_v7, %v6835_v45 }
  0x97   : > { %v7337_v34 = vsel %vm1070_vm2, %v1455_v0, %v3095_v4  ;;  %v2779_v56 = vcombine.high %v2775_v18, %v2775_v18  ;;  %v1434_v21 = vrot.slane %v1418_v53, %v6835_v45  ;;  %v2376_v49 = vrot.slane %v2354_v23, %v6835_v45 }
  0x98   : > { %v7342_v10 = vsel %vm1070_vm2, %v1457_v42, %v3099_v22  ;;  %v1849_v37 = vcombine.high %v1833_v63, %v1833_v63  ;;  %v3351_v6 = vrot.slane %v2775_v18, %v6849_v62  ;;  %v3355_v38 = vrot.slane %v2777_v15, %v6849_v62 }
  0x99   : > { %v7347_v55 = vsel %vm1070_vm2, %v1459_v19, %v3103_v61  ;;  %v1851_v7 = vcombine.high %v1847_v24, %v1847_v24  ;;  %v7350_v0 = vrot.slane %v1426_v39, %v6835_v45  ;;  %v2738_v41 = vrot.slane %v1243_v20, %v6835_v45 }
  0x9a   : > { %v7354_v53 = vsel %vm1070_vm2, %v1833_v63, %v3347_v12  ;;  %v2384_v4 = vcombine.high %v2362_v57, %v2362_v57  ;;  %v1020_v42 = vmul.f32 0.25, %v6768_v8  ;;  %v1021_v23 = vmul.f32 0.25, %v6771_v9 }
  0x9b   : > { %v3359_v18 = vrot.slane %v2779_v56, %v6849_v62  ;;  %v1456_v15 = vcombine.high %v1434_v21, %v1434_v21  ;;  %v2386_v22 = vcombine.high %v2376_v49, %v2376_v49  ;;  %v3075_v19 = vrot.slane %v2362_v57, %v6849_v62 }
  0x9c   : > { %v7361_v61 = vsel %vm1070_vm2, %v1847_v24, %v3351_v6  ;;  %v7364_v39 = vsel %vm1070_vm2, %v1849_v37, %v3355_v38  ;;  %v7367_v20 = vmul.f32 0.75, %v6777_v13  ;;  %v7370_v63 = vmul.f32 0.75, %v6780_v14 }
  0x9d   : > { %v1458_v8 = vcombine.high %v7350_v0, %v7350_v0  ;;  %v3079_v9 = vrot.slane %v2376_v49, %v6849_v62  ;;  %v1810_v12 = vrot.slane %v7280_v30, %v6835_v45  ;;  %v2746_v57 = vcombine.high %v2738_v41, %v2738_v41 }
  0x9e   : > { %8723 = vst [vmem:[#allocation36_spill] sm:$0xff] %v7367_v20  ;;  %8724 = vst [vmem:[#allocation37_spill] sm:$0xff] %v7370_v63  ;;  %v7378_v24 = vadd.f32 %v7367_v20, %v1020_v42  ;;  %v7381_v56 = vadd.f32 %v7370_v63, %v1021_v23  ;;  %v7384_v13 = vmul.f32 0.25, %v6786_v16  ;;  %v7387_v14 = vmul.f32 0.75, %v7069_v60 }
  0x9f   : > { %v3083_v37 = vrot.slane %v2384_v4, %v6849_v62  ;;  %v3087_v49 = vrot.slane %v2386_v22, %v6849_v62  ;;  %v7392_v6 = vsel %vm1070_vm2, %v1434_v21, %v3075_v19  ;;  %v2754_v30 = vrot.slane %v2738_v41, %v6835_v45 }
  0xa0   : > { %8725 = vst [vmem:[#allocation38_spill] sm:$0xff] %v7378_v24  ;;  %8726 = vst [vmem:[#allocation39_spill] sm:$0xff] %v7381_v56  ;;  %v8652_v38 = vrot.slane %v7378_v24, 7  ;;  %v1126_v42 = vrot.slane %v7378_v24, 1  ;;  %v8654_v23 = vrot.slane %v7381_v56, 1  ;;  %v7399_v16 = vmul.f32 0.25, %v6789_v17 }
  0xa1   : > { %8727 = vst [vmem:[#allocation40_spill] sm:$0xff] %v7384_v13  ;;  %8728 = vst [vmem:[#allocation41_spill] sm:$0xff] %v7387_v14  ;;  %v7402_v60 = vsel %vm1070_vm2, %v1851_v7, %v3359_v18  ;;  %v1818_v4 = vcombine.high %v1810_v12, %v1810_v12  ;;  %v2768_v22 = vrot.slane %v2746_v57, %v6835_v45  ;;  %v1188_v21 = vmul.f32 0.75, %v7378_v24 }
  0xa2   : > { %8729 = vst [vmem:[#allocation42_spill] sm:$0xff] %v7399_v16  ;;  %v1113_v41 = vsel %vm1070_vm2, %v7378_v24, %v8652_v38  ;;  %v1128_v19 = vsel %vm1119_vm1, %v1126_v42, %v8654_v23  ;;  %v7414_v17 = vmul.f32 0.75, %v7085_v31  ;;  %v7418_v7 = vadd.f32 %v7387_v14, %v7384_v13 }
  0xa3   : > { %v7422_v18 = vsel %vm1070_vm2, %v7350_v0, %v3079_v9  ;;  %v1826_v57 = vrot.slane %v1810_v12, %v6835_v45  ;;  %v1172_v63 = vmul.f32 0.25, %v1113_v41  ;;  %v1220_v20 = vmul.f32 0.25, %v1128_v19 }
  0xa4   : > { %8730 = vst [vmem:[#allocation43_spill] sm:$0xff] %v7414_v17  ;;  %8731 = vst [vmem:[#allocation44_spill] sm:$0xff] %v7418_v7  ;;  %v2776_v38 = vcombine.high %v2754_v30, %v2754_v30  ;;  %v7427_v24 = vadd.f32 %v7414_v17, %v7399_v16  ;;  %v8661_v31 = vrot.slane %v7418_v7, 7  ;;  %v1138_v42 = vrot.slane %v7418_v7, 1 }
  0xa5   : > { %8732 = vst [vmem:[#allocation45_spill] sm:$0xff] %v7422_v18  ;;  %v7432_v23 = vsel %vm1070_vm2, %v1456_v15, %v3083_v37  ;;  %v1840_v14 = vrot.slane %v1818_v4, %v6835_v45  ;;  %v1204_v0 = vadd.f32 %v1188_v21, %v1172_v63  ;;  %v1236_v9 = vadd.f32 %v1220_v20, %v1188_v21 }
  0xa6   : > { %8733 = vst [vmem:[#allocation46_spill] sm:$0xff] %v7427_v24  ;;  %8734 = vst [vmem:[#allocation47_spill] sm:$0xff] %v7432_v23  ;;  %v2778_v13 = vcombine.high %v2768_v22, %v2768_v22  ;;  %v3331_v12 = vrot.slane %v2754_v30, %v6849_v62  ;;  %v1117_v41 = vsel %vm1070_vm2, %v7418_v7, %v8661_v31  ;;  %v8665_v19 = vrot.slane %v7427_v24, 1 }
  0xa7   : > { %v1460_v17 = vcombine.high %v1204_v0, %v1204_v0  ;;  %v2388_v16 = vcombine.high %v1236_v9, %v1236_v9  ;;  %v1180_v56 = vmul.f32 0.25, %v1117_v41  ;;  %v1196_v15 = vmul.f32 0.75, %v7418_v7 }
  0xa8   : > { %v1848_v37 = vcombine.high %v1826_v57, %v1826_v57  ;;  %v3335_v4 = vrot.slane %v2768_v22, %v6849_v62  ;;  %v3339_v20 = vrot.slane %v2776_v38, %v6849_v62  ;;  %v1140_v63 = vsel %vm1119_vm1, %v1138_v42, %v8665_v19 }
  0xa9   : > { %v1474_v30 = vrot.slane %v1460_v17, %v6835_v45  ;;  %v2402_v21 = vrot.slane %v2388_v16, %v6835_v45  ;;  %v7449_v31 = vadd.f32 %v1196_v15, %v1180_v56  ;;  %v1228_v18 = vmul.f32 0.25, %v1140_v63 }
  0xaa   : > { %v7452_v41 = vsel %vm1070_vm2, %v1458_v8, %v3087_v49  ;;  %v1850_v7 = vcombine.high %v1840_v14, %v1840_v14  ;;  %v3343_v23 = vrot.slane %v2778_v13, %v6849_v62  ;;  %v7456_v22 = vsel %vm1070_vm2, %v1826_v57, %v3331_v12 }
  0xab   : > { %8735 = vst [vmem:[#allocation48_spill] sm:$0xff] %v7449_v31  ;;  %v1476_v38 = vcombine.high %v1474_v30, %v1474_v30  ;;  %v1490_v24 = vrot.slane %v1474_v30, %v6835_v45  ;;  %v2404_v42 = vcombine.high %v2402_v21, %v2402_v21  ;;  %v2418_v17 = vrot.slane %v2402_v21, %v6835_v45 }
  0xac   : > { %v7461_v16 = vsel %vm1070_vm2, %v1840_v14, %v3335_v4  ;;  %v7464_v56 = vsel %vm1070_vm2, %v1848_v37, %v3339_v20  ;;  %v7466_v8 = vadd.f32 %v1228_v18, %v1196_v15  ;;  %v1852_v13 = vcombine.high %v7449_v31, %v7449_v31 }
  0xad   : > { %v1504_v49 = vrot.slane %v1476_v38, %v6835_v45  ;;  %v1506_v57 = vcombine.high %v1490_v24, %v1490_v24  ;;  %v2432_v12 = vrot.slane %v2404_v42, %v6835_v45  ;;  %v2434_v63 = vcombine.high %v2418_v17, %v2418_v17 }
  0xae   : > { %8736 = vst [vmem:[#allocation49_spill] sm:$0xff] %v7466_v8  ;;  %v7473_v30 = vsel %vm1070_vm2, %v1850_v7, %v3343_v23  ;;  %v3123_v14 = vrot.slane %v2418_v17, %v6849_v62  ;;  %v1866_v4 = vrot.slane %v1852_v13, %v6835_v45  ;;  %v2780_v18 = vcombine.high %v7466_v8, %v7466_v8 }
  0xaf   : > { %v1508_v15 = vcombine.high %v1504_v49, %v1504_v49  ;;  %v2436_v37 = vcombine.high %v2432_v12, %v2432_v12  ;;  %v3127_v20 = vrot.slane %v2432_v12, %v6849_v62  ;;  %v3131_v21 = vrot.slane %v2434_v63, %v6849_v62 }
  0xb0   : > { %v7482_v38 = vsel %vm1070_vm2, %v1490_v24, %v3123_v14  ;;  %v1868_v42 = vcombine.high %v1866_v4, %v1866_v4  ;;  %v1882_v23 = vrot.slane %v1866_v4, %v6835_v45  ;;  %v2794_v7 = vrot.slane %v2780_v18, %v6835_v45 }
  0xb1   : > { %v3135_v17 = vrot.slane %v2436_v37, %v6849_v62  ;;  %v7488_v13 = vsel %vm1070_vm2, %v1504_v49, %v3127_v20  ;;  %v7491_v19 = vsel %vm1070_vm2, %v1506_v57, %v3131_v21  ;;  %v2395_v12 = vrot.slane %v1236_v9, %v6835_v45 }
  0xb2   : > { %8737 = vst [vmem:[#allocation50_spill] sm:$0xff] %v7488_v13  ;;  %v7495_v63 = vrot.slane %v1868_v42, %v6835_v45  ;;  %v1898_v24 = vcombine.high %v1882_v23, %v1882_v23  ;;  %v2796_v14 = vcombine.high %v2794_v7, %v2794_v7  ;;  %v2810_v8 = vrot.slane %v2794_v7, %v6835_v45 }
  0xb3   : > { %v7499_v4 = vsel %vm1070_vm2, %v1508_v15, %v3135_v17  ;;  %v1467_v18 = vrot.slane %v1204_v0, %v6835_v45  ;;  %v2403_v37 = vcombine.high %v2395_v12, %v2395_v12  ;;  %v7503_v49 = vrot.slane %v2395_v12, %v6835_v45 }
  0xb4   : > { %8738 = vst [vmem:[#allocation51_spill] sm:$0xff] %v7495_v63  ;;  %8739 = vst [vmem:[#allocation52_spill] sm:$0xff] %v7499_v4  ;;  %v2824_v9 = vrot.slane %v2796_v14, %v6835_v45  ;;  %v2826_v20 = vcombine.high %v2810_v8, %v2810_v8  ;;  %v3379_v21 = vrot.slane %v2810_v8, %v6849_v62 }
  0xb5   : > { %8740 = vst [vmem:[#allocation53_spill] sm:$0xff] %v7503_v49  ;;  %v1475_v42 = vcombine.high %v1467_v18, %v1467_v18  ;;  %v7510_v7 = vrot.slane %v1467_v18, %v6835_v45  ;;  %v7513_v15 = vrot.slane %v2403_v37, %v6835_v45 }
  0xb6   : > { %v2828_v31 = vcombine.high %v2824_v9, %v2824_v9  ;;  %v3383_v57 = vrot.slane %v2824_v9, %v6849_v62  ;;  %v3387_v14 = vrot.slane %v2826_v20, %v6849_v62  ;;  %v7520_v4 = vsel %vm1070_vm2, %v1882_v23, %v3379_v21 }
  0xb7   : > { %8741 = vst [vmem:[#allocation54_spill] sm:$0xff] %v7510_v7  ;;  %8742 = vst [vmem:[#allocation55_spill] sm:$0xff] %v7513_v15  ;;  %v7535_v23 = vrot.slane %v1475_v42, %v6835_v45 }
  0xb8   : > { %8743 = vst [vmem:[#allocation56_spill] sm:$0xff] %v7520_v4  ;;  %v7525_v13 = vrot.slane %v2828_v31, %v6849_v62  ;;  %v7529_v0 = vsel %vm1070_vm2, %v7495_v63, %v3383_v57  ;;  %v7532_v9 = vsel %vm1070_vm2, %v1898_v24, %v3387_v14  ;;  %v8750_v4 = vld [vmem:[#allocation7_spill] sm:$0xff]  ;;  %v8774_v63 = vld [vmem:[#allocation28_spill] sm:$0xff] }
  0xb9   : > { %8744 = vst [vmem:[#allocation57_spill] sm:$0xff] %v7529_v0  ;;  %8745 = vst [vmem:[#allocation58_spill] sm:$0xff] %v7532_v9  ;;  %v8749_v9 = vld [vmem:[#allocation6_spill] sm:$0xff] }
  0xba   : > { %8746 = vst [vmem:[#allocation59_spill] sm:$0xff] %v7535_v23 }
  0xdf   : > { %v6374_v17 = vpop.f32.mrf.mxu0 }
  0xe0   : > { %v6398_v12 = vpop.f32.mrf.mxu1  ;;  %v3793_v8 = vcombine.high %v6374_v17, %v6374_v17  ;;  %v3800_v18 = vrot.slane %v6374_v17, %v6858_v11 }
  0xe1   : > { %v4065_v7 = vcombine.high %v6398_v12, %v6398_v12  ;;  %v4072_v37 = vrot.slane %v6398_v12, %v6858_v11  ;;  %v847_v15 = vpop.f32.mrf.mxu0 }
  0xe2   : > { %v3807_v20 = vrot.slane %v3793_v8, %v6858_v11  ;;  %v3808_v21 = vcombine.high %v3800_v18, %v3800_v18  ;;  %v4452_v17 = vadd.f32 %v3800_v18, %v6875_v46  ;;  %v3776_v62 = vcombine.high %v847_v15, %v847_v15 }
  0xe3   : > { %v4079_v12 = vrot.slane %v4065_v7, %v6858_v11  ;;  %v4080_v49 = vcombine.high %v4072_v37, %v4072_v37  ;;  %v4516_v31 = vadd.f32 %v4072_v37, %v6961_v28  ;;  %v3783_v57 = vrot.slane %v847_v15, %v6858_v11 }
  0xe4   : > { %v3809_v0 = vcombine.high %v3807_v20, %v3807_v20  ;;  %v4453_v24 = vadd.f32 %v3808_v21, %v6878_v47  ;;  %v4454_v14 = vadd.f32 %v3807_v20, %v6881_v48  ;;  %v4607_v42 = vmul.f32 %v6866_v35, %v4452_v17 }
  0xe5   : > { %v4081_v45 = vcombine.high %v4079_v12, %v4079_v12  ;;  %v4517_v8 = vadd.f32 %v4080_v49, %v6968_v52  ;;  %v4518_v46 = vadd.f32 %v4079_v12, %v6978_v33  ;;  %v4671_v7 = vmul.f32 %v6866_v35, %v4516_v31 }
  0xe6   : > { %v4455_v18 = vadd.f32 %v3809_v0, %v6898_v54  ;;  %v4608_v28 = vmul.f32 %v6891_v51, %v4453_v24  ;;  %v4609_v15 = vmul.f32 %v6887_v50, %v4454_v14  ;;  %v4762_v37 = vadd.f32 %v6894_v40, %v4607_v42 }
  0xe7   : > { %v4519_v47 = vadd.f32 %v4081_v45, %v6986_v44  ;;  %v4672_v48 = vmul.f32 %v6891_v51, %v4517_v8  ;;  %v4673_v20 = vmul.f32 %v6887_v50, %v4518_v46  ;;  %v4826_v52 = vadd.f32 %v6894_v40, %v4671_v7  ;;  %v8747_v44 = vld [vmem:[#allocation4_spill] sm:$0xff] }
  0xe8   : > { %v4610_v33 = vmul.f32 %v6919_v26, %v4455_v18  ;;  %v4763_v49 = vadd.f32 %v6923_v5, %v4608_v28  ;;  %v4764_v54 = vadd.f32 %v6907_v58, %v4609_v15  ;;  %v4890_v0 = vmax.f32 %v4762_v37, 0.0 }
  0xe9   : > { %v4674_v21 = vmul.f32 %v6919_v26, %v4519_v47  ;;  %v4827_v17 = vadd.f32 %v6923_v5, %v4672_v48  ;;  %v4828_v12 = vadd.f32 %v6907_v58, %v4673_v20  ;;  %v4954_v45 = vmax.f32 %v4826_v52, 0.0  ;;  %v8748_v20 = vld [vmem:[#allocation5_spill] sm:$0xff] }
  0xea   : > { %v4765_v31 = vadd.f32 %v8747_v44, %v4610_v33  ;;  %v4891_v24 = vmax.f32 %v4763_v49, 0.0  ;;  %v4892_v14 = vmax.f32 %v4764_v54, 0.0  ;;  %v3790_v42 = vrot.slane %v3776_v62, %v6858_v11  ;;  %v927_v49 = vpop.f32.mrf.mxu1 }
  0xeb   : > { %v4829_v8 = vadd.f32 %v8747_v44, %v4674_v21  ;;  %v4955_v46 = vmax.f32 %v4827_v17, 0.0  ;;  %v4956_v7 = vmax.f32 %v4828_v12, 0.0  ;;  %v3791_v18 = vcombine.high %v3783_v57, %v3783_v57 }
  0xec   : > { %v4893_v28 = vmax.f32 %v4765_v31, 0.0  ;;  %v5159_v15 = vcombine.low %v4890_v0, %v4891_v24  ;;  %v3792_v37 = vcombine.high %v3790_v42, %v3790_v42  ;;  %v4448_v47 = vadd.f32 %v3783_v57, %v6995_v43 }
  0xed   : > { %v4957_v48 = vmax.f32 %v4829_v8, 0.0  ;;  %v5431_v23 = vcombine.low %v4954_v45, %v4955_v46  ;;  %v4449_v52 = vadd.f32 %v3791_v18, %v8748_v20  ;;  %v4450_v33 = vadd.f32 %v3790_v42, %v8749_v9 }
  0xee   : > { %v5160_v54 = vcombine.low %v4892_v14, %v4893_v28  ;;  %v5167_v62 = vrot.slane %v5159_v15, %v6858_v11  ;;  %v4451_v21 = vadd.f32 %v3792_v37, %v8750_v4  ;;  %v4603_v17 = vmul.f32 %v6866_v35, %v4448_v47 }
  0xef   : > { %v5432_v12 = vcombine.low %v4956_v7, %v4957_v48  ;;  %v5439_v0 = vrot.slane %v5431_v23, %v6858_v11  ;;  %v4604_v31 = vmul.f32 %v6891_v51, %v4449_v52  ;;  %v4605_v43 = vmul.f32 %v6887_v50, %v4450_v33  ;;  %v6377_v48 = vpop.f32.mrf.mxu0 }
  0xf0   : > { %v5174_v57 = vrot.slane %v5160_v54, %v6858_v11  ;;  %v4606_v45 = vmul.f32 %v6919_v26, %v4451_v21  ;;  %v4758_v9 = vadd.f32 %v6894_v40, %v4603_v17  ;;  %v4048_v24 = vcombine.high %v927_v49, %v927_v49  ;;  %v8751_v54 = vld [vmem:[#allocation8_spill] sm:$0xff]  ;;  %v8752_v17 = vld [vmem:[#allocation9_spill] sm:$0xff] }
  0xf1   : > { %v5446_v14 = vrot.slane %v5432_v12, %v6858_v11  ;;  %v4759_v4 = vadd.f32 %v6923_v5, %v4604_v31  ;;  %v4760_v42 = vadd.f32 %v6907_v58, %v4605_v43  ;;  %v4055_v8 = vrot.slane %v927_v49, %v6858_v11  ;;  %v8753_v31 = vld [vmem:[#allocation10_spill] sm:$0xff]  ;;  %v8758_v49 = vld [vmem:[#allocation15_spill] sm:$0xff] }
  0xf2   : > { %v7581_v23 = vcombine.low %v5167_v62, %v5174_v57  ;;  %v4761_v46 = vadd.f32 %v8747_v44, %v4606_v45  ;;  %v4886_v7 = vmax.f32 %v4758_v9, 0.0  ;;  %v4062_v18 = vrot.slane %v4048_v24, %v6858_v11 }
  0xf3   : > { %v7585_v28 = vcombine.low %v5439_v0, %v5446_v14  ;;  %v4887_v15 = vmax.f32 %v4759_v4, 0.0  ;;  %v4888_v37 = vmax.f32 %v4760_v42, 0.0  ;;  %v4063_v47 = vcombine.high %v4055_v8, %v4055_v8  ;;  %v8754_v0 = vld [vmem:[#allocation11_spill] sm:$0xff] }
  0xf4   : > { %v4889_v52 = vmax.f32 %v4761_v46, 0.0  ;;  %v4064_v33 = vcombine.high %v4062_v18, %v4062_v18  ;;  %v4512_v21 = vadd.f32 %v4055_v8, %v8751_v54  ;;  %v4514_v43 = vadd.f32 %v4062_v18, %v8753_v31 }
  0xf5   : > { %v5142_v62 = vcombine.low %v4886_v7, %v4887_v15  ;;  %v4513_v12 = vadd.f32 %v4063_v47, %v8752_v17  ;;  %v3827_v24 = vcombine.high %v6377_v48, %v6377_v48  ;;  %v3834_v8 = vrot.slane %v6377_v48, %v6858_v11 }
  0xf6   : > { %v5143_v57 = vcombine.low %v4888_v37, %v4889_v52  ;;  %v4515_v45 = vadd.f32 %v4064_v33, %v8754_v0  ;;  %v4667_v9 = vmul.f32 %v6866_v35, %v4512_v21  ;;  %v4669_v42 = vmul.f32 %v6887_v50, %v4514_v43  ;;  %v8755_v33 = vld [vmem:[#allocation12_spill] sm:$0xff] }
  0xf7   : > { %v5150_v14 = vrot.slane %v5142_v62, %v6858_v11  ;;  %v4668_v4 = vmul.f32 %v6891_v51, %v4513_v12  ;;  %v3841_v15 = vrot.slane %v3827_v24, %v6858_v11  ;;  %v3842_v52 = vcombine.high %v3834_v8, %v3834_v8  ;;  %v6401_v12 = vpop.f32.mrf.mxu1 }
  0xf8   : > { %v5157_v46 = vrot.slane %v5143_v57, %v6858_v11  ;;  %v4670_v7 = vmul.f32 %v6919_v26, %v4515_v45  ;;  %v4822_v18 = vadd.f32 %v6894_v40, %v4667_v9  ;;  %v4824_v47 = vadd.f32 %v6907_v58, %v4669_v42  ;;  %v8756_v57 = vld [vmem:[#allocation13_spill] sm:$0xff]  ;;  %v8757_v45 = vld [vmem:[#allocation14_spill] sm:$0xff] }
  0xf9   : > { %v4823_v37 = vadd.f32 %v6923_v5, %v4668_v4  ;;  %v4460_v54 = vadd.f32 %v3834_v8, %v8755_v33  ;;  %v3843_v48 = vcombine.high %v3841_v15, %v3841_v15  ;;  %v4461_v0 = vadd.f32 %v3842_v52, %v8756_v57  ;;  %v857_v52 = vpop.f32.mrf.mxu0 }
  0xfa   : > { %v5158_v21 = vcombine.low %v5150_v14, %v5157_v46  ;;  %v4825_v62 = vadd.f32 %v8747_v44, %v4670_v7  ;;  %v4950_v17 = vmax.f32 %v4822_v18, 0.0  ;;  %v4952_v43 = vmax.f32 %v4824_v47, 0.0 }
  0xfb   : > { %v4951_v31 = vmax.f32 %v4823_v37, 0.0  ;;  %v4462_v9 = vadd.f32 %v3841_v15, %v8757_v45  ;;  %v4463_v42 = vadd.f32 %v3843_v48, %v8758_v49  ;;  %v4615_v20 = vmul.f32 %v6866_v35, %v4460_v54 }
  0xfc   : > { %v5686_v24 = vrot.slane %v5158_v21, 7  ;;  %v4953_v4 = vmax.f32 %v4825_v62, 0.0  ;;  %v4616_v14 = vmul.f32 %v6891_v51, %v4461_v0  ;;  %v4099_v7 = vcombine.high %v6401_v12, %v6401_v12 }
  0xfd   : > { %v5414_v8 = vcombine.low %v4950_v17, %v4951_v31  ;;  %v4617_v46 = vmul.f32 %v6887_v50, %v4462_v9  ;;  %v8759_v18 = vrot.slane %v7581_v23, 7  ;;  %v4618_v47 = vmul.f32 %v6919_v26, %v4463_v42 }
  0xfe   : > { %v5782_v49 = vsel %vm1070_vm2, 0.0, %v5686_v24  ;;  %v5415_v37 = vcombine.low %v4952_v43, %v4953_v4  ;;  %v4770_v62 = vadd.f32 %v6894_v40, %v4615_v20  ;;  %v4771_v48 = vadd.f32 %v6923_v5, %v4616_v14 }
  0xff   : > { %v5688_v15 = vsel %vm1070_vm2, %v5686_v24, %v8759_v18  ;;  %v6294_v33 = vpack.c.bf16 %v5782_v49, %v5782_v49  ;;  %v5422_v21 = vrot.slane %v5414_v8, %v6858_v11  ;;  %v4772_v31 = vadd.f32 %v6907_v58, %v4617_v46  ;;  %v8760_v18 = vld [vmem:[#allocation16_spill] sm:$0xff] }
 0x100   : > { %v6295_v54 = vpack.c.bf16 %v5688_v15, %v5688_v15  ;;  %v5429_v17 = vrot.slane %v5415_v37, %v6858_v11  ;;  %v4773_v57 = vadd.f32 %v8747_v44, %v4618_v47  ;;  %v4898_v43 = vmax.f32 %v4770_v62, 0.0  ;;  %v8761_v15 = vld [vmem:[#allocation18_spill] sm:$0xff] }
 0x101   : > { %5967 = vst.msk [vmem:[%s7616_s26] sm:$0xf] %vm5966_vm3, %v6294_v33  ;;  %v4106_v0 = vrot.slane %v6401_v12, %v6858_v11  ;;  %v4113_v45 = vrot.slane %v4099_v7, %v6858_v11  ;;  %v3810_v9 = vcombine.high %v857_v52, %v857_v52  ;;  %v4899_v20 = vmax.f32 %v4771_v48, 0.0  ;;  %v8762_v12 = vld [vmem:[#allocation17_spill] sm:$0xff]  ;;  %v8763_v7 = vld [vmem:[#allocation20_spill] sm:$0xff] }
 0x102   : > { %5968 = vst.msk [vmem:[%s7616_s26 + $0x4] sm:$0xf] %vm5966_vm3, %v6295_v54  ;;  %v5430_v24 = vcombine.low %v5422_v21, %v5429_v17  ;;  %v4900_v4 = vmax.f32 %v4772_v31, 0.0  ;;  %v4901_v42 = vmax.f32 %v4773_v57, 0.0  ;;  %v3817_v54 = vrot.slane %v857_v52, %v6858_v11 }
 0x103   : > { %v4114_v8 = vcombine.high %v4106_v0, %v4106_v0  ;;  %v4115_v14 = vcombine.high %v4113_v45, %v4113_v45  ;;  %v4524_v46 = vadd.f32 %v4106_v0, %v8760_v18  ;;  %v4526_v49 = vadd.f32 %v4113_v45, %v8761_v15 }
 0x104   : > { %v5714_v37 = vrot.slane %v5430_v24, 7  ;;  %v5193_v47 = vcombine.low %v4898_v43, %v4899_v20  ;;  %v5194_v33 = vcombine.low %v4900_v4, %v4901_v42  ;;  %v8764_v31 = vrot.slane %v7585_v28, 7 }
 0x105   : > { %v4525_v62 = vadd.f32 %v4114_v8, %v8762_v12  ;;  %v4527_v21 = vadd.f32 %v4115_v14, %v8763_v7  ;;  %v4679_v17 = vmul.f32 %v6866_v35, %v4524_v46  ;;  %v4681_v48 = vmul.f32 %v6887_v50, %v4526_v49 }
 0x106   : > { %v5716_v57 = vsel %vm1070_vm2, %v5714_v37, %v8764_v31  ;;  %v5786_v43 = vsel %vm1070_vm2, 0.0, %v5714_v37  ;;  %v5201_v0 = vrot.slane %v5193_v47, %v6858_v11  ;;  %v5208_v52 = vrot.slane %v5194_v33, %v6858_v11  ;;  %v8765_v37 = vld [vmem:[#allocation19_spill] sm:$0xff]  ;;  %v937_v33 = vpop.f32.mrf.mxu1 }
 0x107   : > { %v6314_v45 = vpack.c.bf16 %v5786_v43, %v5786_v43  ;;  %v6315_v24 = vpack.c.bf16 %v5716_v57, %v5716_v57  ;;  %v4680_v20 = vmul.f32 %v6891_v51, %v4525_v62  ;;  %v4682_v4 = vmul.f32 %v6919_v26, %v4527_v21  ;;  %v8767_v57 = vld [vmem:[#allocation22_spill] sm:$0xff] }
 0x108   : > { %v7650_v42 = vcombine.low %v5201_v0, %v5208_v52  ;;  %v4834_v8 = vadd.f32 %v6894_v40, %v4679_v17  ;;  %v4836_v14 = vadd.f32 %v6907_v58, %v4681_v48  ;;  %v3824_v18 = vrot.slane %v3810_v9, %v6858_v11  ;;  %v8766_v48 = vld [vmem:[#allocation21_spill] sm:$0xff]  ;;  %v8768_v52 = vld [vmem:[#allocation23_spill] sm:$0xff] }
 0x109   : > { %5988 = vst.msk [vmem:[%s7616_s26 + $0x50] sm:$0xf] %vm5966_vm3, %v6314_v45  ;;  %5989 = vst.msk [vmem:[%s7616_s26 + $0x54] sm:$0xf] %vm5966_vm3, %v6315_v24  ;;  %v4835_v46 = vadd.f32 %v6923_v5, %v4680_v20  ;;  %v4837_v15 = vadd.f32 %v8747_v44, %v4682_v4  ;;  %v3825_v49 = vcombine.high %v3817_v54, %v3817_v54 }
 0x10a   : > { %v4456_v47 = vadd.f32 %v3817_v54, %v8765_v37  ;;  %v8678_v12 = vrot.slane %v7650_v42, 7  ;;  %v4962_v62 = vmax.f32 %v4834_v8, 0.0  ;;  %v4964_v7 = vmax.f32 %v4836_v14, 0.0 }
 0x10b   : > { %v3826_v21 = vcombine.high %v3824_v18, %v3824_v18  ;;  %v4963_v17 = vmax.f32 %v4835_v46, 0.0  ;;  %v4965_v9 = vmax.f32 %v4837_v15, 0.0  ;;  %v4457_v31 = vadd.f32 %v3825_v49, %v8766_v48 }
 0x10c   : > { %v4458_v43 = vadd.f32 %v3824_v18, %v8767_v57  ;;  %v5790_v0 = vsel %vm1070_vm2, %v8678_v12, 0.0  ;;  %v4611_v54 = vmul.f32 %v6866_v35, %v4456_v47  ;;  %v4082_v24 = vcombine.high %v937_v33, %v937_v33  ;;  %v8773_v12 = vld [vmem:[#allocation29_spill] sm:$0xff] }
 0x10d   : > { %v4459_v45 = vadd.f32 %v3826_v21, %v8768_v52  ;;  %v6298_v20 = vpack.c.bf16 %v5790_v0, %v5790_v0  ;;  %v5465_v4 = vcombine.low %v4962_v62, %v4963_v17  ;;  %v5466_v8 = vcombine.low %v4964_v7, %v4965_v9  ;;  %v6380_v0 = vpop.f32.mrf.mxu0 }
 0x10e   : > { %v4612_v14 = vmul.f32 %v6891_v51, %v4457_v31  ;;  %v4613_v46 = vmul.f32 %v6887_v50, %v4458_v43  ;;  %v4766_v18 = vadd.f32 %v6894_v40, %v4611_v54  ;;  %v4089_v49 = vrot.slane %v937_v33, %v6858_v11  ;;  %v8769_v54 = vld [vmem:[#allocation24_spill] sm:$0xff] }
 0x10f   : > { %v4614_v15 = vmul.f32 %v6919_v26, %v4459_v45  ;;  %5972 = vst.msk [vmem:[%s7616_s26 + $0x10] sm:$0x1] %vm5971_vm4, %v6298_v20  ;;  %v5473_v37 = vrot.slane %v5465_v4, %v6858_v11  ;;  %v5480_v47 = vrot.slane %v5466_v8, %v6858_v11  ;;  %v4096_v62 = vrot.slane %v4082_v24, %v6858_v11  ;;  %v8770_v4 = vld [vmem:[#allocation25_spill] sm:$0xff] }
 0x110   : > { %v4767_v21 = vadd.f32 %v6923_v5, %v4612_v14  ;;  %v4768_v7 = vadd.f32 %v6907_v58, %v4613_v46  ;;  %v4894_v9 = vmax.f32 %v4766_v18, 0.0  ;;  %v4097_v48 = vcombine.high %v4089_v49, %v4089_v49  ;;  %v8771_v46 = vld [vmem:[#allocation26_spill] sm:$0xff] }
 0x111   : > { %v4769_v17 = vadd.f32 %v8747_v44, %v4614_v15  ;;  %v7683_v31 = vcombine.low %v5473_v37, %v5480_v47  ;;  %v4098_v33 = vcombine.high %v4096_v62, %v4096_v62  ;;  %v4520_v43 = vadd.f32 %v4089_v49, %v7198_v59 }
 0x112   : > { %v4895_v57 = vmax.f32 %v4767_v21, 0.0  ;;  %v4896_v52 = vmax.f32 %v4768_v7, 0.0  ;;  %v4521_v20 = vadd.f32 %v4097_v48, %v8769_v54  ;;  %v4522_v8 = vadd.f32 %v4096_v62, %v8770_v4 }
 0x113   : > { %v4897_v45 = vmax.f32 %v4769_v17, 0.0  ;;  %v8677_v24 = vrot.slane %v7683_v31, 7  ;;  %v4523_v15 = vadd.f32 %v4098_v33, %v8771_v46  ;;  %v4675_v18 = vmul.f32 %v6866_v35, %v4520_v43 }
 0x114   : > { %v5176_v14 = vcombine.low %v4894_v9, %v4895_v57  ;;  %v4676_v47 = vmul.f32 %v6891_v51, %v4521_v20  ;;  %v4677_v59 = vmul.f32 %v6887_v50, %v4522_v8  ;;  %v3861_v49 = vcombine.high %v6380_v0, %v6380_v0  ;;  %v6404_v9 = vpop.f32.mrf.mxu1 }
 0x115   : > { %v5177_v37 = vcombine.low %v4896_v52, %v4897_v45  ;;  %v5794_v21 = vsel %vm1070_vm2, %v8677_v24, 0.0  ;;  %v4678_v7 = vmul.f32 %v6919_v26, %v4523_v15  ;;  %v4830_v17 = vadd.f32 %v6894_v40, %v4675_v18 }
 0x116   : > { %v5184_v62 = vrot.slane %v5176_v14, %v6858_v11  ;;  %v6318_v48 = vpack.c.bf16 %v5794_v21, %v5794_v21  ;;  %v4831_v33 = vadd.f32 %v6923_v5, %v4676_v47  ;;  %v4832_v43 = vadd.f32 %v6907_v58, %v4677_v59  ;;  %v8772_v21 = vld [vmem:[#allocation27_spill] sm:$0xff] }
 0x117   : > { %v5191_v57 = vrot.slane %v5177_v37, %v6858_v11  ;;  %v4833_v52 = vadd.f32 %v8747_v44, %v4678_v7  ;;  %v4958_v45 = vmax.f32 %v4830_v17, 0.0  ;;  %v3868_v54 = vrot.slane %v6380_v0, %v6858_v11 }
 0x118   : > { %v3875_v20 = vrot.slane %v3861_v49, %v6858_v11  ;;  %5992 = vst.msk [vmem:[%s7616_s26 + $0x60] sm:$0x1] %vm5971_vm4, %v6318_v48  ;;  %v4959_v8 = vmax.f32 %v4831_v33, 0.0  ;;  %v4960_v14 = vmax.f32 %v4832_v43, 0.0  ;;  %v4133_v46 = vcombine.high %v6404_v9, %v6404_v9  ;;  %v8775_v48 = vld [vmem:[#allocation30_spill] sm:$0xff] }
 0x119   : > { %v5192_v4 = vcombine.low %v5184_v62, %v5191_v57  ;;  %v4961_v15 = vmax.f32 %v4833_v52, 0.0  ;;  %v3876_v18 = vcombine.high %v3868_v54, %v3868_v54  ;;  %v4468_v47 = vadd.f32 %v3868_v54, %v8772_v21 }
 0x11a   : > { %v3877_v37 = vcombine.high %v3875_v20, %v3875_v20  ;;  %v5448_v59 = vcombine.low %v4958_v45, %v4959_v8  ;;  %v4470_v7 = vadd.f32 %v3875_v20, %v8773_v12  ;;  %v4140_v17 = vrot.slane %v6404_v9, %v6858_v11 }
 0x11b   : > { %v5689_v24 = vrot.slane %v5192_v4, 7  ;;  %v5449_v0 = vcombine.low %v4960_v14, %v4961_v15  ;;  %v4469_v49 = vadd.f32 %v3876_v18, %v8774_v63  ;;  %v4623_v57 = vmul.f32 %v6866_v35, %v4468_v47  ;;  %v867_v47 = vpop.f32.mrf.mxu0 }
 0x11c   : > { %v4471_v62 = vadd.f32 %v3877_v37, %v8775_v48  ;;  %v8776_v33 = vrot.slane %v7581_v23, 7  ;;  %v8777_v52 = vrot.slane %v7650_v42, 7  ;;  %v5456_v12 = vrot.slane %v5448_v59, %v6858_v11  ;;  %v8778_v37 = vld [vmem:[#allocation31_spill] sm:$0xff] }
 0x11d   : > { %v4625_v9 = vmul.f32 %v6887_v50, %v4470_v7  ;;  %v5463_v63 = vrot.slane %v5449_v0, %v6858_v11  ;;  %v4624_v4 = vmul.f32 %v6891_v51, %v4469_v49  ;;  %v4778_v23 = vadd.f32 %v6894_v40, %v4623_v57 }
 0x11e   : > { %v5690_v43 = vsel %vm1070_vm2, %v8776_v33, %v5689_v24  ;;  %v5692_v45 = vsel %vm1070_vm2, %v5689_v24, %v8777_v52  ;;  %v4626_v8 = vmul.f32 %v6919_v26, %v4471_v62  ;;  %v4147_v42 = vrot.slane %v4133_v46, %v6858_v11 }
 0x11f   : > { %v6296_v54 = vpack.c.bf16 %v5690_v43, %v5690_v43  ;;  %v6297_v20 = vpack.c.bf16 %v5692_v45, %v5692_v45  ;;  %v4780_v14 = vadd.f32 %v6907_v58, %v4625_v9  ;;  %v5464_v24 = vcombine.low %v5456_v12, %v5463_v63 }
 0x120   : > { %v4779_v15 = vadd.f32 %v6923_v5, %v4624_v4  ;;  %v4148_v18 = vcombine.high %v4140_v17, %v4140_v17  ;;  %v4532_v21 = vadd.f32 %v4140_v17, %v8778_v37  ;;  %v4781_v59 = vadd.f32 %v8747_v44, %v4626_v8  ;;  %v947_v8 = vpop.f32.mrf.mxu1 }
 0x121   : > { %5969 = vst.msk [vmem:[%s7616_s26 + $0x8] sm:$0xf] %vm5966_vm3, %v6296_v54  ;;  %5970 = vst.msk [vmem:[%s7616_s26 + $0xc] sm:$0xf] %vm5966_vm3, %v6297_v20  ;;  %v4906_v7 = vmax.f32 %v4778_v23, 0.0  ;;  %v4908_v0 = vmax.f32 %v4780_v14, 0.0  ;;  %v4149_v49 = vcombine.high %v4147_v42, %v4147_v42  ;;  %v4534_v57 = vadd.f32 %v4147_v42, %v7270_v2 }
 0x122   : > { %v5717_v48 = vrot.slane %v5464_v24, 7  ;;  %v4907_v62 = vmax.f32 %v4779_v15, 0.0  ;;  %v4533_v46 = vadd.f32 %v4148_v18, %v7265_v29  ;;  %v4909_v33 = vmax.f32 %v4781_v59, 0.0 }
 0x123   : > { %v4535_v43 = vadd.f32 %v4149_v49, %v7289_v36  ;;  %v4687_v52 = vmul.f32 %v6866_v35, %v4532_v21  ;;  %v3844_v17 = vcombine.high %v867_v47, %v867_v47  ;;  %v8779_v45 = vrot.slane %v7585_v28, 7 }
 0x124   : > { %v8780_v9 = vrot.slane %v7683_v31, 7  ;;  %v5227_v20 = vcombine.low %v4906_v7, %v4907_v62  ;;  %v4688_v29 = vmul.f32 %v6891_v51, %v4533_v46  ;;  %v5228_v4 = vcombine.low %v4908_v0, %v4909_v33 }
 0x125   : > { %v5718_v12 = vsel %vm1070_vm2, %v8779_v45, %v5717_v48  ;;  %v4689_v36 = vmul.f32 %v6887_v50, %v4534_v57  ;;  %v4690_v14 = vmul.f32 %v6919_v26, %v4535_v43  ;;  %v4842_v28 = vadd.f32 %v6894_v40, %v4687_v52  ;;  %v8781_v52 = vld [vmem:[#allocation32_spill] sm:$0xff]  ;;  %v8782_v45 = vld [vmem:[#allocation33_spill] sm:$0xff] }
 0x126   : > { %v5720_v54 = vsel %vm1070_vm2, %v5717_v48, %v8780_v9  ;;  %v6316_v2 = vpack.c.bf16 %v5718_v12, %v5718_v12  ;;  %v5235_v23 = vrot.slane %v5227_v20, %v6858_v11  ;;  %v4843_v42 = vadd.f32 %v6923_v5, %v4688_v29 }
 0x127   : > { %v6317_v63 = vpack.c.bf16 %v5720_v54, %v5720_v54  ;;  %v5242_v31 = vrot.slane %v5228_v4, %v6858_v11  ;;  %v4844_v24 = vadd.f32 %v6907_v58, %v4689_v36  ;;  %v3851_v15 = vrot.slane %v867_v47, %v6858_v11 }
 0x128   : > { %5990 = vst.msk [vmem:[%s7616_s26 + $0x58] sm:$0xf] %vm5966_vm3, %v6316_v2  ;;  %v3858_v18 = vrot.slane %v3844_v17, %v6858_v11  ;;  %v4845_v37 = vadd.f32 %v8747_v44, %v4690_v14  ;;  %v4970_v21 = vmax.f32 %v4842_v28, 0.0  ;;  %v4971_v59 = vmax.f32 %v4843_v42, 0.0  ;;  %v8783_v14 = vld [vmem:[#allocation34_spill] sm:$0xff] }
 0x129   : > { %5991 = vst.msk [vmem:[%s7616_s26 + $0x5c] sm:$0xf] %vm5966_vm3, %v6317_v63  ;;  %v4116_v7 = vcombine.high %v947_v8, %v947_v8  ;;  %v7759_v0 = vcombine.low %v5235_v23, %v5242_v31  ;;  %v4972_v49 = vmax.f32 %v4844_v24, 0.0  ;;  %v3859_v48 = vcombine.high %v3851_v15, %v3851_v15 }
 0x12a   : > { %v3860_v62 = vcombine.high %v3858_v18, %v3858_v18  ;;  %v4973_v46 = vmax.f32 %v4845_v37, 0.0  ;;  %v5499_v57 = vcombine.low %v4970_v21, %v4971_v59  ;;  %v4464_v33 = vadd.f32 %v3851_v15, %v7278_v32 }
 0x12b   : > { %v4466_v43 = vadd.f32 %v3858_v18, %v7296_v3  ;;  %v5694_v47 = vrot.slane %v7759_v0, 7  ;;  %v4465_v17 = vadd.f32 %v3859_v48, %v8781_v52  ;;  %v4123_v9 = vrot.slane %v947_v8, %v6858_v11  ;;  %v6383_v18 = vpop.f32.mrf.mxu0 }
 0x12c   : > { %v4467_v12 = vadd.f32 %v3860_v62, %v8782_v45  ;;  %v5500_v54 = vcombine.low %v4972_v49, %v4973_v46  ;;  %v5507_v20 = vrot.slane %v5499_v57, %v6858_v11  ;;  %v4619_v29 = vmul.f32 %v6866_v35, %v4464_v33 }
 0x12d   : > { %v4621_v2 = vmul.f32 %v6887_v50, %v4466_v43  ;;  %v4620_v63 = vmul.f32 %v6891_v51, %v4465_v17  ;;  %v4130_v3 = vrot.slane %v4116_v7, %v6858_v11  ;;  %v4131_v4 = vcombine.high %v4123_v9, %v4123_v9  ;;  %v8784_v7 = vld [vmem:[#allocation35_spill] sm:$0xff] }
 0x12e   : > { %v4622_v32 = vmul.f32 %v6919_v26, %v4467_v12  ;;  %v5514_v36 = vrot.slane %v5500_v54, %v6858_v11  ;;  %v4774_v23 = vadd.f32 %v6894_v40, %v4619_v29  ;;  %v4528_v28 = vadd.f32 %v4123_v9, %v8783_v14 }
 0x12f   : > { %v4776_v8 = vadd.f32 %v6907_v58, %v4621_v2  ;;  %v4775_v42 = vadd.f32 %v6923_v5, %v4620_v63  ;;  %v4132_v24 = vcombine.high %v4130_v3, %v4130_v3  ;;  %v4529_v15 = vadd.f32 %v4131_v4, %v7315_v25  ;;  %v6407_v4 = vpop.f32.mrf.mxu1 }
 0x130   : > { %v4777_v31 = vadd.f32 %v8747_v44, %v4622_v32  ;;  %v7780_v37 = vcombine.low %v5507_v20, %v5514_v36  ;;  %v4902_v21 = vmax.f32 %v4774_v23, 0.0  ;;  %v4530_v49 = vadd.f32 %v4130_v3, %v8784_v7 }
 0x131   : > { %v4904_v59 = vmax.f32 %v4776_v8, 0.0  ;;  %v4903_v48 = vmax.f32 %v4775_v42, 0.0  ;;  %v4531_v46 = vadd.f32 %v4132_v24, %v7329_v27  ;;  %v4683_v57 = vmul.f32 %v6866_v35, %v4528_v28 }
 0x132   : > { %v4905_v62 = vmax.f32 %v4777_v31, 0.0  ;;  %v5722_v33 = vrot.slane %v7780_v37, 7  ;;  %v4684_v43 = vmul.f32 %v6891_v51, %v4529_v15  ;;  %v4685_v52 = vmul.f32 %v6887_v50, %v4530_v49 }
 0x133   : > { %v3895_v25 = vcombine.high %v6383_v18, %v6383_v18  ;;  %v5210_v17 = vcombine.low %v4902_v21, %v4903_v48  ;;  %v4686_v12 = vmul.f32 %v6919_v26, %v4531_v46  ;;  %v4838_v9 = vadd.f32 %v6894_v40, %v4683_v57 }
 0x134   : > { %v5211_v45 = vcombine.low %v4904_v59, %v4905_v62  ;;  %v4839_v54 = vadd.f32 %v6923_v5, %v4684_v43  ;;  %v4840_v20 = vadd.f32 %v6907_v58, %v4685_v52  ;;  %v3902_v27 = vrot.slane %v6383_v18, %v6858_v11 }
 0x135   : > { %v3909_v29 = vrot.slane %v3895_v25, %v6858_v11  ;;  %v5218_v2 = vrot.slane %v5210_v17, %v6858_v11  ;;  %v4841_v32 = vadd.f32 %v8747_v44, %v4686_v12  ;;  %v4966_v3 = vmax.f32 %v4838_v9, 0.0 }
 0x136   : > { %v5225_v63 = vrot.slane %v5211_v45, %v6858_v11  ;;  %v4967_v36 = vmax.f32 %v4839_v54, 0.0  ;;  %v4968_v23 = vmax.f32 %v4840_v20, 0.0  ;;  %v3910_v8 = vcombine.high %v3902_v27, %v3902_v27 }
 0x137   : > { %v3911_v14 = vcombine.high %v3909_v29, %v3909_v29  ;;  %v4969_v42 = vmax.f32 %v4841_v32, 0.0  ;;  %v4476_v31 = vadd.f32 %v3902_v27, %v7332_v1  ;;  %v4478_v24 = vadd.f32 %v3909_v29, %v7342_v10  ;;  %v877_v29 = vpop.f32.mrf.mxu0 }
 0x138   : > { %v5226_v28 = vcombine.low %v5218_v2, %v5225_v63  ;;  %v5482_v15 = vcombine.low %v4966_v3, %v4967_v36  ;;  %v4477_v18 = vadd.f32 %v3910_v8, %v7337_v34  ;;  %v4167_v59 = vcombine.high %v6407_v4, %v6407_v4 }
 0x139   : > { %v4479_v21 = vadd.f32 %v3911_v14, %v7347_v55  ;;  %v5483_v49 = vcombine.low %v4968_v23, %v4969_v42  ;;  %v4631_v48 = vmul.f32 %v6866_v35, %v4476_v31  ;;  %v4633_v62 = vmul.f32 %v6887_v50, %v4478_v24 }
 0x13a   : > { %v5693_v7 = vrot.slane %v5226_v28, 7  ;;  %v5490_v46 = vrot.slane %v5482_v15, %v6858_v11  ;;  %v4632_v57 = vmul.f32 %v6891_v51, %v4477_v18  ;;  %v4174_v10 = vrot.slane %v6407_v4, %v6858_v11 }
 0x13b   : > { %v4634_v1 = vmul.f32 %v6919_v26, %v4479_v21  ;;  %v5497_v43 = vrot.slane %v5483_v49, %v6858_v11  ;;  %v4786_v52 = vadd.f32 %v6894_v40, %v4631_v48  ;;  %v4788_v12 = vadd.f32 %v6907_v58, %v4633_v62  ;;  %v957_v21 = vpop.f32.mrf.mxu1 }
 0x13c   : > { %v5695_v34 = vsel %vm1070_vm2, %v5693_v7, %v5694_v47  ;;  %v5783_v55 = vsel %vm1070_vm2, 0.0, %v5693_v7  ;;  %v4787_v45 = vadd.f32 %v6923_v5, %v4632_v57  ;;  %v4181_v27 = vrot.slane %v4167_v59, %v6858_v11 }
 0x13d   : > { %v6299_v25 = vpack.c.bf16 %v5783_v55, %v5783_v55  ;;  %v6300_v17 = vpack.c.bf16 %v5695_v34, %v5695_v34  ;;  %v5498_v9 = vcombine.low %v5490_v46, %v5497_v43  ;;  %v4789_v54 = vadd.f32 %v8747_v44, %v4634_v1 }
 0x13e   : > { %v4914_v20 = vmax.f32 %v4786_v52, 0.0  ;;  %v4915_v2 = vmax.f32 %v4787_v45, 0.0  ;;  %v4916_v63 = vmax.f32 %v4788_v12, 0.0  ;;  %v4182_v32 = vcombine.high %v4174_v10, %v4174_v10 }
 0x13f   : > { %5973 = vst.msk [vmem:[%s7616_s26 + $0x14] sm:$0xf] %vm5966_vm3, %v6299_v25  ;;  %5974 = vst.msk [vmem:[%s7616_s26 + $0x18] sm:$0xf] %vm5966_vm3, %v6300_v17  ;;  %v4540_v3 = vadd.f32 %v4174_v10, %v7354_v53  ;;  %v5721_v4 = vrot.slane %v5498_v9, 7  ;;  %v4917_v36 = vmax.f32 %v4789_v54, 0.0  ;;  %v4183_v23 = vcombine.high %v4181_v27, %v4181_v27 }
 0x140   : > { %v4542_v8 = vadd.f32 %v4181_v27, %v7364_v39  ;;  %v5261_v14 = vcombine.low %v4914_v20, %v4915_v2  ;;  %v4541_v28 = vadd.f32 %v4182_v32, %v7361_v61  ;;  %v3878_v31 = vcombine.high %v877_v29, %v877_v29  ;;  %v8785_v27 = vld [vmem:[#allocation47_spill] sm:$0xff] }
 0x141   : > { %v4695_v42 = vmul.f32 %v6866_v35, %v4540_v3  ;;  %v5723_v24 = vsel %vm1070_vm2, %v5721_v4, %v5722_v33  ;;  %v5787_v15 = vsel %vm1070_vm2, 0.0, %v5721_v4  ;;  %v5262_v53 = vcombine.low %v4916_v63, %v4917_v36  ;;  %v8786_v63 = vld [vmem:[#allocation45_spill] sm:$0xff] }
 0x142   : > { %v4543_v18 = vadd.f32 %v4183_v23, %v7402_v60  ;;  %v6319_v59 = vpack.c.bf16 %v5787_v15, %v5787_v15  ;;  %v6320_v39 = vpack.c.bf16 %v5723_v24, %v5723_v24  ;;  %v5269_v7 = vrot.slane %v5261_v14, %v6858_v11 }
 0x143   : > { %v4696_v61 = vmul.f32 %v6891_v51, %v4541_v28  ;;  %v5276_v49 = vrot.slane %v5262_v53, %v6858_v11  ;;  %v4697_v48 = vmul.f32 %v6887_v50, %v4542_v8  ;;  %v4850_v46 = vadd.f32 %v6894_v40, %v4695_v42 }
 0x144   : > { %v4698_v62 = vmul.f32 %v6919_v26, %v4543_v18  ;;  %5993 = vst.msk [vmem:[%s7616_s26 + $0x64] sm:$0xf] %vm5966_vm3, %v6319_v59  ;;  %5994 = vst.msk [vmem:[%s7616_s26 + $0x68] sm:$0xf] %vm5966_vm3, %v6320_v39  ;;  %v3885_v57 = vrot.slane %v877_v29, %v6858_v11  ;;  %v3892_v1 = vrot.slane %v3878_v31, %v6858_v11 }
 0x145   : > { %v4851_v60 = vadd.f32 %v6923_v5, %v4696_v61  ;;  %v4150_v10 = vcombine.high %v957_v21, %v957_v21  ;;  %v7843_v34 = vcombine.low %v5269_v7, %v5276_v49  ;;  %v4852_v55 = vadd.f32 %v6907_v58, %v4697_v48  ;;  %v6386_v7 = vpop.f32.mrf.mxu0 }
 0x146   : > { %v4853_v43 = vadd.f32 %v8747_v44, %v4698_v62  ;;  %v4978_v52 = vmax.f32 %v4850_v46, 0.0  ;;  %v3893_v17 = vcombine.high %v3885_v57, %v3885_v57  ;;  %v3894_v45 = vcombine.high %v3892_v1, %v3892_v1 }
 0x147   : > { %v4979_v25 = vmax.f32 %v4851_v60, 0.0  ;;  %v4472_v12 = vadd.f32 %v3885_v57, %v7392_v6  ;;  %v5698_v9 = vrot.slane %v7843_v34, 7  ;;  %v4980_v54 = vmax.f32 %v4852_v55, 0.0 }
 0x148   : > { %v4981_v20 = vmax.f32 %v4853_v43, 0.0  ;;  %v4474_v29 = vadd.f32 %v3892_v1, %v8785_v27  ;;  %v4473_v32 = vadd.f32 %v3893_v17, %v8786_v63  ;;  %v4475_v3 = vadd.f32 %v3894_v45, %v7452_v41 }
 0x149   : > { %v5533_v2 = vcombine.low %v4978_v52, %v4979_v25  ;;  %v4627_v4 = vmul.f32 %v6866_v35, %v4472_v12  ;;  %v5791_v36 = vsel %vm1070_vm2, %v5698_v9, 0.0  ;;  %v4157_v8 = vrot.slane %v957_v21, %v6858_v11 }
 0x14a   : > { %v5534_v23 = vcombine.low %v4980_v54, %v4981_v20  ;;  %v4629_v6 = vmul.f32 %v6887_v50, %v4474_v29  ;;  %v6303_v14 = vpack.c.bf16 %v5791_v36, %v5791_v36  ;;  %v4628_v42 = vmul.f32 %v6891_v51, %v4473_v32 }
 0x14b   : > { %v5541_v28 = vrot.slane %v5533_v2, %v6858_v11  ;;  %v4630_v31 = vmul.f32 %v6919_v26, %v4475_v3  ;;  %v4782_v24 = vadd.f32 %v6894_v40, %v4627_v4  ;;  %v4164_v53 = vrot.slane %v4150_v10, %v6858_v11 }
 0x14c   : > { %v5548_v41 = vrot.slane %v5534_v23, %v6858_v11  ;;  %v4784_v15 = vadd.f32 %v6907_v58, %v4629_v6  ;;  %5977 = vst.msk [vmem:[%s7616_s26 + $0x24] sm:$0x1] %vm5971_vm4, %v6303_v14  ;;  %v4783_v18 = vadd.f32 %v6923_v5, %v4628_v42  ;;  %v4165_v59 = vcombine.high %v4157_v8, %v4157_v8 }
 0x14d   : > { %v4785_v21 = vadd.f32 %v8747_v44, %v4630_v31  ;;  %v4536_v39 = vadd.f32 %v4157_v8, %v7456_v22  ;;  %v4910_v49 = vmax.f32 %v4782_v24, 0.0  ;;  %v4166_v62 = vcombine.high %v4164_v53, %v4164_v53  ;;  %v8787_v24 = vld [vmem:[#allocation50_spill] sm:$0xff] }
 0x14e   : > { %v7870_v61 = vcombine.low %v5541_v28, %v5548_v41  ;;  %v4912_v48 = vmax.f32 %v4784_v15, 0.0  ;;  %v4911_v46 = vmax.f32 %v4783_v18, 0.0  ;;  %v4537_v57 = vadd.f32 %v4165_v59, %v7461_v16 }
 0x14f   : > { %v4913_v60 = vmax.f32 %v4785_v21, 0.0  ;;  %v4538_v1 = vadd.f32 %v4164_v53, %v7464_v56  ;;  %v4539_v55 = vadd.f32 %v4166_v62, %v7473_v30  ;;  %v4691_v43 = vmul.f32 %v6866_v35, %v4536_v39  ;;  %v8788_v21 = vld [vmem:[#allocation52_spill] sm:$0xff] }
 0x150   : > { %v5726_v10 = vrot.slane %v7870_v61, 7  ;;  %v3929_v52 = vcombine.high %v6386_v7, %v6386_v7  ;;  %v5244_v22 = vcombine.low %v4910_v49, %v4911_v46  ;;  %v4692_v17 = vmul.f32 %v6891_v51, %v4537_v57 }
 0x151   : > { %v5245_v25 = vcombine.low %v4912_v48, %v4913_v60  ;;  %v4693_v45 = vmul.f32 %v6887_v50, %v4538_v1  ;;  %v4694_v56 = vmul.f32 %v6919_v26, %v4539_v55  ;;  %v4846_v12 = vadd.f32 %v6894_v40, %v4691_v43 }
 0x152   : > { %v5795_v16 = vsel %vm1070_vm2, %v5726_v10, 0.0  ;;  %v3936_v30 = vrot.slane %v6386_v7, %v6858_v11  ;;  %v5252_v20 = vrot.slane %v5244_v22, %v6858_v11  ;;  %v4847_v29 = vadd.f32 %v6923_v5, %v4692_v17  ;;  %v6410_v7 = vpop.f32.mrf.mxu1 }
 0x153   : > { %v6323_v54 = vpack.c.bf16 %v5795_v16, %v5795_v16  ;;  %v5259_v27 = vrot.slane %v5245_v25, %v6858_v11  ;;  %v4848_v2 = vadd.f32 %v6907_v58, %v4693_v45  ;;  %v4849_v63 = vadd.f32 %v8747_v44, %v4694_v56  ;;  %v8791_v25 = vld [vmem:[#allocation54_spill] sm:$0xff] }
 0x154   : > { %v4974_v32 = vmax.f32 %v4846_v12, 0.0  ;;  %v3943_v3 = vrot.slane %v3929_v52, %v6858_v11  ;;  %v4975_v36 = vmax.f32 %v4847_v29, 0.0  ;;  %v3944_v23 = vcombine.high %v3936_v30, %v3936_v30 }
 0x155   : > { %5997 = vst.msk [vmem:[%s7616_s26 + $0x74] sm:$0x1] %vm5971_vm4, %v6323_v54  ;;  %v5260_v4 = vcombine.low %v5252_v20, %v5259_v27  ;;  %v4484_v6 = vadd.f32 %v3936_v30, %v7482_v38  ;;  %v4976_v8 = vmax.f32 %v4848_v2, 0.0  ;;  %v4977_v14 = vmax.f32 %v4849_v63, 0.0  ;;  %v8789_v38 = vld [vmem:[#allocation51_spill] sm:$0xff]  ;;  %v8792_v27 = vld [vmem:[#allocation56_spill] sm:$0xff] }
 0x156   : > { %v3945_v28 = vcombine.high %v3943_v3, %v3943_v3  ;;  %v4486_v42 = vadd.f32 %v3943_v3, %v7491_v19  ;;  %v5516_v41 = vcombine.low %v4974_v32, %v4975_v36  ;;  %v4485_v15 = vadd.f32 %v3944_v23, %v8787_v24  ;;  %v8793_v32 = vld [vmem:[#allocation58_spill] sm:$0xff] }
 0x157   : > { %v5696_v31 = vrot.slane %v5260_v4, 7  ;;  %v4639_v53 = vmul.f32 %v6866_v35, %v4484_v6  ;;  %v5517_v18 = vcombine.low %v4976_v8, %v4977_v14  ;;  %v8790_v49 = vcombine.high %v8789_v38, %v8789_v38  ;;  %v8794_v4 = vld [vmem:[#allocation59_spill] sm:$0xff]  ;;  %v8795_v14 = vld [vmem:[#allocation57_spill] sm:$0xff] }
 0x158   : > { %v4487_v59 = vadd.f32 %v3945_v28, %v8788_v21  ;;  %v4641_v39 = vmul.f32 %v6887_v50, %v4486_v42  ;;  %v5524_v46 = vrot.slane %v5516_v41, %v6858_v11  ;;  %v4640_v60 = vmul.f32 %v6891_v51, %v4485_v15  ;;  %v8797_v21 = vld [vmem:[#allocation3_spill] sm:$0xff] }
 0x159   : > { %v3719_v19 = vsel %vm1070_vm2, %v8790_v49, %v7525_v13  ;;  %v5697_v48 = vsel %vm1070_vm2, %v5694_v47, %v5696_v31  ;;  %v5699_v62 = vsel %vm1070_vm2, %v5696_v31, %v5698_v9  ;;  %v5531_v55 = vrot.slane %v5517_v18, %v6858_v11 }
 0x15a   : > { %v6301_v57 = vpack.c.bf16 %v5697_v48, %v5697_v48  ;;  %v6302_v1 = vpack.c.bf16 %v5699_v62, %v5699_v62  ;;  %v4642_v43 = vmul.f32 %v6919_v26, %v4487_v59  ;;  %v4794_v13 = vadd.f32 %v6894_v40, %v4639_v53  ;;  %v8798_v59 = vld [vmem:[#allocation53_spill] sm:$0xff] }
 0x15b   : > { %v4795_v0 = vadd.f32 %v6923_v5, %v4640_v60  ;;  %v4796_v47 = vadd.f32 %v6907_v58, %v4641_v39  ;;  %v4201_v52 = vcombine.high %v6410_v7, %v6410_v7  ;;  %v5532_v34 = vcombine.low %v5524_v46, %v5531_v55  ;;  %v887_v46 = vpop.f32.mrf.mxu0 }
 0x15c   : > { %5975 = vst.msk [vmem:[%s7616_s26 + $0x1c] sm:$0xf] %vm5966_vm3, %v6301_v57  ;;  %5976 = vst.msk [vmem:[%s7616_s26 + $0x20] sm:$0xf] %vm5966_vm3, %v6302_v1  ;;  %v4797_v9 = vadd.f32 %v8747_v44, %v4642_v43  ;;  %v4208_v22 = vrot.slane %v6410_v7, %v6858_v11  ;;  %v1505_v17 = vcombine.high %v8791_v25, %v8791_v25  ;;  %v4922_v45 = vmax.f32 %v4794_v13, 0.0 }
 0x15d   : > { %v4923_v16 = vmax.f32 %v4795_v0, 0.0  ;;  %v4924_v56 = vmax.f32 %v4796_v47, 0.0  ;;  %v4215_v12 = vrot.slane %v4201_v52, %v6858_v11  ;;  %v5724_v30 = vrot.slane %v5532_v34, 7  ;;  %v967_v52 = vpop.f32.mrf.mxu1 }
 0x15e   : > { %v4925_v54 = vmax.f32 %v4797_v9, 0.0  ;;  %v4216_v20 = vcombine.high %v4208_v22, %v4208_v22  ;;  %v4548_v29 = vadd.f32 %v4208_v22, %v8792_v27  ;;  %v1507_v36 = vcombine.high %v8794_v4, %v8794_v4  ;;  %v8802_v27 = vld [vmem:[#allocation49_spill] sm:$0xff] }
 0x15f   : > { %v5295_v2 = vcombine.low %v4922_v45, %v4923_v16  ;;  %v4217_v63 = vcombine.high %v4215_v12, %v4215_v12  ;;  %v4550_v3 = vadd.f32 %v4215_v12, %v8793_v32  ;;  %v5725_v23 = vsel %vm1070_vm2, %v5722_v33, %v5724_v30 }
 0x160   : > { %v5727_v6 = vsel %vm1070_vm2, %v5724_v30, %v5726_v10  ;;  %v5296_v8 = vcombine.low %v4924_v56, %v4925_v54  ;;  %v4549_v28 = vadd.f32 %v4216_v20, %v8795_v14  ;;  %v6321_v42 = vpack.c.bf16 %v5725_v23, %v5725_v23  ;;  %v8796_v10 = vld [vmem:[#allocation55_spill] sm:$0xff]  ;;  %v8800_v30 = vld [vmem:[#allocation2_spill] sm:$0xff] }
 0x161   : > { %v6322_v31 = vpack.c.bf16 %v5727_v6, %v5727_v6  ;;  %v5303_v41 = vrot.slane %v5295_v2, %v6858_v11  ;;  %v4551_v24 = vadd.f32 %v4217_v63, %v3719_v19  ;;  %v4703_v53 = vmul.f32 %v6866_v35, %v4548_v29 }
 0x162   : > { %v5310_v15 = vrot.slane %v5296_v8, %v6858_v11  ;;  %v4704_v37 = vmul.f32 %v6891_v51, %v4549_v28  ;;  %v4705_v33 = vmul.f32 %v6887_v50, %v4550_v3  ;;  %5995 = vst.msk [vmem:[%s7616_s26 + $0x6c] sm:$0xf] %vm5966_vm3, %v6321_v42  ;;  %v2435_v18 = vcombine.high %v8796_v10, %v8796_v10 }
 0x163   : > { %5996 = vst.msk [vmem:[%s7616_s26 + $0x70] sm:$0xf] %vm5966_vm3, %v6322_v31  ;;  %v4706_v61 = vmul.f32 %v6919_v26, %v4551_v24  ;;  %v3107_v39 = vrot.slane %v8798_v59, %v8797_v21  ;;  %v3111_v7 = vrot.slane %v8796_v10, %v8797_v21  ;;  %v4858_v49 = vadd.f32 %v6894_v40, %v4703_v53 }
 0x164   : > { %v7953_v38 = vcombine.low %v5303_v41, %v5310_v15  ;;  %v4859_v19 = vadd.f32 %v6923_v5, %v4704_v37  ;;  %v4860_v48 = vadd.f32 %v6907_v58, %v4705_v33  ;;  %v8799_v60 = vcombine.high %v8798_v59, %v8798_v59 }
 0x165   : > { %v4861_v62 = vadd.f32 %v8747_v44, %v4706_v61  ;;  %v3119_v1 = vrot.slane %v2435_v18, %v8797_v21  ;;  %v3648_v55 = vsel %vm1070_vm2, %v8791_v25, %v3107_v39  ;;  %v4986_v13 = vmax.f32 %v4858_v49, 0.0  ;;  %v8801_v25 = vld [vmem:[#allocation48_spill] sm:$0xff] }
 0x166   : > { %v3115_v57 = vrot.slane %v8799_v60, %v8797_v21  ;;  %v5701_v43 = vrot.slane %v7953_v38, 7  ;;  %v4987_v0 = vmax.f32 %v4859_v19, 0.0  ;;  %v4988_v47 = vmax.f32 %v4860_v48, 0.0 }
 0x167   : > { %v4989_v34 = vmax.f32 %v4861_v62, 0.0  ;;  %v3649_v9 = vsel %vm1070_vm2, %v8794_v4, %v3111_v7  ;;  %v3651_v45 = vsel %vm1070_vm2, %v1507_v36, %v3119_v1  ;;  %v3912_v56 = vcombine.high %v887_v46, %v887_v46 }
 0x168   : > { %v3650_v22 = vsel %vm1070_vm2, %v1505_v17, %v3115_v57  ;;  %v5567_v16 = vcombine.low %v4986_v13, %v4987_v0  ;;  %v3919_v12 = vrot.slane %v887_v46, %v6858_v11  ;;  %v1859_v54 = vrot.slane %v8801_v25, %v8800_v30 }
 0x169   : > { %v5568_v20 = vcombine.low %v4988_v47, %v4989_v34  ;;  %v2787_v29 = vrot.slane %v8802_v27, %v8800_v30  ;;  %v4184_v2 = vcombine.high %v967_v52, %v967_v52  ;;  %v4191_v63 = vrot.slane %v967_v52, %v6858_v11  ;;  %v8803_v27 = vld [vmem:[#allocation39_spill] sm:$0xff] }
 0x16a   : > { %v5575_v32 = vrot.slane %v5567_v16, %v6858_v11  ;;  %v3926_v17 = vrot.slane %v3912_v56, %v6858_v11  ;;  %v3927_v3 = vcombine.high %v3919_v12, %v3919_v12  ;;  %v4480_v4 = vadd.f32 %v3919_v12, %v3648_v55 }
 0x16b   : > { %v5582_v36 = vrot.slane %v5568_v20, %v6858_v11  ;;  %v1867_v23 = vcombine.high %v1859_v54, %v1859_v54  ;;  %v1875_v6 = vrot.slane %v1859_v54, %v8800_v30  ;;  %v2795_v8 = vcombine.high %v2787_v29, %v2787_v29 }
 0x16c   : > { %v3928_v14 = vcombine.high %v3926_v17, %v3926_v17  ;;  %v4481_v28 = vadd.f32 %v3927_v3, %v3649_v9  ;;  %v4482_v42 = vadd.f32 %v3926_v17, %v3650_v22  ;;  %v4635_v31 = vmul.f32 %v6866_v35, %v4480_v4 }
 0x16d   : > { %v7982_v41 = vcombine.low %v5575_v32, %v5582_v36  ;;  %v1889_v24 = vrot.slane %v1867_v23, %v8800_v30  ;;  %v1897_v15 = vcombine.high %v1875_v6, %v1875_v6  ;;  %v2803_v53 = vrot.slane %v2787_v29, %v8800_v30  ;;  %v6389_v23 = vpop.f32.mrf.mxu0 }
 0x16e   : > { %v4483_v37 = vadd.f32 %v3928_v14, %v3651_v45  ;;  %v4636_v33 = vmul.f32 %v6891_v51, %v4481_v28  ;;  %v4637_v61 = vmul.f32 %v6887_v50, %v4482_v42  ;;  %v4790_v10 = vadd.f32 %v6894_v40, %v4635_v31 }
 0x16f   : > { %v5729_v18 = vrot.slane %v7982_v41, 7  ;;  %v1899_v59 = vcombine.high %v1889_v24, %v1889_v24  ;;  %v2817_v39 = vrot.slane %v2795_v8, %v8800_v30  ;;  %v2825_v7 = vcombine.high %v2803_v53, %v2803_v53 }
 0x170   : > { %v4638_v49 = vmul.f32 %v6919_v26, %v4483_v37  ;;  %v4791_v19 = vadd.f32 %v6923_v5, %v4636_v33  ;;  %v4792_v48 = vadd.f32 %v6907_v58, %v4637_v61  ;;  %v4918_v62 = vmax.f32 %v4790_v10, 0.0 }
 0x171   : > { %v2827_v46 = vcombine.high %v2817_v39, %v2817_v39  ;;  %v3363_v60 = vrot.slane %v2803_v53, %v8797_v21  ;;  %v3367_v57 = vrot.slane %v2817_v39, %v8797_v21  ;;  %v3371_v1 = vrot.slane %v2825_v7, %v8797_v21 }
 0x172   : > { %v4793_v55 = vadd.f32 %v8747_v44, %v4638_v49  ;;  %v4919_v13 = vmax.f32 %v4791_v19, 0.0  ;;  %v4920_v0 = vmax.f32 %v4792_v48, 0.0  ;;  %v4198_v47 = vrot.slane %v4184_v2, %v6858_v11 }
 0x173   : > { %v3375_v52 = vrot.slane %v2827_v46, %v8797_v21  ;;  %v3712_v34 = vsel %vm1070_vm2, %v1875_v6, %v3363_v60  ;;  %v3713_v9 = vsel %vm1070_vm2, %v1889_v24, %v3367_v57  ;;  %v3714_v22 = vsel %vm1070_vm2, %v1897_v15, %v3371_v1  ;;  %v8804_v6 = vld [vmem:[#allocation38_spill] sm:$0xff] }
 0x174   : > { %v4921_v45 = vmax.f32 %v4793_v55, 0.0  ;;  %v5278_v16 = vcombine.low %v4918_v62, %v4919_v13  ;;  %v4199_v56 = vcombine.high %v4191_v63, %v4191_v63  ;;  %v4200_v12 = vcombine.high %v4198_v47, %v4198_v47 }
 0x175   : > { %v3715_v25 = vsel %vm1070_vm2, %v1899_v59, %v3375_v52  ;;  %v4544_v54 = vadd.f32 %v4191_v63, %v3712_v34  ;;  %v4546_v20 = vadd.f32 %v4198_v47, %v3714_v22  ;;  %v1078_v29 = vrot.slane %v8803_v27, 7  ;;  %v8807_v47 = vld [vmem:[#allocation46_spill] sm:$0xff] }
 0x176   : > { %v5279_v32 = vcombine.low %v4920_v0, %v4921_v45  ;;  %v5286_v2 = vrot.slane %v5278_v16, %v6858_v11  ;;  %v4545_v17 = vadd.f32 %v4199_v56, %v3713_v9  ;;  %v4547_v3 = vadd.f32 %v4200_v12, %v3715_v25 }
 0x177   : > { %v4699_v4 = vmul.f32 %v6866_v35, %v4544_v54  ;;  %v4701_v36 = vmul.f32 %v6887_v50, %v4546_v20  ;;  %v8805_v8 = vrot.slane %v8804_v6, 7  ;;  %v8806_v63 = vrot.slane %v8803_v27, 1 }
 0x178   : > { %v5293_v42 = vrot.slane %v5279_v32, %v6858_v11  ;;  %v4700_v31 = vmul.f32 %v6891_v51, %v4545_v17  ;;  %v4702_v24 = vmul.f32 %v6919_v26, %v4547_v3  ;;  %v1189_v33 = vmul.f32 0.75, %v8803_v27 }
 0x179   : > { %v1079_v14 = vsel %vm1070_vm2, %v8805_v8, %v1078_v29  ;;  %v1162_v28 = vsel %vm1119_vm1, %v8806_v63, %v8803_v27  ;;  %v4854_v53 = vadd.f32 %v6894_v40, %v4699_v4  ;;  %v4856_v37 = vadd.f32 %v6907_v58, %v4701_v36  ;;  %v8808_v36 = vld [vmem:[#allocation44_spill] sm:$0xff] }
 0x17a   : > { %v1173_v15 = vmul.f32 0.25, %v1079_v14  ;;  %v1221_v61 = vmul.f32 0.25, %v1162_v28  ;;  %v5294_v10 = vcombine.low %v5286_v2, %v5293_v42  ;;  %v4855_v59 = vadd.f32 %v6923_v5, %v4700_v31 }
 0x17b   : > { %v4857_v39 = vadd.f32 %v8747_v44, %v4702_v24  ;;  %v3963_v7 = vcombine.high %v6389_v23, %v6389_v23  ;;  %v4982_v49 = vmax.f32 %v4854_v53, 0.0  ;;  %v4984_v19 = vmax.f32 %v4856_v37, 0.0 }
 0x17c   : > { %v8023_v48 = vadd.f32 %v1189_v33, %v1173_v15  ;;  %v8025_v62 = vadd.f32 %v1221_v61, %v1189_v33  ;;  %v5700_v46 = vrot.slane %v5294_v10, 7  ;;  %v4983_v60 = vmax.f32 %v4855_v59, 0.0 }
 0x17d   : > { %v4985_v57 = vmax.f32 %v4857_v39, 0.0  ;;  %v3970_v1 = vrot.slane %v6389_v23, %v6858_v11  ;;  %v3977_v0 = vrot.slane %v3963_v7, %v6858_v11  ;;  %v1090_v52 = vrot.slane %v8807_v47, 7 }
 0x17e   : > { %v1509_v55 = vcombine.high %v8023_v48, %v8023_v48  ;;  %v2437_v13 = vcombine.high %v8025_v62, %v8025_v62  ;;  %v5702_v34 = vsel %vm1070_vm2, %v5700_v46, %v5701_v43  ;;  %v5784_v9 = vsel %vm1070_vm2, 0.0, %v5700_v46  ;;  %v6413_v46 = vpop.f32.mrf.mxu1 }
 0x17f   : > { %v5550_v22 = vcombine.low %v4982_v49, %v4983_v60  ;;  %v5551_v45 = vcombine.low %v4984_v19, %v4985_v57  ;;  %v6304_v16 = vpack.c.bf16 %v5784_v9, %v5784_v9  ;;  %v6305_v56 = vpack.c.bf16 %v5702_v34, %v5702_v34 }
 0x180   : > { %v1523_v12 = vrot.slane %v1509_v55, %v8800_v30  ;;  %v2451_v25 = vrot.slane %v2437_v13, %v8800_v30  ;;  %v3978_v27 = vcombine.high %v3970_v1, %v3970_v1  ;;  %v3979_v29 = vcombine.high %v3977_v0, %v3977_v0 }
 0x181   : > { %v5558_v54 = vrot.slane %v5550_v22, %v6858_v11  ;;  %v5565_v20 = vrot.slane %v5551_v45, %v6858_v11  ;;  %5978 = vst.msk [vmem:[%s7616_s26 + $0x28] sm:$0xf] %vm5966_vm3, %v6304_v16  ;;  %5979 = vst.msk [vmem:[%s7616_s26 + $0x2c] sm:$0xf] %vm5966_vm3, %v6305_v56  ;;  %v8809_v23 = vrot.slane %v8808_v36, 7  ;;  %v8810_v8 = vrot.slane %v8807_v47, 1 }
 0x182   : > { %v1525_v32 = vcombine.high %v1523_v12, %v1523_v12  ;;  %v1539_v2 = vrot.slane %v1523_v12, %v8800_v30  ;;  %v2453_v17 = vcombine.high %v2451_v25, %v2451_v25  ;;  %v2467_v3 = vrot.slane %v2451_v25, %v8800_v30 }
 0x183   : > { %v5566_v4 = vcombine.low %v5558_v54, %v5565_v20  ;;  %v1091_v6 = vsel %vm1070_vm2, %v8809_v23, %v1090_v52  ;;  %v1166_v14 = vsel %vm1119_vm1, %v8810_v8, %v8807_v47  ;;  %v1197_v63 = vmul.f32 0.75, %v8807_v47 }
 0x184   : > { %v1553_v28 = vrot.slane %v1525_v32, %v8800_v30  ;;  %v1555_v42 = vcombine.high %v1539_v2, %v1539_v2  ;;  %v2481_v31 = vrot.slane %v2453_v17, %v8800_v30  ;;  %v2483_v24 = vcombine.high %v2467_v3, %v2467_v3 }
 0x185   : > { %v5728_v15 = vrot.slane %v5566_v4, 7  ;;  %v3155_v53 = vrot.slane %v2467_v3, %v8797_v21  ;;  %v1181_v37 = vmul.f32 0.25, %v1091_v6  ;;  %v1229_v33 = vmul.f32 0.25, %v1166_v14 }
 0x186   : > { %v1557_v61 = vcombine.high %v1553_v28, %v1553_v28  ;;  %v2485_v10 = vcombine.high %v2481_v31, %v2481_v31  ;;  %v3159_v59 = vrot.slane %v2481_v31, %v8797_v21  ;;  %v3163_v39 = vrot.slane %v2483_v24, %v8797_v21 }
 0x187   : > { %v5730_v7 = vsel %vm1070_vm2, %v5728_v15, %v5729_v18  ;;  %v5788_v49 = vsel %vm1070_vm2, 0.0, %v5728_v15  ;;  %v3660_v19 = vsel %vm1070_vm2, %v1539_v2, %v3155_v53  ;;  %v8066_v60 = vadd.f32 %v1197_v63, %v1181_v37 }
 0x188   : > { %v6324_v57 = vpack.c.bf16 %v5788_v49, %v5788_v49  ;;  %v6325_v55 = vpack.c.bf16 %v5730_v7, %v5730_v7  ;;  %v3167_v13 = vrot.slane %v2485_v10, %v8797_v21  ;;  %v3661_v47 = vsel %vm1070_vm2, %v1553_v28, %v3159_v59 }
 0x189   : > { %v3662_v52 = vsel %vm1070_vm2, %v1555_v42, %v3163_v39  ;;  %v4492_v34 = vadd.f32 %v3970_v1, %v3660_v19  ;;  %v4493_v9 = vadd.f32 %v3978_v27, %v3661_v47  ;;  %v8071_v22 = vadd.f32 %v1229_v33, %v1197_v63 }
 0x18a   : > { %5998 = vst.msk [vmem:[%s7616_s26 + $0x78] sm:$0xf] %vm5966_vm3, %v6324_v57  ;;  %5999 = vst.msk [vmem:[%s7616_s26 + $0x7c] sm:$0xf] %vm5966_vm3, %v6325_v55  ;;  %v3663_v45 = vsel %vm1070_vm2, %v1557_v61, %v3167_v13  ;;  %v4494_v16 = vadd.f32 %v3977_v0, %v3662_v52  ;;  %v1901_v56 = vcombine.high %v8066_v60, %v8066_v60 }
 0x18b   : > { %v4235_v12 = vcombine.high %v6413_v46, %v6413_v46  ;;  %v4495_v25 = vadd.f32 %v3979_v29, %v3663_v45  ;;  %v4647_v54 = vmul.f32 %v6866_v35, %v4492_v34  ;;  %v4648_v20 = vmul.f32 %v6891_v51, %v4493_v9 }
 0x18c   : > { %v2829_v1 = vcombine.high %v8071_v22, %v8071_v22  ;;  %v4649_v27 = vmul.f32 %v6887_v50, %v4494_v16  ;;  %v1915_v32 = vrot.slane %v1901_v56, %v8800_v30  ;;  %v4242_v2 = vrot.slane %v6413_v46, %v6858_v11 }
 0x18d   : > { %v4249_v0 = vrot.slane %v4235_v12, %v6858_v11  ;;  %v4650_v17 = vmul.f32 %v6919_v26, %v4495_v25  ;;  %v4802_v3 = vadd.f32 %v6894_v40, %v4647_v54  ;;  %v4803_v29 = vadd.f32 %v6923_v5, %v4648_v20  ;;  %v897_v25 = vpop.f32.mrf.mxu0 }
 0x18e   : > { %v2843_v4 = vrot.slane %v2829_v1, %v8800_v30  ;;  %v4804_v36 = vadd.f32 %v6907_v58, %v4649_v27  ;;  %v1917_v23 = vcombine.high %v1915_v32, %v1915_v32  ;;  %v1931_v6 = vrot.slane %v1915_v32, %v8800_v30 }
 0x18f   : > { %v4250_v8 = vcombine.high %v4242_v2, %v4242_v2  ;;  %v4805_v14 = vadd.f32 %v8747_v44, %v4650_v17  ;;  %v4930_v63 = vmax.f32 %v4802_v3, 0.0  ;;  %v4931_v28 = vmax.f32 %v4803_v29, 0.0 }
 0x190   : > { %v2845_v42 = vcombine.high %v2843_v4, %v2843_v4  ;;  %v4932_v31 = vmax.f32 %v4804_v36, 0.0  ;;  %v1945_v24 = vrot.slane %v1917_v23, %v8800_v30  ;;  %v1947_v15 = vcombine.high %v1931_v6, %v1931_v6 }
 0x191   : > { %v2859_v53 = vrot.slane %v2843_v4, %v8800_v30  ;;  %v4933_v37 = vmax.f32 %v4805_v14, 0.0  ;;  %v5329_v33 = vcombine.low %v4930_v63, %v4931_v28  ;;  %v4251_v10 = vcombine.high %v4249_v0, %v4249_v0 }
 0x192   : > { %v2873_v61 = vrot.slane %v2845_v42, %v8800_v30  ;;  %v1949_v59 = vcombine.high %v1945_v24, %v1945_v24  ;;  %v1516_v49 = vrot.slane %v8023_v48, %v8800_v30 }
 0x193   : > { %v2875_v39 = vcombine.high %v2859_v53, %v2859_v53  ;;  %v3411_v7 = vrot.slane %v2859_v53, %v8797_v21  ;;  %v5330_v19 = vcombine.low %v4932_v31, %v4933_v37  ;;  %v5337_v46 = vrot.slane %v5329_v33, %v6858_v11 }
 0x194   : > { %v2877_v57 = vcombine.high %v2873_v61, %v2873_v61  ;;  %v3415_v55 = vrot.slane %v2873_v61, %v8797_v21  ;;  %v1524_v52 = vcombine.high %v1516_v49, %v1516_v49  ;;  %v1532_v34 = vrot.slane %v1516_v49, %v8800_v30 }
 0x195   : > { %v3419_v13 = vrot.slane %v2875_v39, %v8797_v21  ;;  %v3724_v47 = vsel %vm1070_vm2, %v1931_v6, %v3411_v7  ;;  %v5344_v9 = vrot.slane %v5330_v19, %v6858_v11 }
 0x196   : > { %v3423_v45 = vrot.slane %v2877_v57, %v8797_v21  ;;  %v3725_v48 = vsel %vm1070_vm2, %v1945_v24, %v3415_v55  ;;  %v4556_v16 = vadd.f32 %v4242_v2, %v3724_v47  ;;  %v1546_v54 = vrot.slane %v1524_v52, %v8800_v30 }
 0x197   : > { %v3726_v56 = vsel %vm1070_vm2, %v1947_v15, %v3419_v13  ;;  %v4557_v12 = vadd.f32 %v4250_v8, %v3725_v48  ;;  %v1554_v20 = vcombine.high %v1532_v34, %v1532_v34  ;;  %v8111_v1 = vcombine.low %v5337_v46, %v5344_v9 }
 0x198   : > { %v3727_v27 = vsel %vm1070_vm2, %v1949_v59, %v3423_v45  ;;  %v4558_v32 = vadd.f32 %v4249_v0, %v3726_v56  ;;  %v4711_v17 = vmul.f32 %v6866_v35, %v4556_v16  ;;  %v1556_v4 = vcombine.high %v1546_v54, %v1546_v54 }
 0x199   : > { %v4559_v3 = vadd.f32 %v4251_v10, %v3727_v27  ;;  %v4712_v29 = vmul.f32 %v6891_v51, %v4557_v12  ;;  %v2444_v2 = vrot.slane %v8025_v62, %v8800_v30  ;;  %v5705_v36 = vrot.slane %v8111_v1, 7 }
 0x19a   : > { %v4713_v23 = vmul.f32 %v6887_v50, %v4558_v32  ;;  %v4866_v6 = vadd.f32 %v6894_v40, %v4711_v17  ;;  %v3946_v8 = vcombine.high %v897_v25, %v897_v25  ;;  %v3953_v24 = vrot.slane %v897_v25, %v6858_v11 }
 0x19b   : > { %v4714_v0 = vmul.f32 %v6919_v26, %v4559_v3  ;;  %v4867_v14 = vadd.f32 %v6923_v5, %v4712_v29  ;;  %v2452_v63 = vcombine.high %v2444_v2, %v2444_v2  ;;  %v2460_v28 = vrot.slane %v2444_v2, %v8800_v30 }
 0x19c   : > { %v5792_v62 = vsel %vm1070_vm2, %v5705_v36, 0.0  ;;  %v4868_v42 = vadd.f32 %v6907_v58, %v4713_v23  ;;  %v4994_v31 = vmax.f32 %v4866_v6, 0.0  ;;  %v3960_v39 = vrot.slane %v3946_v8, %v6858_v11 }
 0x19d   : > { %v6308_v15 = vpack.c.bf16 %v5792_v62, %v5792_v62  ;;  %v4869_v53 = vadd.f32 %v8747_v44, %v4714_v0  ;;  %v4995_v37 = vmax.f32 %v4867_v14, 0.0  ;;  %v2474_v33 = vrot.slane %v2452_v63, %v8800_v30 }
 0x19e   : > { %v4996_v61 = vmax.f32 %v4868_v42, 0.0  ;;  %v2482_v10 = vcombine.high %v2460_v28, %v2460_v28  ;;  %v3139_v59 = vrot.slane %v2460_v28, %v8797_v21  ;;  %v3961_v13 = vcombine.high %v3953_v24, %v3953_v24 }
 0x19f   : > { %5982 = vst.msk [vmem:[%s7616_s26 + $0x38] sm:$0x1] %vm5971_vm4, %v6308_v15  ;;  %v4997_v7 = vmax.f32 %v4869_v53, 0.0  ;;  %v5601_v49 = vcombine.low %v4994_v31, %v4995_v37  ;;  %v2484_v19 = vcombine.high %v2474_v33, %v2474_v33  ;;  %v3143_v46 = vrot.slane %v2474_v33, %v8797_v21  ;;  %v977_v15 = vpop.f32.mrf.mxu1 }
 0x1a0   : > { %v3147_v57 = vrot.slane %v2482_v10, %v8797_v21  ;;  %v3656_v55 = vsel %vm1070_vm2, %v1532_v34, %v3139_v59  ;;  %v3962_v47 = vcombine.high %v3960_v39, %v3960_v39  ;;  %v1908_v34 = vrot.slane %v8066_v60, %v8800_v30 }
 0x1a1   : > { %v5602_v52 = vcombine.low %v4996_v61, %v4997_v7  ;;  %v5609_v9 = vrot.slane %v5601_v49, %v6858_v11  ;;  %v3151_v45 = vrot.slane %v2484_v19, %v8797_v21  ;;  %v3657_v48 = vsel %vm1070_vm2, %v1546_v54, %v3143_v46 }
 0x1a2   : > { %v3658_v16 = vsel %vm1070_vm2, %v1554_v20, %v3147_v57  ;;  %v4488_v56 = vadd.f32 %v3953_v24, %v3656_v55  ;;  %v4489_v12 = vadd.f32 %v3961_v13, %v3657_v48  ;;  %v2836_v17 = vrot.slane %v8071_v22, %v8800_v30 }
 0x1a3   : > { %v5616_v25 = vrot.slane %v5602_v52, %v6858_v11  ;;  %v3659_v27 = vsel %vm1070_vm2, %v1556_v4, %v3151_v45  ;;  %v4490_v32 = vadd.f32 %v3960_v39, %v3658_v16  ;;  %v1916_v2 = vcombine.high %v1908_v34, %v1908_v34 }
 0x1a4   : > { %v4491_v3 = vadd.f32 %v3962_v47, %v3659_v27  ;;  %v4643_v29 = vmul.f32 %v6866_v35, %v4488_v56  ;;  %v4644_v54 = vmul.f32 %v6891_v51, %v4489_v12  ;;  %v1924_v23 = vrot.slane %v1908_v34, %v8800_v30  ;;  %v8812_v27 = vld [vmem:[#allocation40_spill] sm:$0xff] }
 0x1a5   : > { %v8166_v20 = vcombine.low %v5609_v9, %v5616_v25  ;;  %v4645_v60 = vmul.f32 %v6887_v50, %v4490_v32  ;;  %v2844_v6 = vcombine.high %v2836_v17, %v2836_v17  ;;  %v1938_v0 = vrot.slane %v1916_v2, %v8800_v30  ;;  %v8813_v32 = vld [vmem:[#allocation36_spill] sm:$0xff]  ;;  %v8814_v2 = vld [vmem:[#allocation42_spill] sm:$0xff] }
 0x1a6   : > { %v4646_v4 = vmul.f32 %v6919_v26, %v4491_v3  ;;  %v4798_v8 = vadd.f32 %v6894_v40, %v4643_v29  ;;  %v4799_v22 = vadd.f32 %v6923_v5, %v4644_v54  ;;  %v1946_v28 = vcombine.high %v1924_v23, %v1924_v23 }
 0x1a7   : > { %v5733_v14 = vrot.slane %v8166_v20, 7  ;;  %v4800_v63 = vadd.f32 %v6907_v58, %v4645_v60  ;;  %v2852_v62 = vrot.slane %v2836_v17, %v8800_v30  ;;  %v1948_v53 = vcombine.high %v1938_v0, %v1938_v0  ;;  %v8815_v60 = vld [vmem:[#allocation37_spill] sm:$0xff] }
 0x1a8   : > { %v4801_v42 = vadd.f32 %v8747_v44, %v4646_v4  ;;  %v4926_v31 = vmax.f32 %v4798_v8, 0.0  ;;  %v4927_v24 = vmax.f32 %v4799_v22, 0.0  ;;  %v2866_v61 = vrot.slane %v2844_v6, %v8800_v30 }
 0x1a9   : > { %v5796_v37 = vsel %vm1070_vm2, %v5733_v14, 0.0  ;;  %v4928_v33 = vmax.f32 %v4800_v63, 0.0  ;;  %v2874_v10 = vcombine.high %v2852_v62, %v2852_v62  ;;  %v3395_v49 = vrot.slane %v2852_v62, %v8797_v21 }
 0x1aa   : > { %v6328_v59 = vpack.c.bf16 %v5796_v37, %v5796_v37  ;;  %v4929_v39 = vmax.f32 %v4801_v42, 0.0  ;;  %v5312_v7 = vcombine.low %v4926_v31, %v4927_v24  ;;  %v2876_v19 = vcombine.high %v2866_v61, %v2866_v61 }
 0x1ab   : > { %v3399_v46 = vrot.slane %v2866_v61, %v8797_v21  ;;  %v3403_v57 = vrot.slane %v2874_v10, %v8797_v21  ;;  %v4218_v55 = vcombine.high %v977_v15, %v977_v15  ;;  %v3720_v52 = vsel %vm1070_vm2, %v1924_v23, %v3395_v49 }
 0x1ac   : > { %6002 = vst.msk [vmem:[%s7616_s26 + $0x88] sm:$0x1] %vm5971_vm4, %v6328_v59  ;;  %v5313_v13 = vcombine.low %v4928_v33, %v4929_v39  ;;  %v5320_v47 = vrot.slane %v5312_v7, %v6858_v11  ;;  %v4225_v9 = vrot.slane %v977_v15, %v6858_v11  ;;  %v3407_v45 = vrot.slane %v2876_v19, %v8797_v21  ;;  %v6392_v33 = vpop.f32.mrf.mxu0  ;;  %v1016_v19 = vld [vmem:[%s524_s19] sm:$0xff] }
 0x1ad   : > { %v3721_v48 = vsel %vm1070_vm2, %v1938_v0, %v3399_v46  ;;  %v3722_v16 = vsel %vm1070_vm2, %v1946_v28, %v3403_v57  ;;  %v4232_v56 = vrot.slane %v4218_v55, %v6858_v11  ;;  %v8198_v17 = vadd.f32 %v8813_v32, %v8812_v27  ;;  %v1017_v46 = vld [vmem:[%s524_s19 + $0x8] sm:$0xff]  ;;  %v6416_v32 = vpop.f32.mrf.mxu1 }
 0x1ae   : > { %v5327_v12 = vrot.slane %v5313_v13, %v6858_v11  ;;  %v4233_v34 = vcombine.high %v4225_v9, %v4225_v9  ;;  %v4552_v25 = vadd.f32 %v4225_v9, %v3720_v52  ;;  %v3723_v3 = vsel %vm1070_vm2, %v1948_v53, %v3407_v45 }
 0x1af   : > { %v4234_v29 = vcombine.high %v4232_v56, %v4232_v56  ;;  %v4554_v54 = vadd.f32 %v4232_v56, %v3722_v16  ;;  %v8203_v23 = vadd.f32 %v8815_v60, %v8814_v2  ;;  %v1080_v22 = vrot.slane %v8198_v17, 7 }
 0x1b0   : > { %v5328_v6 = vcombine.low %v5320_v47, %v5327_v12  ;;  %v4553_v4 = vadd.f32 %v4233_v34, %v3721_v48  ;;  %v4707_v8 = vmul.f32 %v6866_v35, %v4552_v25  ;;  %v1129_v28 = vrot.slane %v8198_v17, 1 }
 0x1b1   : > { %v4555_v0 = vadd.f32 %v4234_v29, %v3723_v3  ;;  %v4709_v63 = vmul.f32 %v6887_v50, %v4554_v54  ;;  %v1130_v62 = vrot.slane %v8203_v23, 1  ;;  %v1114_v15 = vsel %vm1070_vm2, %v8198_v17, %v1080_v22  ;;  %v8816_v3 = vld [vmem:[#allocation41_spill] sm:$0xff]  ;;  %v8817_v54 = vld [vmem:[#allocation43_spill] sm:$0xff] }
 0x1b2   : > { %v5703_v42 = vrot.slane %v5328_v6, 7  ;;  %v4708_v31 = vmul.f32 %v6891_v51, %v4553_v4  ;;  %v4862_v24 = vadd.f32 %v6894_v40, %v4707_v8  ;;  %v1174_v10 = vmul.f32 0.25, %v1114_v15 }
 0x1b3   : > { %v4710_v53 = vmul.f32 %v6919_v26, %v4555_v0  ;;  %v4864_v37 = vadd.f32 %v6907_v58, %v4709_v63  ;;  %v1131_v61 = vsel %vm1119_vm1, %v1129_v28, %v1130_v62  ;;  %v1190_v38 = vmul.f32 0.75, %v8198_v17 }
 0x1b4   : > { %v5704_v59 = vsel %vm1070_vm2, %v5701_v43, %v5703_v42  ;;  %v5706_v39 = vsel %vm1070_vm2, %v5703_v42, %v5705_v36  ;;  %v4863_v7 = vadd.f32 %v6923_v5, %v4708_v31  ;;  %v4990_v49 = vmax.f32 %v4862_v24, 0.0 }
 0x1b5   : > { %v6306_v57 = vpack.c.bf16 %v5704_v59, %v5704_v59  ;;  %v6307_v55 = vpack.c.bf16 %v5706_v39, %v5706_v39  ;;  %v4865_v13 = vadd.f32 %v8747_v44, %v4710_v53  ;;  %v4992_v47 = vmax.f32 %v4864_v37, 0.0 }
 0x1b6   : > { %v4991_v52 = vmax.f32 %v4863_v7, 0.0  ;;  %v1222_v9 = vmul.f32 0.25, %v1131_v61  ;;  %v3997_v45 = vcombine.high %v6392_v33, %v6392_v33  ;;  %v8238_v1 = vrot.slane %v6392_v33, %v6858_v11 }
 0x1b7   : > { %5980 = vst.msk [vmem:[%s7616_s26 + $0x30] sm:$0xf] %vm5966_vm3, %v6306_v57  ;;  %5981 = vst.msk [vmem:[%s7616_s26 + $0x34] sm:$0xf] %vm5966_vm3, %v6307_v55  ;;  %v4993_v43 = vmax.f32 %v4865_v13, 0.0  ;;  %v1044_v36 = vmul.f32 0.25, %v1016_v19  ;;  %v8240_v56 = vadd.f32 %v1190_v38, %v1174_v10  ;;  %v4269_v53 = vcombine.high %v6416_v32, %v6416_v32 }
 0x1b8   : > { %v1045_v48 = vmul.f32 0.25, %v1017_v46  ;;  %v5584_v16 = vcombine.low %v4990_v49, %v4991_v52  ;;  %v8242_v12 = vadd.f32 %v1222_v9, %v1190_v38  ;;  %v4011_v34 = vrot.slane %v3997_v45, %v6858_v11 }
 0x1b9   : > { %v5585_v25 = vcombine.low %v4992_v47, %v4993_v43  ;;  %v4012_v27 = vcombine.high %v8238_v1, %v8238_v1  ;;  %v8248_v29 = vadd.f32 %v1044_v36, %v8816_v3  ;;  %v1558_v6 = vcombine.high %v8240_v56, %v8240_v56 }
 0x1ba   : > { %v8251_v2 = vadd.f32 %v1045_v48, %v8817_v54  ;;  %v5592_v60 = vrot.slane %v5584_v16, %v6858_v11  ;;  %v2486_v4 = vcombine.high %v8242_v12, %v8242_v12  ;;  %v4013_v8 = vcombine.high %v4011_v34, %v4011_v34 }
 0x1bb   : > { %v5599_v0 = vrot.slane %v5585_v25, %v6858_v11  ;;  %v1092_v63 = vrot.slane %v8248_v29, 7  ;;  %v1141_v28 = vrot.slane %v8248_v29, 1  ;;  %v1572_v31 = vrot.slane %v1558_v6, %v8800_v30 }
 0x1bc   : > { %v1142_v42 = vrot.slane %v8251_v2, 1  ;;  %v2500_v24 = vrot.slane %v2486_v4, %v8800_v30  ;;  %v1198_v15 = vmul.f32 0.75, %v8248_v29  ;;  %v8273_v10 = vrot.slane %v6416_v32, %v6858_v11 }
 0x1bd   : > { %v5600_v37 = vcombine.low %v5592_v60, %v5599_v0  ;;  %v1118_v33 = vsel %vm1070_vm2, %v8248_v29, %v1092_v63  ;;  %v1574_v59 = vcombine.high %v1572_v31, %v1572_v31  ;;  %v1588_v39 = vrot.slane %v1572_v31, %v8800_v30 }
 0x1be   : > { %v1143_v61 = vsel %vm1119_vm1, %v1141_v28, %v1142_v42  ;;  %v2502_v7 = vcombine.high %v2500_v24, %v2500_v24  ;;  %v2516_v49 = vrot.slane %v2500_v24, %v8800_v30  ;;  %v1182_v46 = vmul.f32 0.25, %v1118_v33 }
 0x1bf   : > { %v5731_v19 = vrot.slane %v5600_v37, 7  ;;  %v1230_v57 = vmul.f32 0.25, %v1143_v61  ;;  %v8278_v55 = vrot.slane %v4269_v53, %v6858_v11  ;;  %v1602_v13 = vrot.slane %v1574_v59, %v8800_v30 }
 0x1c0   : > { %v1604_v47 = vcombine.high %v1588_v39, %v1588_v39  ;;  %v2530_v52 = vrot.slane %v2502_v7, %v8800_v30  ;;  %v2532_v38 = vcombine.high %v2516_v49, %v2516_v49  ;;  %v3187_v43 = vrot.slane %v2516_v49, %v8797_v21 }
 0x1c1   : > { %v5732_v9 = vsel %vm1070_vm2, %v5729_v18, %v5731_v19  ;;  %v5734_v45 = vsel %vm1070_vm2, %v5731_v19, %v5733_v14  ;;  %v8289_v36 = vadd.f32 %v1198_v15, %v1182_v46  ;;  %v1606_v25 = vcombine.high %v1602_v13, %v1602_v13 }
 0x1c2   : > { %v6326_v48 = vpack.c.bf16 %v5732_v9, %v5732_v9  ;;  %v6327_v16 = vpack.c.bf16 %v5734_v45, %v5734_v45  ;;  %v2534_v32 = vcombine.high %v2530_v52, %v2530_v52  ;;  %v3191_v3 = vrot.slane %v2530_v52, %v8797_v21 }
 0x1c3   : > { %v3195_v54 = vrot.slane %v2532_v38, %v8797_v21  ;;  %v3668_v41 = vsel %vm1070_vm2, %v1588_v39, %v3187_v43  ;;  %v8294_v60 = vadd.f32 %v1230_v57, %v1198_v15  ;;  %v1950_v14 = vcombine.high %v8289_v36, %v8289_v36 }
 0x1c4   : > { %6000 = vst.msk [vmem:[%s7616_s26 + $0x80] sm:$0xf] %vm5966_vm3, %v6326_v48  ;;  %6001 = vst.msk [vmem:[%s7616_s26 + $0x84] sm:$0xf] %vm5966_vm3, %v6327_v16  ;;  %v3199_v18 = vrot.slane %v2534_v32, %v8797_v21  ;;  %v4500_v20 = vadd.f32 %v8238_v1, %v3668_v41  ;;  %v4284_v6 = vcombine.high %v8273_v10, %v8273_v10 }
 0x1c5   : > { %v3669_v4 = vsel %vm1070_vm2, %v1602_v13, %v3191_v3  ;;  %v3670_v0 = vsel %vm1070_vm2, %v1604_v47, %v3195_v54  ;;  %v2878_v28 = vcombine.high %v8294_v60, %v8294_v60  ;;  %v4285_v31 = vcombine.high %v8278_v55, %v8278_v55 }
 0x1c6   : > { %v3671_v24 = vsel %vm1070_vm2, %v1606_v25, %v3199_v18  ;;  %v4501_v15 = vadd.f32 %v4012_v27, %v3669_v4  ;;  %v4502_v1 = vadd.f32 %v4011_v34, %v3670_v0  ;;  %v4655_v53 = vmul.f32 %v6866_v35, %v4500_v20 }
 0x1c7   : > { %v4503_v37 = vadd.f32 %v4013_v8, %v3671_v24  ;;  %v1964_v33 = vrot.slane %v1950_v14, %v8800_v30  ;;  %v2892_v61 = vrot.slane %v2878_v28, %v8800_v30  ;;  %v1565_v59 = vrot.slane %v8240_v56, %v8800_v30 }
 0x1c8   : > { %v4656_v39 = vmul.f32 %v6891_v51, %v4501_v15  ;;  %v4657_v7 = vmul.f32 %v6887_v50, %v4502_v1  ;;  %v4810_v49 = vadd.f32 %v6894_v40, %v4655_v53  ;;  %v2493_v27 = vrot.slane %v8242_v12, %v8800_v30 }
 0x1c9   : > { %v4658_v34 = vmul.f32 %v6919_v26, %v4503_v37  ;;  %v1966_v19 = vcombine.high %v1964_v33, %v1964_v33  ;;  %v1980_v8 = vrot.slane %v1964_v33, %v8800_v30  ;;  %v2894_v46 = vcombine.high %v2892_v61, %v2892_v61 }
 0x1ca   : > { %v4811_v57 = vadd.f32 %v6923_v5, %v4656_v39  ;;  %v4812_v13 = vadd.f32 %v6907_v58, %v4657_v7  ;;  %v4938_v56 = vmax.f32 %v4810_v49, 0.0  ;;  %v2908_v47 = vrot.slane %v2892_v61, %v8800_v30 }
 0x1cb   : > { %v4813_v52 = vadd.f32 %v8747_v44, %v4658_v34  ;;  %v1994_v38 = vrot.slane %v1966_v19, %v8800_v30  ;;  %v1996_v9 = vcombine.high %v1980_v8, %v1980_v8  ;;  %v2922_v12 = vrot.slane %v2894_v46, %v8800_v30 }
 0x1cc   : > { %v4939_v45 = vmax.f32 %v4811_v57, 0.0  ;;  %v4940_v43 = vmax.f32 %v4812_v13, 0.0  ;;  %v2924_v48 = vcombine.high %v2908_v47, %v2908_v47  ;;  %v3443_v16 = vrot.slane %v2908_v47, %v8797_v21 }
 0x1cd   : > { %v4941_v25 = vmax.f32 %v4813_v52, 0.0  ;;  %v1998_v32 = vcombine.high %v1994_v38, %v1994_v38  ;;  %v2926_v3 = vcombine.high %v2922_v12, %v2922_v12  ;;  %v3447_v54 = vrot.slane %v2922_v12, %v8797_v21 }
 0x1ce   : > { %v5363_v41 = vcombine.low %v4938_v56, %v4939_v45  ;;  %v3451_v18 = vrot.slane %v2924_v48, %v8797_v21  ;;  %v3732_v20 = vsel %vm1070_vm2, %v1980_v8, %v3443_v16  ;;  %v1573_v14 = vcombine.high %v1565_v59, %v1565_v59 }
 0x1cf   : > { %v5364_v4 = vcombine.low %v4940_v43, %v4941_v25  ;;  %v3455_v0 = vrot.slane %v2926_v3, %v8797_v21  ;;  %v3733_v28 = vsel %vm1070_vm2, %v1994_v38, %v3447_v54  ;;  %v4564_v24 = vadd.f32 %v8273_v10, %v3732_v20 }
 0x1d0   : > { %v5371_v15 = vrot.slane %v5363_v41, %v6858_v11  ;;  %v3734_v1 = vsel %vm1070_vm2, %v1996_v9, %v3451_v18  ;;  %v4565_v53 = vadd.f32 %v4284_v6, %v3733_v28  ;;  %v1581_v37 = vrot.slane %v1565_v59, %v8800_v30 }
 0x1d1   : > { %v5378_v33 = vrot.slane %v5364_v4, %v6858_v11  ;;  %v3735_v61 = vsel %vm1070_vm2, %v1998_v32, %v3455_v0  ;;  %v4566_v39 = vadd.f32 %v8278_v55, %v3734_v1  ;;  %v4719_v7 = vmul.f32 %v6866_v35, %v4564_v24  ;;  %v907_v55 = vpop.f32.mrf.mxu0 }
 0x1d2   : > { %v4567_v49 = vadd.f32 %v4285_v31, %v3735_v61  ;;  %v4720_v34 = vmul.f32 %v6891_v51, %v4565_v53  ;;  %v1595_v10 = vrot.slane %v1573_v14, %v8800_v30  ;;  %v1603_v19 = vcombine.high %v1581_v37, %v1581_v37 }
 0x1d3   : > { %v8347_v8 = vcombine.low %v5371_v15, %v5378_v33  ;;  %v4721_v6 = vmul.f32 %v6887_v50, %v4566_v39  ;;  %v4874_v59 = vadd.f32 %v6894_v40, %v4719_v7  ;;  %v2501_v46 = vcombine.high %v2493_v27, %v2493_v27 }
 0x1d4   : > { %v4722_v57 = vmul.f32 %v6919_v26, %v4567_v49  ;;  %v4875_v13 = vadd.f32 %v6923_v5, %v4720_v34  ;;  %v1605_v56 = vcombine.high %v1595_v10, %v1595_v10  ;;  %v2509_v31 = vrot.slane %v2493_v27, %v8800_v30 }
 0x1d5   : > { %v5708_v47 = vrot.slane %v8347_v8, 7  ;;  %v4876_v52 = vadd.f32 %v6907_v58, %v4721_v6  ;;  %v5002_v38 = vmax.f32 %v4874_v59, 0.0  ;;  %v2523_v9 = vrot.slane %v2501_v46, %v8800_v30 }
 0x1d6   : > { %v4877_v12 = vadd.f32 %v8747_v44, %v4722_v57  ;;  %v5003_v45 = vmax.f32 %v4875_v13, 0.0  ;;  %v2531_v43 = vcombine.high %v2509_v31, %v2509_v31  ;;  %v3171_v48 = vrot.slane %v2509_v31, %v8797_v21 }
 0x1d7   : > { %v5004_v16 = vmax.f32 %v4876_v52, 0.0  ;;  %v2533_v25 = vcombine.high %v2523_v9, %v2523_v9  ;;  %v3175_v32 = vrot.slane %v2523_v9, %v8797_v21  ;;  %v3980_v3 = vcombine.high %v907_v55, %v907_v55  ;;  %v987_v52 = vpop.f32.mrf.mxu1 }
 0x1d8   : > { %v5005_v54 = vmax.f32 %v4877_v12, 0.0  ;;  %v5635_v27 = vcombine.low %v5002_v38, %v5003_v45  ;;  %v3179_v41 = vrot.slane %v2531_v43, %v8797_v21  ;;  %v3664_v18 = vsel %vm1070_vm2, %v1581_v37, %v3171_v48 }
 0x1d9   : > { %v3183_v20 = vrot.slane %v2533_v25, %v8797_v21  ;;  %v3665_v14 = vsel %vm1070_vm2, %v1595_v10, %v3175_v32  ;;  %v3987_v4 = vrot.slane %v907_v55, %v6858_v11  ;;  %v3994_v0 = vrot.slane %v3980_v3, %v6858_v11 }
 0x1da   : > { %v5636_v28 = vcombine.low %v5004_v16, %v5005_v54  ;;  %v5643_v24 = vrot.slane %v5635_v27, %v6858_v11  ;;  %v3666_v15 = vsel %vm1070_vm2, %v1603_v19, %v3179_v41  ;;  %v1957_v1 = vrot.slane %v8289_v36, %v8800_v30 }
 0x1db   : > { %v3667_v53 = vsel %vm1070_vm2, %v1605_v56, %v3183_v20  ;;  %v3995_v33 = vcombine.high %v3987_v4, %v3987_v4  ;;  %v3996_v37 = vcombine.high %v3994_v0, %v3994_v0  ;;  %v4496_v61 = vadd.f32 %v3987_v4, %v3664_v18 }
 0x1dc   : > { %v5650_v39 = vrot.slane %v5636_v28, %v6858_v11  ;;  %v4498_v7 = vadd.f32 %v3994_v0, %v3666_v15  ;;  %v1965_v49 = vcombine.high %v1957_v1, %v1957_v1  ;;  %v1973_v34 = vrot.slane %v1957_v1, %v8800_v30 }
 0x1dd   : > { %v4497_v10 = vadd.f32 %v3995_v33, %v3665_v14  ;;  %v4499_v6 = vadd.f32 %v3996_v37, %v3667_v53  ;;  %v4651_v59 = vmul.f32 %v6866_v35, %v4496_v61  ;;  %v2885_v19 = vrot.slane %v8294_v60, %v8800_v30 }
 0x1de   : > { %v8376_v46 = vcombine.low %v5643_v24, %v5650_v39  ;;  %v4653_v36 = vmul.f32 %v6887_v50, %v4498_v7  ;;  %v1987_v57 = vrot.slane %v1965_v49, %v8800_v30  ;;  %v1995_v13 = vcombine.high %v1973_v34, %v1973_v34 }
 0x1df   : > { %v4652_v55 = vmul.f32 %v6891_v51, %v4497_v10  ;;  %v4654_v56 = vmul.f32 %v6919_v26, %v4499_v6  ;;  %v4806_v31 = vadd.f32 %v6894_v40, %v4651_v59  ;;  %v2893_v38 = vcombine.high %v2885_v19, %v2885_v19 }
 0x1e0   : > { %v5736_v9 = vrot.slane %v8376_v46, 7  ;;  %v4808_v12 = vadd.f32 %v6907_v58, %v4653_v36  ;;  %v1997_v60 = vcombine.high %v1987_v57, %v1987_v57  ;;  %v2901_v45 = vrot.slane %v2885_v19, %v8800_v30 }
 0x1e1   : > { %v4807_v43 = vadd.f32 %v6923_v5, %v4652_v55  ;;  %v4809_v48 = vadd.f32 %v8747_v44, %v4654_v56  ;;  %v4934_v16 = vmax.f32 %v4806_v31, 0.0  ;;  %v2915_v25 = vrot.slane %v2893_v38, %v8800_v30 }
 0x1e2   : > { %v4936_v32 = vmax.f32 %v4808_v12, 0.0  ;;  %v2923_v3 = vcombine.high %v2901_v45, %v2901_v45  ;;  %v3427_v54 = vrot.slane %v2901_v45, %v8797_v21  ;;  %v4252_v27 = vcombine.high %v987_v52, %v987_v52 }
 0x1e3   : > { %v4935_v41 = vmax.f32 %v4807_v43, 0.0  ;;  %v4937_v18 = vmax.f32 %v4809_v48, 0.0  ;;  %v2925_v20 = vcombine.high %v2915_v25, %v2915_v25  ;;  %v3431_v14 = vrot.slane %v2915_v25, %v8797_v21 }
 0x1e4   : > { %v3435_v4 = vrot.slane %v2923_v3, %v8797_v21  ;;  %v3728_v0 = vsel %vm1070_vm2, %v1973_v34, %v3427_v54  ;;  %v4259_v28 = vrot.slane %v987_v52, %v6858_v11  ;;  %v4266_v24 = vrot.slane %v4252_v27, %v6858_v11 }
 0x1e5   : > { %v5346_v15 = vcombine.low %v4934_v16, %v4935_v41  ;;  %v5347_v1 = vcombine.low %v4936_v32, %v4937_v18  ;;  %v3439_v53 = vrot.slane %v2925_v20, %v8797_v21  ;;  %v3729_v33 = vsel %vm1070_vm2, %v1987_v57, %v3431_v14 }
 0x1e6   : > { %v3730_v37 = vsel %vm1070_vm2, %v1995_v13, %v3435_v4  ;;  %v4267_v61 = vcombine.high %v4259_v28, %v4259_v28  ;;  %v4268_v39 = vcombine.high %v4266_v24, %v4266_v24  ;;  %v4560_v7 = vadd.f32 %v4259_v28, %v3728_v0  ;;  %v6395_v13 = vpop.f32.mrf.mxu0 }
 0x1e7   : > { %v5354_v49 = vrot.slane %v5346_v15, %v6858_v11  ;;  %v5361_v10 = vrot.slane %v5347_v1, %v6858_v11  ;;  %v3731_v34 = vsel %vm1070_vm2, %v1997_v60, %v3439_v53  ;;  %v4562_v6 = vadd.f32 %v4266_v24, %v3730_v37 }
 0x1e8   : > { %v4561_v59 = vadd.f32 %v4267_v61, %v3729_v33  ;;  %v4563_v19 = vadd.f32 %v4268_v39, %v3731_v34  ;;  %v4715_v36 = vmul.f32 %v6866_v35, %v4560_v7  ;;  %v1081_v55 = vrot.slane %v8203_v23, 7 }
 0x1e9   : > { %v5362_v56 = vcombine.low %v5354_v49, %v5361_v10  ;;  %v4717_v57 = vmul.f32 %v6887_v50, %v4562_v6  ;;  %v1163_v31 = vsel %vm1119_vm1, %v1130_v62, %v8203_v23  ;;  %v1191_v52 = vmul.f32 0.75, %v8203_v23  ;;  %v6419_v49 = vpop.f32.mrf.mxu1 }
 0x1ea   : > { %v4716_v38 = vmul.f32 %v6891_v51, %v4561_v59  ;;  %v4718_v12 = vmul.f32 %v6919_v26, %v4563_v19  ;;  %v4870_v60 = vadd.f32 %v6894_v40, %v4715_v36  ;;  %v1082_v45 = vsel %vm1070_vm2, %v1080_v22, %v1081_v55 }
 0x1eb   : > { %v5707_v43 = vrot.slane %v5362_v56, 7  ;;  %v4872_v48 = vadd.f32 %v6907_v58, %v4717_v57  ;;  %v1175_v16 = vmul.f32 0.25, %v1082_v45  ;;  %v1223_v25 = vmul.f32 0.25, %v1163_v31 }
 0x1ec   : > { %v4871_v32 = vadd.f32 %v6923_v5, %v4716_v38  ;;  %v4873_v23 = vadd.f32 %v8747_v44, %v4718_v12  ;;  %v4998_v62 = vmax.f32 %v4870_v60, 0.0  ;;  %v4031_v3 = vcombine.high %v6395_v13, %v6395_v13 }
 0x1ed   : > { %v5709_v54 = vsel %vm1070_vm2, %v5707_v43, %v5708_v47  ;;  %v5785_v17 = vsel %vm1070_vm2, 0.0, %v5707_v43  ;;  %v5000_v22 = vmax.f32 %v4872_v48, 0.0  ;;  %v8422_v27 = vadd.f32 %v1191_v52, %v1175_v16 }
 0x1ee   : > { %v6309_v41 = vpack.c.bf16 %v5785_v17, %v5785_v17  ;;  %v6310_v18 = vpack.c.bf16 %v5709_v54, %v5709_v54  ;;  %v4999_v20 = vmax.f32 %v4871_v32, 0.0  ;;  %v5001_v14 = vmax.f32 %v4873_v23, 0.0 }
 0x1ef   : > { %v8424_v4 = vadd.f32 %v1223_v25, %v1191_v52  ;;  %v1607_v0 = vcombine.high %v8422_v27, %v8422_v27  ;;  %v4038_v28 = vrot.slane %v6395_v13, %v6858_v11  ;;  %v8430_v24 = vrot.slane %v4031_v3, %v6858_v11 }
 0x1f0   : > { %5983 = vst.msk [vmem:[%s7616_s26 + $0x3c] sm:$0xf] %vm5966_vm3, %v6309_v41  ;;  %5984 = vst.msk [vmem:[%s7616_s26 + $0x40] sm:$0xf] %vm5966_vm3, %v6310_v18  ;;  %v5618_v15 = vcombine.low %v4998_v62, %v4999_v20  ;;  %v5619_v1 = vcombine.low %v5000_v22, %v5001_v14  ;;  %v1093_v53 = vrot.slane %v8251_v2, 7  ;;  %v1167_v33 = vsel %vm1119_vm1, %v1142_v42, %v8251_v2 }
 0x1f1   : > { %v1621_v37 = vrot.slane %v1607_v0, %v8800_v30  ;;  %v2535_v61 = vcombine.high %v8424_v4, %v8424_v4  ;;  %v4046_v39 = vcombine.high %v4038_v28, %v4038_v28  ;;  %v4047_v7 = vcombine.high %v8430_v24, %v8430_v24 }
 0x1f2   : > { %v5626_v10 = vrot.slane %v5618_v15, %v6858_v11  ;;  %v5633_v34 = vrot.slane %v5619_v1, %v6858_v11  ;;  %v1094_v6 = vsel %vm1070_vm2, %v1092_v63, %v1093_v53  ;;  %v1199_v42 = vmul.f32 0.75, %v8251_v2 }
 0x1f3   : > { %v1623_v59 = vcombine.high %v1621_v37, %v1621_v37  ;;  %v1637_v19 = vrot.slane %v1621_v37, %v8800_v30  ;;  %v2549_v36 = vrot.slane %v2535_v61, %v8800_v30  ;;  %v1183_v55 = vmul.f32 0.25, %v1094_v6 }
 0x1f4   : > { %v5634_v56 = vcombine.low %v5626_v10, %v5633_v34  ;;  %v1231_v57 = vmul.f32 0.25, %v1167_v33  ;;  %v4303_v13 = vcombine.high %v6419_v49, %v6419_v49  ;;  %v8455_v31 = vrot.slane %v6419_v49, %v6858_v11 }
 0x1f5   : > { %v1651_v52 = vrot.slane %v1623_v59, %v8800_v30  ;;  %v1653_v38 = vcombine.high %v1637_v19, %v1637_v19  ;;  %v2551_v29 = vcombine.high %v2549_v36, %v2549_v36  ;;  %v2565_v63 = vrot.slane %v2549_v36, %v8800_v30 }
 0x1f6   : > { %v5735_v12 = vrot.slane %v5634_v56, 7  ;;  %v8459_v2 = vadd.f32 %v1199_v42, %v1183_v55  ;;  %v8461_v60 = vadd.f32 %v1231_v57, %v1199_v42  ;;  %v8464_v45 = vrot.slane %v4303_v13, %v6858_v11 }
 0x1f7   : > { %v1655_v43 = vcombine.high %v1651_v52, %v1651_v52  ;;  %v2579_v48 = vrot.slane %v2551_v29, %v8800_v30  ;;  %v2581_v16 = vcombine.high %v2565_v63, %v2565_v63  ;;  %v3219_v25 = vrot.slane %v2565_v63, %v8797_v21 }
 0x1f8   : > { %v5737_v32 = vsel %vm1070_vm2, %v5735_v12, %v5736_v9  ;;  %v5789_v23 = vsel %vm1070_vm2, 0.0, %v5735_v12  ;;  %v1999_v62 = vcombine.high %v8459_v2, %v8459_v2  ;;  %v2927_v3 = vcombine.high %v8461_v60, %v8461_v60 }
 0x1f9   : > { %v6329_v54 = vpack.c.bf16 %v5789_v23, %v5789_v23  ;;  %v6330_v17 = vpack.c.bf16 %v5737_v32, %v5737_v32  ;;  %v2583_v22 = vcombine.high %v2579_v48, %v2579_v48  ;;  %v3223_v41 = vrot.slane %v2579_v48, %v8797_v21 }
 0x1fa   : > { %v3227_v18 = vrot.slane %v2581_v16, %v8797_v21  ;;  %v3676_v20 = vsel %vm1070_vm2, %v1637_v19, %v3219_v25  ;;  %v2013_v14 = vrot.slane %v1999_v62, %v8800_v30  ;;  %v2941_v0 = vrot.slane %v2927_v3, %v8800_v30 }
 0x1fb   : > { %6003 = vst.msk [vmem:[%s7616_s26 + $0x8c] sm:$0xf] %vm5966_vm3, %v6329_v54  ;;  %6004 = vst.msk [vmem:[%s7616_s26 + $0x90] sm:$0xf] %vm5966_vm3, %v6330_v17  ;;  %v3231_v15 = vrot.slane %v2583_v22, %v8797_v21  ;;  %v3677_v1 = vsel %vm1070_vm2, %v1651_v52, %v3223_v41  ;;  %v4508_v53 = vadd.f32 %v4038_v28, %v3676_v20 }
 0x1fc   : > { %v4318_v33 = vcombine.high %v8455_v31, %v8455_v31  ;;  %v3678_v37 = vsel %vm1070_vm2, %v1653_v38, %v3227_v18  ;;  %v4509_v61 = vadd.f32 %v4046_v39, %v3677_v1  ;;  %v2015_v49 = vcombine.high %v2013_v14, %v2013_v14 }
 0x1fd   : > { %v2029_v10 = vrot.slane %v2013_v14, %v8800_v30  ;;  %v3679_v34 = vsel %vm1070_vm2, %v1655_v43, %v3231_v15  ;;  %v4510_v6 = vadd.f32 %v8430_v24, %v3678_v37  ;;  %v4663_v42 = vmul.f32 %v6866_v35, %v4508_v53 }
 0x1fe   : > { %v2943_v59 = vcombine.high %v2941_v0, %v2941_v0  ;;  %v4511_v19 = vadd.f32 %v4047_v7, %v3679_v34  ;;  %v4664_v36 = vmul.f32 %v6891_v51, %v4509_v61  ;;  %v2043_v28 = vrot.slane %v2015_v49, %v8800_v30 }
 0x1ff   : > { %v2045_v55 = vcombine.high %v2029_v10, %v2029_v10  ;;  %v4665_v56 = vmul.f32 %v6887_v50, %v4510_v6  ;;  %v4818_v39 = vadd.f32 %v6894_v40, %v4663_v42  ;;  %v2957_v57 = vrot.slane %v2941_v0, %v8800_v30 }
 0x200   : > { %v2971_v13 = vrot.slane %v2943_v59, %v8800_v30  ;;  %v4666_v52 = vmul.f32 %v6919_v26, %v4511_v19  ;;  %v4819_v24 = vadd.f32 %v6923_v5, %v4664_v36  ;;  %v2047_v38 = vcombine.high %v2043_v28, %v2043_v28 }
 0x201   : > { %v4319_v7 = vcombine.high %v8464_v45, %v8464_v45  ;;  %v4820_v29 = vadd.f32 %v6907_v58, %v4665_v56  ;;  %v4946_v63 = vmax.f32 %v4818_v39, 0.0  ;;  %v2973_v12 = vcombine.high %v2957_v57, %v2957_v57  ;;  %v917_v39 = vpop.f32.mrf.mxu0 }
 0x202   : > { %v2975_v43 = vcombine.high %v2971_v13, %v2971_v13  ;;  %v4821_v48 = vadd.f32 %v8747_v44, %v4666_v52  ;;  %v4947_v16 = vmax.f32 %v4819_v24, 0.0  ;;  %v3475_v25 = vrot.slane %v2957_v57, %v8797_v21 }
 0x203   : > { %v3479_v32 = vrot.slane %v2971_v13, %v8797_v21  ;;  %v4948_v23 = vmax.f32 %v4820_v29, 0.0  ;;  %v3483_v62 = vrot.slane %v2973_v12, %v8797_v21  ;;  %v1614_v54 = vrot.slane %v8422_v27, %v8800_v30 }
 0x204   : > { %v3487_v3 = vrot.slane %v2975_v43, %v8797_v21  ;;  %v4949_v17 = vmax.f32 %v4821_v48, 0.0  ;;  %v5397_v22 = vcombine.low %v4946_v63, %v4947_v16  ;;  %v3740_v41 = vsel %vm1070_vm2, %v2029_v10, %v3475_v25 }
 0x205   : > { %v3741_v18 = vsel %vm1070_vm2, %v2043_v28, %v3479_v32  ;;  %v3742_v20 = vsel %vm1070_vm2, %v2045_v55, %v3483_v62  ;;  %v4572_v0 = vadd.f32 %v8455_v31, %v3740_v41  ;;  %v1622_v10 = vcombine.high %v1614_v54, %v1614_v54 }
 0x206   : > { %v3743_v14 = vsel %vm1070_vm2, %v2047_v38, %v3487_v3  ;;  %v4573_v15 = vadd.f32 %v4318_v33, %v3741_v18  ;;  %v5398_v1 = vcombine.low %v4948_v23, %v4949_v17  ;;  %v5405_v53 = vrot.slane %v5397_v22, %v6858_v11 }
 0x207   : > { %v4574_v37 = vadd.f32 %v8464_v45, %v3742_v20  ;;  %v4575_v61 = vadd.f32 %v4319_v7, %v3743_v14  ;;  %v4727_v27 = vmul.f32 %v6866_v35, %v4572_v0  ;;  %v1630_v34 = vrot.slane %v1614_v54, %v8800_v30 }
 0x208   : > { %v4728_v49 = vmul.f32 %v6891_v51, %v4573_v15  ;;  %v5412_v6 = vrot.slane %v5398_v1, %v6858_v11  ;;  %v2542_v33 = vrot.slane %v8424_v4, %v8800_v30  ;;  %v1644_v19 = vrot.slane %v1622_v10, %v8800_v30 }
 0x209   : > { %v4729_v42 = vmul.f32 %v6887_v50, %v4574_v37  ;;  %v4730_v31 = vmul.f32 %v6919_v26, %v4575_v61  ;;  %v4882_v59 = vadd.f32 %v6894_v40, %v4727_v27  ;;  %v1652_v36 = vcombine.high %v1630_v34, %v1630_v34 }
 0x20a   : > { %v4883_v45 = vadd.f32 %v6923_v5, %v4728_v49  ;;  %v8530_v28 = vcombine.low %v5405_v53, %v5412_v6  ;;  %v2550_v57 = vcombine.high %v2542_v33, %v2542_v33  ;;  %v1654_v24 = vcombine.high %v1644_v19, %v1644_v19 }
 0x20b   : > { %v4884_v55 = vadd.f32 %v6907_v58, %v4729_v42  ;;  %v4885_v56 = vadd.f32 %v8747_v44, %v4730_v31  ;;  %v5010_v13 = vmax.f32 %v4882_v59, 0.0  ;;  %v2558_v4 = vrot.slane %v2542_v33, %v8800_v30 }
 0x20c   : > { %v5011_v52 = vmax.f32 %v4883_v45, 0.0  ;;  %v5712_v38 = vrot.slane %v8530_v28, 7  ;;  %v2572_v63 = vrot.slane %v2550_v57, %v8800_v30  ;;  %v4014_v16 = vcombine.high %v917_v39, %v917_v39  ;;  %v997_v57 = vpop.f32.mrf.mxu1 }
 0x20d   : > { %v5012_v7 = vmax.f32 %v4884_v55, 0.0  ;;  %v5013_v29 = vmax.f32 %v4885_v56, 0.0  ;;  %v2580_v43 = vcombine.high %v2558_v4, %v2558_v4  ;;  %v3203_v48 = vrot.slane %v2558_v4, %v8797_v21 }
 0x20e   : > { %v5669_v12 = vcombine.low %v5010_v13, %v5011_v52  ;;  %v5793_v25 = vsel %vm1070_vm2, %v5712_v38, 0.0  ;;  %v2582_v23 = vcombine.high %v2572_v63, %v2572_v63  ;;  %v3207_v62 = vrot.slane %v2572_v63, %v8797_v21 }
 0x20f   : > { %v5670_v32 = vcombine.low %v5012_v7, %v5013_v29  ;;  %v6313_v3 = vpack.c.bf16 %v5793_v25, %v5793_v25  ;;  %v3211_v17 = vrot.slane %v2580_v43, %v8797_v21  ;;  %v3672_v22 = vsel %vm1070_vm2, %v1630_v34, %v3203_v48 }
 0x210   : > { %v5677_v54 = vrot.slane %v5669_v12, %v6858_v11  ;;  %v3215_v18 = vrot.slane %v2582_v23, %v8797_v21  ;;  %v3673_v20 = vsel %vm1070_vm2, %v1644_v19, %v3207_v62  ;;  %v4021_v14 = vrot.slane %v917_v39, %v6858_v11 }
 0x211   : > { %v5684_v41 = vrot.slane %v5670_v32, %v6858_v11  ;;  %5987 = vst.msk [vmem:[%s7616_s26 + $0x4c] sm:$0x1] %vm5971_vm4, %v6313_v3  ;;  %v3674_v0 = vsel %vm1070_vm2, %v1652_v36, %v3211_v17  ;;  %v4028_v15 = vrot.slane %v4014_v16, %v6858_v11  ;;  %v2006_v1 = vrot.slane %v8459_v2, %v8800_v30 }
 0x212   : > { %v2934_v53 = vrot.slane %v8461_v60, %v8800_v30  ;;  %v3675_v61 = vsel %vm1070_vm2, %v1654_v24, %v3215_v18  ;;  %v4029_v27 = vcombine.high %v4021_v14, %v4021_v14  ;;  %v4504_v49 = vadd.f32 %v4021_v14, %v3672_v22 }
 0x213   : > { %v8557_v37 = vcombine.low %v5677_v54, %v5684_v41  ;;  %v4030_v10 = vcombine.high %v4028_v15, %v4028_v15  ;;  %v4506_v34 = vadd.f32 %v4028_v15, %v3674_v0  ;;  %v2014_v6 = vcombine.high %v2006_v1, %v2006_v1 }
 0x214   : > { %v2022_v42 = vrot.slane %v2006_v1, %v8800_v30  ;;  %v4505_v33 = vadd.f32 %v4029_v27, %v3673_v20  ;;  %v4659_v59 = vmul.f32 %v6866_v35, %v4504_v49  ;;  %v2942_v2 = vcombine.high %v2934_v53, %v2934_v53 }
 0x215   : > { %v5740_v31 = vrot.slane %v8557_v37, 7  ;;  %v4507_v45 = vadd.f32 %v4030_v10, %v3675_v61  ;;  %v4661_v60 = vmul.f32 %v6887_v50, %v4506_v34  ;;  %v2036_v19 = vrot.slane %v2014_v6, %v8800_v30 }
 0x216   : > { %v2044_v36 = vcombine.high %v2022_v42, %v2022_v42  ;;  %v4660_v56 = vmul.f32 %v6891_v51, %v4505_v33  ;;  %v4814_v39 = vadd.f32 %v6894_v40, %v4659_v59  ;;  %v2950_v13 = vrot.slane %v2934_v53, %v8800_v30 }
 0x217   : > { %v5797_v55 = vsel %vm1070_vm2, %v5740_v31, 0.0  ;;  %v4662_v24 = vmul.f32 %v6919_v26, %v4507_v45  ;;  %v4816_v4 = vadd.f32 %v6907_v58, %v4661_v60  ;;  %v2046_v7 = vcombine.high %v2036_v19, %v2036_v19 }
 0x218   : > { %v6333_v52 = vpack.c.bf16 %v5797_v55, %v5797_v55  ;;  %v4815_v29 = vadd.f32 %v6923_v5, %v4660_v56  ;;  %v4942_v63 = vmax.f32 %v4814_v39, 0.0  ;;  %v2964_v12 = vrot.slane %v2942_v2, %v8800_v30 }
 0x219   : > { %v2972_v43 = vcombine.high %v2950_v13, %v2950_v13  ;;  %v4817_v48 = vadd.f32 %v8747_v44, %v4662_v24  ;;  %v4944_v16 = vmax.f32 %v4816_v4, 0.0  ;;  %v3459_v25 = vrot.slane %v2950_v13, %v8797_v21 }
 0x21a   : > { %6007 = vst.msk [vmem:[%s7616_s26 + $0x9c] sm:$0x1] %vm5971_vm4, %v6333_v52  ;;  %v4286_v32 = vcombine.high %v997_v57, %v997_v57  ;;  %v4943_v23 = vmax.f32 %v4815_v29, 0.0  ;;  %v2974_v62 = vcombine.high %v2964_v12, %v2964_v12  ;;  %v3463_v3 = vrot.slane %v2964_v12, %v8797_v21 }
 0x21b   : > { %v3467_v54 = vrot.slane %v2972_v43, %v8797_v21  ;;  %v4945_v17 = vmax.f32 %v4817_v48, 0.0  ;;  %v3736_v22 = vsel %vm1070_vm2, %v2022_v42, %v3459_v25  ;;  %v4293_v30 = vrot.slane %v997_v57, %v6858_v11 }
 0x21c   : > { %v4300_v41 = vrot.slane %v4286_v32, %v6858_v11  ;;  %v5380_v18 = vcombine.low %v4942_v63, %v4943_v23  ;;  %v3471_v20 = vrot.slane %v2974_v62, %v8797_v21  ;;  %v3737_v14 = vsel %vm1070_vm2, %v2036_v19, %v3463_v3 }
 0x21d   : > { %v3738_v0 = vsel %vm1070_vm2, %v2044_v36, %v3467_v54  ;;  %v5381_v15 = vcombine.low %v4944_v16, %v4945_v17  ;;  %v4301_v1 = vcombine.high %v4293_v30, %v4293_v30  ;;  %v4568_v61 = vadd.f32 %v4293_v30, %v3736_v22 }
 0x21e   : > { %v4302_v53 = vcombine.high %v4300_v41, %v4300_v41  ;;  %v5388_v27 = vrot.slane %v5380_v18, %v6858_v11  ;;  %v3739_v49 = vsel %vm1070_vm2, %v2046_v7, %v3471_v20  ;;  %v4570_v10 = vadd.f32 %v4300_v41, %v3738_v0 }
 0x21f   : > { %v5395_v34 = vrot.slane %v5381_v15, %v6858_v11  ;;  %v4569_v6 = vadd.f32 %v4301_v1, %v3737_v14  ;;  %v4723_v33 = vmul.f32 %v6866_v35, %v4568_v61 }
 0x220   : > { %v4571_v42 = vadd.f32 %v4302_v53, %v3739_v49  ;;  %v4725_v21 = vmul.f32 %v6887_v50, %v4570_v10 }
 0x221   : > { %v5396_v59 = vcombine.low %v5388_v27, %v5395_v34  ;;  %v4724_v2 = vmul.f32 %v6891_v51, %v4569_v6  ;;  %v4878_v60 = vadd.f32 %v6894_v40, %v4723_v33 }
 0x222   : > { %v4726_v45 = vmul.f32 %v6919_v26, %v4571_v42  ;;  %v4880_v19 = vadd.f32 %v6907_v58, %v4725_v21 }
 0x223   : > { %v5710_v36 = vrot.slane %v5396_v59, 7  ;;  %v4879_v55 = vadd.f32 %v6923_v5, %v4724_v2  ;;  %v5006_v39 = vmax.f32 %v4878_v60, 0.0 }
 0x224   : > { %v4881_v56 = vadd.f32 %v8747_v44, %v4726_v45  ;;  %v5008_v35 = vmax.f32 %v4880_v19, 0.0 }
 0x225   : > { %v5711_v50 = vsel %vm1070_vm2, %v5708_v47, %v5710_v36  ;;  %v5713_v51 = vsel %vm1070_vm2, %v5710_v36, %v5712_v38  ;;  %v5007_v26 = vmax.f32 %v4879_v55, 0.0 }
 0x226   : > { %v5009_v40 = vmax.f32 %v4881_v56, 0.0  ;;  %v6311_v58 = vpack.c.bf16 %v5711_v50, %v5711_v50  ;;  %v6312_v57 = vpack.c.bf16 %v5713_v51, %v5713_v51 }
 0x227   : > { %v5652_v13 = vcombine.low %v5006_v39, %v5007_v26 }
 0x228   : > { %v5653_v5 = vcombine.low %v5008_v35, %v5009_v40  ;;  %5985 = vst.msk [vmem:[%s7616_s26 + $0x44] sm:$0xf] %vm5966_vm3, %v6311_v58  ;;  %5986 = vst.msk [vmem:[%s7616_s26 + $0x48] sm:$0xf] %vm5966_vm3, %v6312_v57 }
 0x229   : > { %v5660_v44 = vrot.slane %v5652_v13, %v6858_v11 }
 0x22a   : > { %v5667_v8 = vrot.slane %v5653_v5, %v6858_v11 }
 0x22c   : > { %v5668_v47 = vcombine.low %v5660_v44, %v5667_v8 }
 0x22e   : > { %v5738_v28 = vrot.slane %v5668_v47, 7 }
 0x230   : > { %v5739_v38 = vsel %vm1070_vm2, %v5736_v9, %v5738_v28  ;;  %v5741_v52 = vsel %vm1070_vm2, %v5738_v28, %v5740_v31 }
 0x231   : > { %v6331_v24 = vpack.c.bf16 %v5739_v38, %v5739_v38  ;;  %v6332_v4 = vpack.c.bf16 %v5741_v52, %v5741_v52 }
 0x233   : > { %6005 = vst.msk [vmem:[%s7616_s26 + $0x94] sm:$0xf] %vm5966_vm3, %v6331_v24  ;;  %6006 = vst.msk [vmem:[%s7616_s26 + $0x98] sm:$0xf] %vm5966_vm3, %v6332_v4 }
 0x234 PF: > { %s19_s13 = sadd.s32 1, %s6506_s13   ;;  %s8818_s30 = smov %s6498_s11 }
 0x235   : > { %p16_p11 = scmp.ge.s32.totalorder %s19_s13, 10   ;;  %s8819_s10 = smov %s6502_s12 }
 0x236   : > { %s8820_s11 = smov %s8823_s14  ;;  %s8821_s12 = smov %s8827_s15 }
 0x237   :  { %18 = sbr.rel (!%p16_p11) target bundleno = 3 (0x3), region = 95 }

</bundles_post_ra>
